<compile_context>
chip_gen: v7x
topology: tpu7x:2x2x1
jax: 0.10.0
libtpu: 0.0.40
codegen_flags: <defaults>
</compile_context>

<pallas_src>
import functools
import math

import jax
import jax.numpy as jnp
from jax import lax
from jax.experimental import pallas as pl
from jax.experimental.pallas import tpu as pltpu


# ----------------------------------------------------------------------------
# Helpers
# ----------------------------------------------------------------------------

def _vmem():
    # whole-array block resident in VMEM (everything here is tiny)
    return pl.BlockSpec(memory_space=pltpu.MemorySpace.VMEM)


def _layernorm(x, g, b, eps):
    mu = jnp.mean(x, axis=-1, keepdims=True)
    var = jnp.mean((x - mu) ** 2, axis=-1, keepdims=True)
    return (x - mu) * lax.rsqrt(var + eps) * g + b


# ----------------------------------------------------------------------------
# Kernel 1: conv-GEMM + ReLU + mean-over-H + projector (fused head)
# ----------------------------------------------------------------------------

def _head_kernel(patch_ref, convw_ref, convb_ref, poolh_ref, projw_ref,
                 projb_ref, o_ref):
    # conv as GEMM (bf16 in, f32 accumulate) + ReLU
    feat = jnp.dot(patch_ref[...], convw_ref[...],
                   preferred_element_type=jnp.float32)
    feat = jnp.maximum(feat + convb_ref[...], 0.0)            # (B*H*W, Cf)
    # mean over H as a pooling matmul -> (B*S, Cf), stays in VMEM
    seq = jnp.dot(poolh_ref[...], feat.astype(poolh_ref.dtype),
                  preferred_element_type=jnp.float32)
    # projector
    h = jnp.dot(seq.astype(projw_ref.dtype), projw_ref[...],
                preferred_element_type=jnp.float32)
    o_ref[...] = h + projb_ref[...]                           # (B*S, D) lane-dense


def fused_head(patches, conv_w, conv_b, pool_h, proj_w, proj_b):
    M = pool_h.shape[0]
    D = proj_w.shape[1]
    return pl.pallas_call(
        _head_kernel,
        out_shape=jax.ShapeDtypeStruct((M, D), jnp.float32),
        in_specs=[_vmem()] * 6,
        out_specs=_vmem(),
    )(patches, conv_w, conv_b.reshape(1, -1), pool_h, proj_w,
      proj_b.reshape(1, -1))


# ----------------------------------------------------------------------------
# Kernel 2: one fused TransformerEncoderLayer (post-norm, ReLU FFN)
# ----------------------------------------------------------------------------

def _layer_kernel(x_ref, wqkv_ref, bqkv_ref, wo_ref, bo_ref, g1_ref, bt1_ref,
                  wff1_ref, bff1_ref, wff2_ref, bff2_ref, g2_ref, bt2_ref,
                  o_ref, attn_scr, *, B, S, num_heads, eps):
    # TODO(synk): torch's default dropout(p=0.1) is omitted (eval semantics).
    x = x_ref[...]                                            # (B*S, D) f32
    D = x.shape[1]
    Dh = D // num_heads
    scale = 1.0 / math.sqrt(Dh)
    cdt = wqkv_ref.dtype                                      # bf16 compute dtype

    # --- QKV projection (columns: [q | k | v], head-contiguous) ---
    qkv = jnp.dot(x.astype(cdt), wqkv_ref[...],
                  preferred_element_type=jnp.float32) + bqkv_ref[...]

    # --- per (batch, head) attention, fully unrolled (B*heads = 8) ---
    for b in range(B):
        r0, r1 = b * S, (b + 1) * S
        for h in range(num_heads):
            c0, c1 = h * Dh, (h + 1) * Dh
            q = qkv[r0:r1, c0:c1].astype(cdt)                 # (S, Dh)
            k = qkv[r0:r1, D + c0:D + c1].astype(cdt)
            v = qkv[r0:r1, 2 * D + c0:2 * D + c1].astype(cdt)
            # contract last dims directly (no explicit K transpose)
            s = lax.dot_general(q, k, (((1,), (1,)), ((), ())),
                                preferred_element_type=jnp.float32) * scale
            m = jnp.max(s, axis=-1, keepdims=True)
            p = jnp.exp(s - m)
            p = p * pl.reciprocal(jnp.sum(p, axis=-1, keepdims=True),
                                  approx=True)
            attn_scr[r0:r1, c0:c1] = jnp.dot(
                p.astype(cdt), v, preferred_element_type=jnp.float32)

    # --- out projection + add & norm ---
    attn = jnp.dot(attn_scr[...].astype(cdt), wo_ref[...],
                   preferred_element_type=jnp.float32) + bo_ref[...]
    h1 = _layernorm(x + attn, g1_ref[...], bt1_ref[...], eps)

    # --- FFN + add & norm ---
    ff = jnp.dot(h1.astype(cdt), wff1_ref[...],
                 preferred_element_type=jnp.float32) + bff1_ref[...]
    ff = jnp.maximum(ff, 0.0)
    ff = jnp.dot(ff.astype(cdt), wff2_ref[...],
                 preferred_element_type=jnp.float32) + bff2_ref[...]
    o_ref[...] = _layernorm(h1 + ff, g2_ref[...], bt2_ref[...], eps)


def fused_transformer_layer(x, p, *, B, S, num_heads, eps=1e-5):
    M, D = x.shape
    return pl.pallas_call(
        functools.partial(_layer_kernel, B=B, S=S, num_heads=num_heads, eps=eps),
        out_shape=jax.ShapeDtypeStruct((M, D), jnp.float32),
        in_specs=[_vmem()] * 13,
        out_specs=_vmem(),
        scratch_shapes=[pltpu.VMEM((M, D), jnp.float32)],
    )(x,
      p["w_qkv"], p["b_qkv"].reshape(1, -1),
      p["w_o"], p["b_o"].reshape(1, -1),
      p["g1"].reshape(1, -1), p["bt1"].reshape(1, -1),
      p["w_ff1"], p["b_ff1"].reshape(1, -1),
      p["w_ff2"], p["b_ff2"].reshape(1, -1),
      p["g2"].reshape(1, -1), p["bt2"].reshape(1, -1))


# ----------------------------------------------------------------------------
# Kernel 3: mean-over-S + classifier (Linear+ReLU+Linear+Sigmoid), fused
# ----------------------------------------------------------------------------

def _tail_kernel(h_ref, pools_ref, w1_ref, b1_ref, w2_ref, b2_ref, o_ref):
    pooled = jnp.dot(pools_ref[...], h_ref[...].astype(pools_ref.dtype),
                     preferred_element_type=jnp.float32)      # (B, D)
    c = jnp.dot(pooled.astype(w1_ref.dtype), w1_ref[...],
                preferred_element_type=jnp.float32) + b1_ref[...]
    c = jnp.maximum(c, 0.0)                                   # (B, 128) in VMEM
    y = jnp.dot(c, w2_ref[...],                               # f32 x f32 (N=1)
                preferred_element_type=jnp.float32) + b2_ref[...]
    o_ref[...] = jax.nn.sigmoid(y)                            # (B, 1)


def fused_tail(h, pool_s, w1, b1, w2, b2):
    B = pool_s.shape[0]
    return pl.pallas_call(
        _tail_kernel,
        out_shape=jax.ShapeDtypeStruct((B, 1), jnp.float32),
        in_specs=[_vmem()] * 6,
        out_specs=_vmem(),
    )(h, pool_s, w1, b1.reshape(1, -1), w2, b2.reshape(1, -1))


# ----------------------------------------------------------------------------
# Model glue (im2col, pooling matrices) in plain JAX
# ----------------------------------------------------------------------------

def im2col_3x3(x):
    """x: (B, Cin, H, W) NCHW -> (B*H*W, Cin*9), pad=1, stride=1.
    Row order (b, h, w); feature order (cin, kh, kw)."""
    B, C, H, W = x.shape
    xp = jnp.pad(x, ((0, 0), (0, 0), (1, 1), (1, 1)))
    cols = [xp[:, :, dh:dh + H, dw:dw + W] for dh in range(3) for dw in range(3)]
    patches = jnp.stack(cols, axis=-1)                  # (B, C, H, W, 9)
    patches = patches.transpose(0, 2, 3, 1, 4)          # (B, H, W, C, 9)
    return patches.reshape(B * H * W, C * 9)


def mean_pool_h_matrix(B, H, W, dtype):
    """(B*W, B*H*W) matrix averaging over H for rows ordered (b, h, w)."""
    r = jnp.arange(B * W)[:, None]
    c = jnp.arange(B * H * W)[None, :]
    hit = (c // (H * W) == r // W) & (c % W == r % W)
    return jnp.where(hit, 1.0 / H, 0.0).astype(dtype)


def mean_pool_s_matrix(B, S, dtype):
    """(B, B*S) matrix averaging over the sequence for rows ordered (b, s)."""
    r = jnp.arange(B)[:, None]
    c = jnp.arange(B * S)[None, :]
    return jnp.where(c // S == r, 1.0 / S, 0.0).astype(dtype)


def seed_model_forward(x, params, *, num_heads):
    B, Cin, H, W = x.shape
    S = W
    cdt = params["proj_w"].dtype                        # bf16 compute dtype

    # --- frozen CNN backbone + mean(dim=2) + permute + projector, fused ---
    patches = im2col_3x3(x).astype(cdt)
    pool_h = mean_pool_h_matrix(B, H, W, cdt)
    h = fused_head(patches, params["conv_w2d"], params["conv_b"], pool_h,
                   params["proj_w"], params["proj_b"])  # (B*S, D) f32

    # --- transformer encoder (one fused kernel per layer) ---
    for layer_p in params["layers"]:
        h = fused_transformer_layer(h, layer_p, B=B, S=S, num_heads=num_heads)

    # --- pool over sequence + classifier, fused ---
    pool_s = mean_pool_s_matrix(B, S, cdt)
    out = fused_tail(h, pool_s, params["cls_w1"], params["cls_b1"],
                     params["cls_w2"], params["cls_b2"])
    return out[:, 0]                                    # squeeze(1) -> (B,)


# ----------------------------------------------------------------------------
# Deterministic parameter init (matrices bf16, biases / LN params f32)
# ----------------------------------------------------------------------------

def init_params(key, *, cin, cnn_output_dim, transformer_dim, num_heads,
                num_layers, ffn_dim):
    def nrm(k, shape, scale=0.05, dtype=jnp.bfloat16):
        return (scale * jax.random.normal(k, shape)).astype(dtype)

    keys = jax.random.split(key, 8 + num_layers)
    D, F = transformer_dim, ffn_dim
    params = {
        # conv weight stored pre-flattened as (Cin*9, Cout)
        "conv_w2d": nrm(keys[0], (cin * 9, cnn_output_dim)),
        "conv_b": jnp.zeros((cnn_output_dim,), jnp.float32),
        "proj_w": nrm(keys[1], (cnn_output_dim, D)),
        "proj_b": jnp.zeros((D,), jnp.float32),
        "cls_w1": nrm(keys[2], (D, 128)),
        "cls_b1": jnp.zeros((128,), jnp.float32),
        "cls_w2": nrm(keys[3], (128, 1), dtype=jnp.float32),
        "cls_b2": jnp.zeros((1,), jnp.float32),
        "layers": [],
    }
    for li in range(num_layers):
        lk = jax.random.split(keys[8 + li], 4)
        params["layers"].append({
            "w_qkv": nrm(lk[0], (D, 3 * D)),
            "b_qkv": jnp.zeros((3 * D,), jnp.float32),
            "w_o": nrm(lk[1], (D, D)),
            "b_o": jnp.zeros((D,), jnp.float32),
            "g1": jnp.ones((D,), jnp.float32),
            "bt1": jnp.zeros((D,), jnp.float32),
            "w_ff1": nrm(lk[2], (D, F)),
            "b_ff1": jnp.zeros((F,), jnp.float32),
            "w_ff2": nrm(lk[3], (F, D)),
            "b_ff2": jnp.zeros((D,), jnp.float32),
            "g2": jnp.ones((D,), jnp.float32),
            "bt2": jnp.zeros((D,), jnp.float32),
        })
    return params


# ----------------------------------------------------------------------------
# Main
# ----------------------------------------------------------------------------

if __name__ == "__main__":
    B, CIN, H, W = 2, 4, 16, 16        # input (NCHW), seq length = W = 16
    CNN_OUT = 32                       # synthetic cnn_output_dim
    D_MODEL, N_HEADS, N_LAYERS, FFN = 256, 4, 2, 512

    root = jax.random.PRNGKey(0)
    k_x, k_p = jax.random.split(root)

    x = jax.random.normal(k_x, (B, CIN, H, W), dtype=jnp.float32)
    params = init_params(k_p, cin=CIN, cnn_output_dim=CNN_OUT,
                         transformer_dim=D_MODEL, num_heads=N_HEADS,
                         num_layers=N_LAYERS, ffn_dim=FFN)

    fwd = jax.jit(functools.partial(seed_model_forward, num_heads=N_HEADS))
    y = fwd(x, params)
    y = jax.block_until_ready(y)

    assert y.shape == (B,)
    assert bool(jnp.all(jnp.isfinite(y)))
    assert bool(jnp.all((y >= 0.0) & (y <= 1.0)))   # sigmoid output
    print("KERNEL_OK")
</pallas_src>

<mosaic_0001>
module attributes {stable_mosaic.version = 11 : i64} {
  func.func @_head_kernel(%arg0: memref<512x36xbf16, #tpu.memory_space<vmem>>, %arg1: memref<36x32xbf16, #tpu.memory_space<vmem>>, %arg2: memref<1x32xf32, #tpu.memory_space<vmem>>, %arg3: memref<32x512xbf16, #tpu.memory_space<vmem>>, %arg4: memref<32x256xbf16, #tpu.memory_space<vmem>>, %arg5: memref<1x256xf32, #tpu.memory_space<vmem>>, %arg6: memref<32x256xf32, #tpu.memory_space<vmem>>) attributes {dimension_semantics = [], scalar_prefetch = 0 : i64, scratch_operands = 0 : i64, tpu.core_type = #tpu.core_type<tc>} {
    %c0 = arith.constant 0 : index
    %c0_0 = arith.constant 0 : index
    %0 = vector.load %arg0[%c0, %c0_0] : memref<512x36xbf16, #tpu.memory_space<vmem>>, vector<512x36xbf16>
    %c0_1 = arith.constant 0 : index
    %c0_2 = arith.constant 0 : index
    %1 = vector.load %arg1[%c0_1, %c0_2] : memref<36x32xbf16, #tpu.memory_space<vmem>>, vector<36x32xbf16>
    %cst = arith.constant dense<0.000000e+00> : vector<512x32xf32>
    %2 = tpu.matmul %0, %1, %cst {dimension_numbers = #tpu.dot_dimension_numbers<[1], [0], [0], [1], [0, 0, 1, 1], [], []>} : vector<512x36xbf16>, vector<36x32xbf16>, vector<512x32xf32> -> vector<512x32xf32>
    %c0_3 = arith.constant 0 : index
    %c0_4 = arith.constant 0 : index
    %3 = vector.load %arg2[%c0_3, %c0_4] : memref<1x32xf32, #tpu.memory_space<vmem>>, vector<1x32xf32>
    %4 = vector.broadcast %3 : vector<1x32xf32> to vector<512x32xf32>
    %5 = arith.addf %2, %4 : vector<512x32xf32>
    %cst_5 = arith.constant 0.000000e+00 : f32
    %6 = vector.broadcast %cst_5 : f32 to vector<512x32xf32>
    %7 = arith.maximumf %5, %6 : vector<512x32xf32>
    %c0_6 = arith.constant 0 : index
    %c0_7 = arith.constant 0 : index
    %8 = vector.load %arg3[%c0_6, %c0_7] : memref<32x512xbf16, #tpu.memory_space<vmem>>, vector<32x512xbf16>
    %9 = arith.truncf %7 : vector<512x32xf32> to vector<512x32xbf16>
    %cst_8 = arith.constant dense<0.000000e+00> : vector<32x32xf32>
    %10 = tpu.matmul %8, %9, %cst_8 {dimension_numbers = #tpu.dot_dimension_numbers<[1], [0], [0], [1], [0, 0, 1, 1], [], []>} : vector<32x512xbf16>, vector<512x32xbf16>, vector<32x32xf32> -> vector<32x32xf32>
    %11 = arith.truncf %10 : vector<32x32xf32> to vector<32x32xbf16>
    %c0_9 = arith.constant 0 : index
    %c0_10 = arith.constant 0 : index
    %12 = vector.load %arg4[%c0_9, %c0_10] : memref<32x256xbf16, #tpu.memory_space<vmem>>, vector<32x256xbf16>
    %cst_11 = arith.constant dense<0.000000e+00> : vector<32x256xf32>
    %13 = tpu.matmul %11, %12, %cst_11 {dimension_numbers = #tpu.dot_dimension_numbers<[1], [0], [0], [1], [0, 0, 1, 1], [], []>} : vector<32x32xbf16>, vector<32x256xbf16>, vector<32x256xf32> -> vector<32x256xf32>
    %c0_12 = arith.constant 0 : index
    %c0_13 = arith.constant 0 : index
    %14 = vector.load %arg5[%c0_12, %c0_13] : memref<1x256xf32, #tpu.memory_space<vmem>>, vector<1x256xf32>
    %15 = vector.broadcast %14 : vector<1x256xf32> to vector<32x256xf32>
    %16 = arith.addf %13, %15 : vector<32x256xf32>
    %c0_14 = arith.constant 0 : index
    %c0_15 = arith.constant 0 : index
    %17 = vector.load %arg6[%c0_14, %c0_15] : memref<32x256xf32, #tpu.memory_space<vmem>>, vector<32x256xf32>
    tpu.vector_store %arg6[%c0_14, %c0_15], %16 {strides = array<i32>} : memref<32x256xf32, #tpu.memory_space<vmem>>, vector<32x256xf32>,
    return
  }
}

module attributes {stable_mosaic.version = 11 : i64} {
  func.func @_tail_kernel(%arg0: memref<32x256xf32, #tpu.memory_space<vmem>>, %arg1: memref<2x32xbf16, #tpu.memory_space<vmem>>, %arg2: memref<256x128xbf16, #tpu.memory_space<vmem>>, %arg3: memref<1x128xf32, #tpu.memory_space<vmem>>, %arg4: memref<128x1xf32, #tpu.memory_space<vmem>>, %arg5: memref<1x1xf32, #tpu.memory_space<vmem>>, %arg6: memref<2x1xf32, #tpu.memory_space<vmem>>) attributes {dimension_semantics = [], scalar_prefetch = 0 : i64, scratch_operands = 0 : i64, tpu.core_type = #tpu.core_type<tc>} {
    %c0 = arith.constant 0 : index
    %c0_0 = arith.constant 0 : index
    %0 = vector.load %arg1[%c0, %c0_0] : memref<2x32xbf16, #tpu.memory_space<vmem>>, vector<2x32xbf16>
    %c0_1 = arith.constant 0 : index
    %c0_2 = arith.constant 0 : index
    %1 = vector.load %arg0[%c0_1, %c0_2] : memref<32x256xf32, #tpu.memory_space<vmem>>, vector<32x256xf32>
    %2 = arith.truncf %1 : vector<32x256xf32> to vector<32x256xbf16>
    %cst = arith.constant dense<0.000000e+00> : vector<2x256xf32>
    %3 = tpu.matmul %0, %2, %cst {dimension_numbers = #tpu.dot_dimension_numbers<[1], [0], [0], [1], [0, 0, 1, 1], [], []>} : vector<2x32xbf16>, vector<32x256xbf16>, vector<2x256xf32> -> vector<2x256xf32>
    %4 = arith.truncf %3 : vector<2x256xf32> to vector<2x256xbf16>
    %c0_3 = arith.constant 0 : index
    %c0_4 = arith.constant 0 : index
    %5 = vector.load %arg2[%c0_3, %c0_4] : memref<256x128xbf16, #tpu.memory_space<vmem>>, vector<256x128xbf16>
    %cst_5 = arith.constant dense<0.000000e+00> : vector<2x128xf32>
    %6 = tpu.matmul %4, %5, %cst_5 {dimension_numbers = #tpu.dot_dimension_numbers<[1], [0], [0], [1], [0, 0, 1, 1], [], []>} : vector<2x256xbf16>, vector<256x128xbf16>, vector<2x128xf32> -> vector<2x128xf32>
    %c0_6 = arith.constant 0 : index
    %c0_7 = arith.constant 0 : index
    %7 = vector.load %arg3[%c0_6, %c0_7] : memref<1x128xf32, #tpu.memory_space<vmem>>, vector<1x128xf32>
    %8 = vector.broadcast %7 : vector<1x128xf32> to vector<2x128xf32>
    %9 = arith.addf %6, %8 : vector<2x128xf32>
    %cst_8 = arith.constant 0.000000e+00 : f32
    %10 = vector.broadcast %cst_8 : f32 to vector<2x128xf32>
    %11 = arith.maximumf %9, %10 : vector<2x128xf32>
    %c0_9 = arith.constant 0 : index
    %c0_10 = arith.constant 0 : index
    %12 = vector.load %arg4[%c0_9, %c0_10] : memref<128x1xf32, #tpu.memory_space<vmem>>, vector<128x1xf32>
    %cst_11 = arith.constant dense<0.000000e+00> : vector<2x1xf32>
    %13 = tpu.matmul %11, %12, %cst_11 {dimension_numbers = #tpu.dot_dimension_numbers<[1], [0], [0], [1], [0, 0, 1, 1], [], []>} : vector<2x128xf32>, vector<128x1xf32>, vector<2x1xf32> -> vector<2x1xf32>
    %c0_12 = arith.constant 0 : index
    %c0_13 = arith.constant 0 : index
    %14 = vector.load %arg5[%c0_12, %c0_13] : memref<1x1xf32, #tpu.memory_space<vmem>>, vector<1x1xf32>
    %15 = vector.broadcast %14 : vector<1x1xf32> to vector<2x1xf32>
    %16 = arith.addf %13, %15 : vector<2x1xf32>
    %17 = arith.negf %16 : vector<2x1xf32>
    %18 = math.exp %17 : vector<2x1xf32>
    %cst_14 = arith.constant 1.000000e+00 : f32
    %19 = vector.broadcast %cst_14 : f32 to vector<2x1xf32>
    %20 = arith.addf %19, %18 : vector<2x1xf32>
    %21 = arith.divf %19, %20 : vector<2x1xf32>
    %c0_15 = arith.constant 0 : index
    %c0_16 = arith.constant 0 : index
    %22 = vector.load %arg6[%c0_15, %c0_16] : memref<2x1xf32, #tpu.memory_space<vmem>>, vector<2x1xf32>
    tpu.vector_store %arg6[%c0_15, %c0_16], %21 {strides = array<i32>} : memref<2x1xf32, #tpu.memory_space<vmem>>, vector<2x1xf32>,
    return
  }
}

module attributes {stable_mosaic.version = 11 : i64} {
  func.func @_layer_kernel(%arg0: memref<32x256xf32, #tpu.memory_space<vmem>>, %arg1: memref<256x768xbf16, #tpu.memory_space<vmem>>, %arg2: memref<1x768xf32, #tpu.memory_space<vmem>>, %arg3: memref<256x256xbf16, #tpu.memory_space<vmem>>, %arg4: memref<1x256xf32, #tpu.memory_space<vmem>>, %arg5: memref<1x256xf32, #tpu.memory_space<vmem>>, %arg6: memref<1x256xf32, #tpu.memory_space<vmem>>, %arg7: memref<256x512xbf16, #tpu.memory_space<vmem>>, %arg8: memref<1x512xf32, #tpu.memory_space<vmem>>, %arg9: memref<512x256xbf16, #tpu.memory_space<vmem>>, %arg10: memref<1x256xf32, #tpu.memory_space<vmem>>, %arg11: memref<1x256xf32, #tpu.memory_space<vmem>>, %arg12: memref<1x256xf32, #tpu.memory_space<vmem>>, %arg13: memref<32x256xf32, #tpu.memory_space<vmem>>, %arg14: memref<32x256xf32, #tpu.memory_space<vmem>>) attributes {dimension_semantics = [], scalar_prefetch = 0 : i64, scratch_operands = 1 : i64, tpu.core_type = #tpu.core_type<tc>} {
    %c0 = arith.constant 0 : index
    %c0_0 = arith.constant 0 : index
    %0 = vector.load %arg0[%c0, %c0_0] : memref<32x256xf32, #tpu.memory_space<vmem>>, vector<32x256xf32>
    %1 = arith.truncf %0 : vector<32x256xf32> to vector<32x256xbf16>
    %c0_1 = arith.constant 0 : index
    %c0_2 = arith.constant 0 : index
    %2 = vector.load %arg1[%c0_1, %c0_2] : memref<256x768xbf16, #tpu.memory_space<vmem>>, vector<256x768xbf16>
    %cst = arith.constant dense<0.000000e+00> : vector<32x768xf32>
    %3 = tpu.matmul %1, %2, %cst {dimension_numbers = #tpu.dot_dimension_numbers<[1], [0], [0], [1], [0, 0, 1, 1], [], []>} : vector<32x256xbf16>, vector<256x768xbf16>, vector<32x768xf32> -> vector<32x768xf32>
    %c0_3 = arith.constant 0 : index
    %c0_4 = arith.constant 0 : index
    %4 = vector.load %arg2[%c0_3, %c0_4] : memref<1x768xf32, #tpu.memory_space<vmem>>, vector<1x768xf32>
    %5 = vector.broadcast %4 : vector<1x768xf32> to vector<32x768xf32>
    %6 = arith.addf %3, %5 : vector<32x768xf32>
    %7 = vector.extract_strided_slice %6 {offsets = [0, 0], sizes = [16, 64], strides = [1, 1]} : vector<32x768xf32> to vector<16x64xf32>
    %8 = arith.truncf %7 : vector<16x64xf32> to vector<16x64xbf16>
    %9 = vector.extract_strided_slice %6 {offsets = [0, 256], sizes = [16, 64], strides = [1, 1]} : vector<32x768xf32> to vector<16x64xf32>
    %10 = arith.truncf %9 : vector<16x64xf32> to vector<16x64xbf16>
    %11 = vector.extract_strided_slice %6 {offsets = [0, 512], sizes = [16, 64], strides = [1, 1]} : vector<32x768xf32> to vector<16x64xf32>
    %12 = arith.truncf %11 : vector<16x64xf32> to vector<16x64xbf16>
    %cst_5 = arith.constant dense<0.000000e+00> : vector<16x16xf32>
    %13 = tpu.matmul %8, %10, %cst_5 {dimension_numbers = #tpu.dot_dimension_numbers<[1], [1], [0], [0], [0, 0, 1, 0], [], []>} : vector<16x64xbf16>, vector<16x64xbf16>, vector<16x16xf32> -> vector<16x16xf32>
    %cst_6 = arith.constant 1.250000e-01 : f32
    %14 = vector.broadcast %cst_6 : f32 to vector<16x16xf32>
    %15 = arith.mulf %13, %14 : vector<16x16xf32>
    %cst_7 = arith.constant dense<0xFF800000> : vector<16xf32>
    %16 = vector.multi_reduction <maximumf>, %15, %cst_7 [1] : vector<16x16xf32> to vector<16xf32>
    %17 = vector.shape_cast %16 : vector<16xf32> to vector<16x1xf32>
    %18 = vector.broadcast %17 : vector<16x1xf32> to vector<16x16xf32>
    %19 = arith.subf %15, %18 : vector<16x16xf32>
    %20 = math.exp %19 : vector<16x16xf32>
    %cst_8 = arith.constant dense<0.000000e+00> : vector<16xf32>
    %21 = vector.multi_reduction <add>, %20, %cst_8 [1] : vector<16x16xf32> to vector<16xf32>
    %22 = vector.shape_cast %21 : vector<16xf32> to vector<16x1xf32>
    %23 = tpu.reciprocal %22 {approx = true} : vector<16x1xf32> -> vector<16x1xf32>
    %24 = vector.broadcast %23 : vector<16x1xf32> to vector<16x16xf32>
    %25 = arith.mulf %20, %24 : vector<16x16xf32>
    %26 = arith.truncf %25 : vector<16x16xf32> to vector<16x16xbf16>
    %cst_9 = arith.constant dense<0.000000e+00> : vector<16x64xf32>
    %27 = tpu.matmul %26, %12, %cst_9 {dimension_numbers = #tpu.dot_dimension_numbers<[1], [0], [0], [1], [0, 0, 1, 1], [], []>} : vector<16x16xbf16>, vector<16x64xbf16>, vector<16x64xf32> -> vector<16x64xf32>
    %c0_10 = arith.constant 0 : index
    %c0_11 = arith.constant 0 : index
    %28 = vector.load %arg14[%c0_10, %c0_11] : memref<32x256xf32, #tpu.memory_space<vmem>>, vector<16x64xf32>
    tpu.vector_store %arg14[%c0_10, %c0_11], %27 {strides = array<i32>} : memref<32x256xf32, #tpu.memory_space<vmem>>, vector<16x64xf32>,
    %29 = vector.extract_strided_slice %6 {offsets = [0, 64], sizes = [16, 64], strides = [1, 1]} : vector<32x768xf32> to vector<16x64xf32>
    %30 = arith.truncf %29 : vector<16x64xf32> to vector<16x64xbf16>
    %31 = vector.extract_strided_slice %6 {offsets = [0, 320], sizes = [16, 64], strides = [1, 1]} : vector<32x768xf32> to vector<16x64xf32>
    %32 = arith.truncf %31 : vector<16x64xf32> to vector<16x64xbf16>
    %33 = vector.extract_strided_slice %6 {offsets = [0, 576], sizes = [16, 64], strides = [1, 1]} : vector<32x768xf32> to vector<16x64xf32>
    %34 = arith.truncf %33 : vector<16x64xf32> to vector<16x64xbf16>
    %cst_12 = arith.constant dense<0.000000e+00> : vector<16x16xf32>
    %35 = tpu.matmul %30, %32, %cst_12 {dimension_numbers = #tpu.dot_dimension_numbers<[1], [1], [0], [0], [0, 0, 1, 0], [], []>} : vector<16x64xbf16>, vector<16x64xbf16>, vector<16x16xf32> -> vector<16x16xf32>
    %cst_13 = arith.constant 1.250000e-01 : f32
    %36 = vector.broadcast %cst_13 : f32 to vector<16x16xf32>
    %37 = arith.mulf %35, %36 : vector<16x16xf32>
    %cst_14 = arith.constant dense<0xFF800000> : vector<16xf32>
    %38 = vector.multi_reduction <maximumf>, %37, %cst_14 [1] : vector<16x16xf32> to vector<16xf32>
    %39 = vector.shape_cast %38 : vector<16xf32> to vector<16x1xf32>
    %40 = vector.broadcast %39 : vector<16x1xf32> to vector<16x16xf32>
    %41 = arith.subf %37, %40 : vector<16x16xf32>
    %42 = math.exp %41 : vector<16x16xf32>
    %cst_15 = arith.constant dense<0.000000e+00> : vector<16xf32>
    %43 = vector.multi_reduction <add>, %42, %cst_15 [1] : vector<16x16xf32> to vector<16xf32>
    %44 = vector.shape_cast %43 : vector<16xf32> to vector<16x1xf32>
    %45 = tpu.reciprocal %44 {approx = true} : vector<16x1xf32> -> vector<16x1xf32>
    %46 = vector.broadcast %45 : vector<16x1xf32> to vector<16x16xf32>
    %47 = arith.mulf %42, %46 : vector<16x16xf32>
    %48 = arith.truncf %47 : vector<16x16xf32> to vector<16x16xbf16>
    %cst_16 = arith.constant dense<0.000000e+00> : vector<16x64xf32>
    %49 = tpu.matmul %48, %34, %cst_16 {dimension_numbers = #tpu.dot_dimension_numbers<[1], [0], [0], [1], [0, 0, 1, 1], [], []>} : vector<16x16xbf16>, vector<16x64xbf16>, vector<16x64xf32> -> vector<16x64xf32>
    %c0_17 = arith.constant 0 : index
    %c64 = arith.constant 64 : index
    %50 = vector.load %arg14[%c0_17, %c64] : memref<32x256xf32, #tpu.memory_space<vmem>>, vector<16x64xf32>
    tpu.vector_store %arg14[%c0_17, %c64], %49 {strides = array<i32>} : memref<32x256xf32, #tpu.memory_space<vmem>>, vector<16x64xf32>,
    %51 = vector.extract_strided_slice %6 {offsets = [0, 128], sizes = [16, 64], strides = [1, 1]} : vector<32x768xf32> to vector<16x64xf32>
    %52 = arith.truncf %51 : vector<16x64xf32> to vector<16x64xbf16>
    %53 = vector.extract_strided_slice %6 {offsets = [0, 384], sizes = [16, 64], strides = [1, 1]} : vector<32x768xf32> to vector<16x64xf32>
    %54 = arith.truncf %53 : vector<16x64xf32> to vector<16x64xbf16>
    %55 = vector.extract_strided_slice %6 {offsets = [0, 640], sizes = [16, 64], strides = [1, 1]} : vector<32x768xf32> to vector<16x64xf32>
    %56 = arith.truncf %55 : vector<16x64xf32> to vector<16x64xbf16>
    %cst_18 = arith.constant dense<0.000000e+00> : vector<16x16xf32>
    %57 = tpu.matmul %52, %54, %cst_18 {dimension_numbers = #tpu.dot_dimension_numbers<[1], [1], [0], [0], [0, 0, 1, 0], [], []>} : vector<16x64xbf16>, vector<16x64xbf16>, vector<16x16xf32> -> vector<16x16xf32>
    %cst_19 = arith.constant 1.250000e-01 : f32
    %58 = vector.broadcast %cst_19 : f32 to vector<16x16xf32>
    %59 = arith.mulf %57, %58 : vector<16x16xf32>
    %cst_20 = arith.constant dense<0xFF800000> : vector<16xf32>
    %60 = vector.multi_reduction <maximumf>, %59, %cst_20 [1] : vector<16x16xf32> to vector<16xf32>
    %61 = vector.shape_cast %60 : vector<16xf32> to vector<16x1xf32>
    %62 = vector.broadcast %61 : vector<16x1xf32> to vector<16x16xf32>
    %63 = arith.subf %59, %62 : vector<16x16xf32>
    %64 = math.exp %63 : vector<16x16xf32>
    %cst_21 = arith.constant dense<0.000000e+00> : vector<16xf32>
    %65 = vector.multi_reduction <add>, %64, %cst_21 [1] : vector<16x16xf32> to vector<16xf32>
    %66 = vector.shape_cast %65 : vector<16xf32> to vector<16x1xf32>
    %67 = tpu.reciprocal %66 {approx = true} : vector<16x1xf32> -> vector<16x1xf32>
    %68 = vector.broadcast %67 : vector<16x1xf32> to vector<16x16xf32>
    %69 = arith.mulf %64, %68 : vector<16x16xf32>
    %70 = arith.truncf %69 : vector<16x16xf32> to vector<16x16xbf16>
    %cst_22 = arith.constant dense<0.000000e+00> : vector<16x64xf32>
    %71 = tpu.matmul %70, %56, %cst_22 {dimension_numbers = #tpu.dot_dimension_numbers<[1], [0], [0], [1], [0, 0, 1, 1], [], []>} : vector<16x16xbf16>, vector<16x64xbf16>, vector<16x64xf32> -> vector<16x64xf32>
    %c0_23 = arith.constant 0 : index
    %c128 = arith.constant 128 : index
    %72 = vector.load %arg14[%c0_23, %c128] : memref<32x256xf32, #tpu.memory_space<vmem>>, vector<16x64xf32>
    tpu.vector_store %arg14[%c0_23, %c128], %71 {strides = array<i32>} : memref<32x256xf32, #tpu.memory_space<vmem>>, vector<16x64xf32>,
    %73 = vector.extract_strided_slice %6 {offsets = [0, 192], sizes = [16, 64], strides = [1, 1]} : vector<32x768xf32> to vector<16x64xf32>
    %74 = arith.truncf %73 : vector<16x64xf32> to vector<16x64xbf16>
    %75 = vector.extract_strided_slice %6 {offsets = [0, 448], sizes = [16, 64], strides = [1, 1]} : vector<32x768xf32> to vector<16x64xf32>
    %76 = arith.truncf %75 : vector<16x64xf32> to vector<16x64xbf16>
    %77 = vector.extract_strided_slice %6 {offsets = [0, 704], sizes = [16, 64], strides = [1, 1]} : vector<32x768xf32> to vector<16x64xf32>
    %78 = arith.truncf %77 : vector<16x64xf32> to vector<16x64xbf16>
    %cst_24 = arith.constant dense<0.000000e+00> : vector<16x16xf32>
    %79 = tpu.matmul %74, %76, %cst_24 {dimension_numbers = #tpu.dot_dimension_numbers<[1], [1], [0], [0], [0, 0, 1, 0], [], []>} : vector<16x64xbf16>, vector<16x64xbf16>, vector<16x16xf32> -> vector<16x16xf32>
    %cst_25 = arith.constant 1.250000e-01 : f32
    %80 = vector.broadcast %cst_25 : f32 to vector<16x16xf32>
    %81 = arith.mulf %79, %80 : vector<16x16xf32>
    %cst_26 = arith.constant dense<0xFF800000> : vector<16xf32>
    %82 = vector.multi_reduction <maximumf>, %81, %cst_26 [1] : vector<16x16xf32> to vector<16xf32>
    %83 = vector.shape_cast %82 : vector<16xf32> to vector<16x1xf32>
    %84 = vector.broadcast %83 : vector<16x1xf32> to vector<16x16xf32>
    %85 = arith.subf %81, %84 : vector<16x16xf32>
    %86 = math.exp %85 : vector<16x16xf32>
    %cst_27 = arith.constant dense<0.000000e+00> : vector<16xf32>
    %87 = vector.multi_reduction <add>, %86, %cst_27 [1] : vector<16x16xf32> to vector<16xf32>
    %88 = vector.shape_cast %87 : vector<16xf32> to vector<16x1xf32>
    %89 = tpu.reciprocal %88 {approx = true} : vector<16x1xf32> -> vector<16x1xf32>
    %90 = vector.broadcast %89 : vector<16x1xf32> to vector<16x16xf32>
    %91 = arith.mulf %86, %90 : vector<16x16xf32>
    %92 = arith.truncf %91 : vector<16x16xf32> to vector<16x16xbf16>
    %cst_28 = arith.constant dense<0.000000e+00> : vector<16x64xf32>
    %93 = tpu.matmul %92, %78, %cst_28 {dimension_numbers = #tpu.dot_dimension_numbers<[1], [0], [0], [1], [0, 0, 1, 1], [], []>} : vector<16x16xbf16>, vector<16x64xbf16>, vector<16x64xf32> -> vector<16x64xf32>
    %c0_29 = arith.constant 0 : index
    %c192 = arith.constant 192 : index
    %94 = vector.load %arg14[%c0_29, %c192] : memref<32x256xf32, #tpu.memory_space<vmem>>, vector<16x64xf32>
    tpu.vector_store %arg14[%c0_29, %c192], %93 {strides = array<i32>} : memref<32x256xf32, #tpu.memory_space<vmem>>, vector<16x64xf32>,
    %95 = vector.extract_strided_slice %6 {offsets = [16, 0], sizes = [16, 64], strides = [1, 1]} : vector<32x768xf32> to vector<16x64xf32>
    %96 = arith.truncf %95 : vector<16x64xf32> to vector<16x64xbf16>
    %97 = vector.extract_strided_slice %6 {offsets = [16, 256], sizes = [16, 64], strides = [1, 1]} : vector<32x768xf32> to vector<16x64xf32>
    %98 = arith.truncf %97 : vector<16x64xf32> to vector<16x64xbf16>
    %99 = vector.extract_strided_slice %6 {offsets = [16, 512], sizes = [16, 64], strides = [1, 1]} : vector<32x768xf32> to vector<16x64xf32>
    %100 = arith.truncf %99 : vector<16x64xf32> to vector<16x64xbf16>
    %cst_30 = arith.constant dense<0.000000e+00> : vector<16x16xf32>
    %101 = tpu.matmul %96, %98, %cst_30 {dimension_numbers = #tpu.dot_dimension_numbers<[1], [1], [0], [0], [0, 0, 1, 0], [], []>} : vector<16x64xbf16>, vector<16x64xbf16>, vector<16x16xf32> -> vector<16x16xf32>
    %cst_31 = arith.constant 1.250000e-01 : f32
    %102 = vector.broadcast %cst_31 : f32 to vector<16x16xf32>
    %103 = arith.mulf %101, %102 : vector<16x16xf32>
    %cst_32 = arith.constant dense<0xFF800000> : vector<16xf32>
    %104 = vector.multi_reduction <maximumf>, %103, %cst_32 [1] : vector<16x16xf32> to vector<16xf32>
    %105 = vector.shape_cast %104 : vector<16xf32> to vector<16x1xf32>
    %106 = vector.broadcast %105 : vector<16x1xf32> to vector<16x16xf32>
    %107 = arith.subf %103, %106 : vector<16x16xf32>
    %108 = math.exp %107 : vector<16x16xf32>
    %cst_33 = arith.constant dense<0.000000e+00> : vector<16xf32>
    %109 = vector.multi_reduction <add>, %108, %cst_33 [1] : vector<16x16xf32> to vector<16xf32>
    %110 = vector.shape_cast %109 : vector<16xf32> to vector<16x1xf32>
    %111 = tpu.reciprocal %110 {approx = true} : vector<16x1xf32> -> vector<16x1xf32>
    %112 = vector.broadcast %111 : vector<16x1xf32> to vector<16x16xf32>
    %113 = arith.mulf %108, %112 : vector<16x16xf32>
    %114 = arith.truncf %113 : vector<16x16xf32> to vector<16x16xbf16>
    %cst_34 = arith.constant dense<0.000000e+00> : vector<16x64xf32>
    %115 = tpu.matmul %114, %100, %cst_34 {dimension_numbers = #tpu.dot_dimension_numbers<[1], [0], [0], [1], [0, 0, 1, 1], [], []>} : vector<16x16xbf16>, vector<16x64xbf16>, vector<16x64xf32> -> vector<16x64xf32>
    %c16 = arith.constant 16 : index
    %c0_35 = arith.constant 0 : index
    %116 = vector.load %arg14[%c16, %c0_35] : memref<32x256xf32, #tpu.memory_space<vmem>>, vector<16x64xf32>
    tpu.vector_store %arg14[%c16, %c0_35], %115 {strides = array<i32>} : memref<32x256xf32, #tpu.memory_space<vmem>>, vector<16x64xf32>,
    %117 = vector.extract_strided_slice %6 {offsets = [16, 64], sizes = [16, 64], strides = [1, 1]} : vector<32x768xf32> to vector<16x64xf32>
    %118 = arith.truncf %117 : vector<16x64xf32> to vector<16x64xbf16>
    %119 = vector.extract_strided_slice %6 {offsets = [16, 320], sizes = [16, 64], strides = [1, 1]} : vector<32x768xf32> to vector<16x64xf32>
    %120 = arith.truncf %119 : vector<16x64xf32> to vector<16x64xbf16>
    %121 = vector.extract_strided_slice %6 {offsets = [16, 576], sizes = [16, 64], strides = [1, 1]} : vector<32x768xf32> to vector<16x64xf32>
    %122 = arith.truncf %121 : vector<16x64xf32> to vector<16x64xbf16>
    %cst_36 = arith.constant dense<0.000000e+00> : vector<16x16xf32>
    %123 = tpu.matmul %118, %120, %cst_36 {dimension_numbers = #tpu.dot_dimension_numbers<[1], [1], [0], [0], [0, 0, 1, 0], [], []>} : vector<16x64xbf16>, vector<16x64xbf16>, vector<16x16xf32> -> vector<16x16xf32>
    %cst_37 = arith.constant 1.250000e-01 : f32
    %124 = vector.broadcast %cst_37 : f32 to vector<16x16xf32>
    %125 = arith.mulf %123, %124 : vector<16x16xf32>
    %cst_38 = arith.constant dense<0xFF800000> : vector<16xf32>
    %126 = vector.multi_reduction <maximumf>, %125, %cst_38 [1] : vector<16x16xf32> to vector<16xf32>
    %127 = vector.shape_cast %126 : vector<16xf32> to vector<16x1xf32>
    %128 = vector.broadcast %127 : vector<16x1xf32> to vector<16x16xf32>
    %129 = arith.subf %125, %128 : vector<16x16xf32>
    %130 = math.exp %129 : vector<16x16xf32>
    %cst_39 = arith.constant dense<0.000000e+00> : vector<16xf32>
    %131 = vector.multi_reduction <add>, %130, %cst_39 [1] : vector<16x16xf32> to vector<16xf32>
    %132 = vector.shape_cast %131 : vector<16xf32> to vector<16x1xf32>
    %133 = tpu.reciprocal %132 {approx = true} : vector<16x1xf32> -> vector<16x1xf32>
    %134 = vector.broadcast %133 : vector<16x1xf32> to vector<16x16xf32>
    %135 = arith.mulf %130, %134 : vector<16x16xf32>
    %136 = arith.truncf %135 : vector<16x16xf32> to vector<16x16xbf16>
    %cst_40 = arith.constant dense<0.000000e+00> : vector<16x64xf32>
    %137 = tpu.matmul %136, %122, %cst_40 {dimension_numbers = #tpu.dot_dimension_numbers<[1], [0], [0], [1], [0, 0, 1, 1], [], []>} : vector<16x16xbf16>, vector<16x64xbf16>, vector<16x64xf32> -> vector<16x64xf32>
    %c16_41 = arith.constant 16 : index
    %c64_42 = arith.constant 64 : index
    %138 = vector.load %arg14[%c16_41, %c64_42] : memref<32x256xf32, #tpu.memory_space<vmem>>, vector<16x64xf32>
    tpu.vector_store %arg14[%c16_41, %c64_42], %137 {strides = array<i32>} : memref<32x256xf32, #tpu.memory_space<vmem>>, vector<16x64xf32>,
    %139 = vector.extract_strided_slice %6 {offsets = [16, 128], sizes = [16, 64], strides = [1, 1]} : vector<32x768xf32> to vector<16x64xf32>
    %140 = arith.truncf %139 : vector<16x64xf32> to vector<16x64xbf16>
    %141 = vector.extract_strided_slice %6 {offsets = [16, 384], sizes = [16, 64], strides = [1, 1]} : vector<32x768xf32> to vector<16x64xf32>
    %142 = arith.truncf %141 : vector<16x64xf32> to vector<16x64xbf16>
    %143 = vector.extract_strided_slice %6 {offsets = [16, 640], sizes = [16, 64], strides = [1, 1]} : vector<32x768xf32> to vector<16x64xf32>
    %144 = arith.truncf %143 : vector<16x64xf32> to vector<16x64xbf16>
    %cst_43 = arith.constant dense<0.000000e+00> : vector<16x16xf32>
    %145 = tpu.matmul %140, %142, %cst_43 {dimension_numbers = #tpu.dot_dimension_numbers<[1], [1], [0], [0], [0, 0, 1, 0], [], []>} : vector<16x64xbf16>, vector<16x64xbf16>, vector<16x16xf32> -> vector<16x16xf32>
    %cst_44 = arith.constant 1.250000e-01 : f32
    %146 = vector.broadcast %cst_44 : f32 to vector<16x16xf32>
    %147 = arith.mulf %145, %146 : vector<16x16xf32>
    %cst_45 = arith.constant dense<0xFF800000> : vector<16xf32>
    %148 = vector.multi_reduction <maximumf>, %147, %cst_45 [1] : vector<16x16xf32> to vector<16xf32>
    %149 = vector.shape_cast %148 : vector<16xf32> to vector<16x1xf32>
    %150 = vector.broadcast %149 : vector<16x1xf32> to vector<16x16xf32>
    %151 = arith.subf %147, %150 : vector<16x16xf32>
    %152 = math.exp %151 : vector<16x16xf32>
    %cst_46 = arith.constant dense<0.000000e+00> : vector<16xf32>
    %153 = vector.multi_reduction <add>, %152, %cst_46 [1] : vector<16x16xf32> to vector<16xf32>
    %154 = vector.shape_cast %153 : vector<16xf32> to vector<16x1xf32>
    %155 = tpu.reciprocal %154 {approx = true} : vector<16x1xf32> -> vector<16x1xf32>
    %156 = vector.broadcast %155 : vector<16x1xf32> to vector<16x16xf32>
    %157 = arith.mulf %152, %156 : vector<16x16xf32>
    %158 = arith.truncf %157 : vector<16x16xf32> to vector<16x16xbf16>
    %cst_47 = arith.constant dense<0.000000e+00> : vector<16x64xf32>
    %159 = tpu.matmul %158, %144, %cst_47 {dimension_numbers = #tpu.dot_dimension_numbers<[1], [0], [0], [1], [0, 0, 1, 1], [], []>} : vector<16x16xbf16>, vector<16x64xbf16>, vector<16x64xf32> -> vector<16x64xf32>
    %c16_48 = arith.constant 16 : index
    %c128_49 = arith.constant 128 : index
    %160 = vector.load %arg14[%c16_48, %c128_49] : memref<32x256xf32, #tpu.memory_space<vmem>>, vector<16x64xf32>
    tpu.vector_store %arg14[%c16_48, %c128_49], %159 {strides = array<i32>} : memref<32x256xf32, #tpu.memory_space<vmem>>, vector<16x64xf32>,
    %161 = vector.extract_strided_slice %6 {offsets = [16, 192], sizes = [16, 64], strides = [1, 1]} : vector<32x768xf32> to vector<16x64xf32>
    %162 = arith.truncf %161 : vector<16x64xf32> to vector<16x64xbf16>
    %163 = vector.extract_strided_slice %6 {offsets = [16, 448], sizes = [16, 64], strides = [1, 1]} : vector<32x768xf32> to vector<16x64xf32>
    %164 = arith.truncf %163 : vector<16x64xf32> to vector<16x64xbf16>
    %165 = vector.extract_strided_slice %6 {offsets = [16, 704], sizes = [16, 64], strides = [1, 1]} : vector<32x768xf32> to vector<16x64xf32>
    %166 = arith.truncf %165 : vector<16x64xf32> to vector<16x64xbf16>
    %cst_50 = arith.constant dense<0.000000e+00> : vector<16x16xf32>
    %167 = tpu.matmul %162, %164, %cst_50 {dimension_numbers = #tpu.dot_dimension_numbers<[1], [1], [0], [0], [0, 0, 1, 0], [], []>} : vector<16x64xbf16>, vector<16x64xbf16>, vector<16x16xf32> -> vector<16x16xf32>
    %cst_51 = arith.constant 1.250000e-01 : f32
    %168 = vector.broadcast %cst_51 : f32 to vector<16x16xf32>
    %169 = arith.mulf %167, %168 : vector<16x16xf32>
    %cst_52 = arith.constant dense<0xFF800000> : vector<16xf32>
    %170 = vector.multi_reduction <maximumf>, %169, %cst_52 [1] : vector<16x16xf32> to vector<16xf32>
    %171 = vector.shape_cast %170 : vector<16xf32> to vector<16x1xf32>
    %172 = vector.broadcast %171 : vector<16x1xf32> to vector<16x16xf32>
    %173 = arith.subf %169, %172 : vector<16x16xf32>
    %174 = math.exp %173 : vector<16x16xf32>
    %cst_53 = arith.constant dense<0.000000e+00> : vector<16xf32>
    %175 = vector.multi_reduction <add>, %174, %cst_53 [1] : vector<16x16xf32> to vector<16xf32>
    %176 = vector.shape_cast %175 : vector<16xf32> to vector<16x1xf32>
    %177 = tpu.reciprocal %176 {approx = true} : vector<16x1xf32> -> vector<16x1xf32>
    %178 = vector.broadcast %177 : vector<16x1xf32> to vector<16x16xf32>
    %179 = arith.mulf %174, %178 : vector<16x16xf32>
    %180 = arith.truncf %179 : vector<16x16xf32> to vector<16x16xbf16>
    %cst_54 = arith.constant dense<0.000000e+00> : vector<16x64xf32>
    %181 = tpu.matmul %180, %166, %cst_54 {dimension_numbers = #tpu.dot_dimension_numbers<[1], [0], [0], [1], [0, 0, 1, 1], [], []>} : vector<16x16xbf16>, vector<16x64xbf16>, vector<16x64xf32> -> vector<16x64xf32>
    %c16_55 = arith.constant 16 : index
    %c192_56 = arith.constant 192 : index
    %182 = vector.load %arg14[%c16_55, %c192_56] : memref<32x256xf32, #tpu.memory_space<vmem>>, vector<16x64xf32>
    tpu.vector_store %arg14[%c16_55, %c192_56], %181 {strides = array<i32>} : memref<32x256xf32, #tpu.memory_space<vmem>>, vector<16x64xf32>,
    %c0_57 = arith.constant 0 : index
    %c0_58 = arith.constant 0 : index
    %183 = vector.load %arg14[%c0_57, %c0_58] : memref<32x256xf32, #tpu.memory_space<vmem>>, vector<32x256xf32>
    %184 = arith.truncf %183 : vector<32x256xf32> to vector<32x256xbf16>
    %c0_59 = arith.constant 0 : index
    %c0_60 = arith.constant 0 : index
    %185 = vector.load %arg3[%c0_59, %c0_60] : memref<256x256xbf16, #tpu.memory_space<vmem>>, vector<256x256xbf16>
    %cst_61 = arith.constant dense<0.000000e+00> : vector<32x256xf32>
    %186 = tpu.matmul %184, %185, %cst_61 {dimension_numbers = #tpu.dot_dimension_numbers<[1], [0], [0], [1], [0, 0, 1, 1], [], []>} : vector<32x256xbf16>, vector<256x256xbf16>, vector<32x256xf32> -> vector<32x256xf32>
    %c0_62 = arith.constant 0 : index
    %c0_63 = arith.constant 0 : index
    %187 = vector.load %arg4[%c0_62, %c0_63] : memref<1x256xf32, #tpu.memory_space<vmem>>, vector<1x256xf32>
    %188 = vector.broadcast %187 : vector<1x256xf32> to vector<32x256xf32>
    %189 = arith.addf %186, %188 : vector<32x256xf32>
    %190 = arith.addf %0, %189 : vector<32x256xf32>
    %c0_64 = arith.constant 0 : index
    %c0_65 = arith.constant 0 : index
    %191 = vector.load %arg5[%c0_64, %c0_65] : memref<1x256xf32, #tpu.memory_space<vmem>>, vector<1x256xf32>
    %c0_66 = arith.constant 0 : index
    %c0_67 = arith.constant 0 : index
    %192 = vector.load %arg6[%c0_66, %c0_67] : memref<1x256xf32, #tpu.memory_space<vmem>>, vector<1x256xf32>
    %cst_68 = arith.constant dense<0.000000e+00> : vector<32xf32>
    %193 = vector.multi_reduction <add>, %190, %cst_68 [1] : vector<32x256xf32> to vector<32xf32>
    %194 = vector.shape_cast %193 : vector<32xf32> to vector<32x1xf32>
    %cst_69 = arith.constant 2.560000e+02 : f32
    %195 = vector.broadcast %cst_69 : f32 to vector<32x1xf32>
    %196 = arith.divf %194, %195 : vector<32x1xf32>
    %197 = vector.broadcast %196 : vector<32x1xf32> to vector<32x256xf32>
    %198 = arith.subf %190, %197 : vector<32x256xf32>
    %199 = arith.mulf %198, %198 : vector<32x256xf32>
    %cst_70 = arith.constant dense<0.000000e+00> : vector<32xf32>
    %200 = vector.multi_reduction <add>, %199, %cst_70 [1] : vector<32x256xf32> to vector<32xf32>
    %201 = vector.shape_cast %200 : vector<32xf32> to vector<32x1xf32>
    %cst_71 = arith.constant 2.560000e+02 : f32
    %202 = vector.broadcast %cst_71 : f32 to vector<32x1xf32>
    %203 = arith.divf %201, %202 : vector<32x1xf32>
    %204 = vector.broadcast %196 : vector<32x1xf32> to vector<32x256xf32>
    %205 = arith.subf %190, %204 : vector<32x256xf32>
    %cst_72 = arith.constant 9.99999974E-6 : f32
    %206 = vector.broadcast %cst_72 : f32 to vector<32x1xf32>
    %207 = arith.addf %203, %206 : vector<32x1xf32>
    %208 = math.rsqrt %207 : vector<32x1xf32>
    %209 = vector.broadcast %208 : vector<32x1xf32> to vector<32x256xf32>
    %210 = arith.mulf %205, %209 : vector<32x256xf32>
    %211 = vector.broadcast %191 : vector<1x256xf32> to vector<32x256xf32>
    %212 = arith.mulf %210, %211 : vector<32x256xf32>
    %213 = vector.broadcast %192 : vector<1x256xf32> to vector<32x256xf32>
    %214 = arith.addf %212, %213 : vector<32x256xf32>
    %215 = arith.truncf %214 : vector<32x256xf32> to vector<32x256xbf16>
    %c0_73 = arith.constant 0 : index
    %c0_74 = arith.constant 0 : index
    %216 = vector.load %arg7[%c0_73, %c0_74] : memref<256x512xbf16, #tpu.memory_space<vmem>>, vector<256x512xbf16>
    %cst_75 = arith.constant dense<0.000000e+00> : vector<32x512xf32>
    %217 = tpu.matmul %215, %216, %cst_75 {dimension_numbers = #tpu.dot_dimension_numbers<[1], [0], [0], [1], [0, 0, 1, 1], [], []>} : vector<32x256xbf16>, vector<256x512xbf16>, vector<32x512xf32> -> vector<32x512xf32>
    %c0_76 = arith.constant 0 : index
    %c0_77 = arith.constant 0 : index
    %218 = vector.load %arg8[%c0_76, %c0_77] : memref<1x512xf32, #tpu.memory_space<vmem>>, vector<1x512xf32>
    %219 = vector.broadcast %218 : vector<1x512xf32> to vector<32x512xf32>
    %220 = arith.addf %217, %219 : vector<32x512xf32>
    %cst_78 = arith.constant 0.000000e+00 : f32
    %221 = vector.broadcast %cst_78 : f32 to vector<32x512xf32>
    %222 = arith.maximumf %220, %221 : vector<32x512xf32>
    %223 = arith.truncf %222 : vector<32x512xf32> to vector<32x512xbf16>
    %c0_79 = arith.constant 0 : index
    %c0_80 = arith.constant 0 : index
    %224 = vector.load %arg9[%c0_79, %c0_80] : memref<512x256xbf16, #tpu.memory_space<vmem>>, vector<512x256xbf16>
    %cst_81 = arith.constant dense<0.000000e+00> : vector<32x256xf32>
    %225 = tpu.matmul %223, %224, %cst_81 {dimension_numbers = #tpu.dot_dimension_numbers<[1], [0], [0], [1], [0, 0, 1, 1], [], []>} : vector<32x512xbf16>, vector<512x256xbf16>, vector<32x256xf32> -> vector<32x256xf32>
    %c0_82 = arith.constant 0 : index
    %c0_83 = arith.constant 0 : index
    %226 = vector.load %arg10[%c0_82, %c0_83] : memref<1x256xf32, #tpu.memory_space<vmem>>, vector<1x256xf32>
    %227 = vector.broadcast %226 : vector<1x256xf32> to vector<32x256xf32>
    %228 = arith.addf %225, %227 : vector<32x256xf32>
    %229 = arith.addf %214, %228 : vector<32x256xf32>
    %c0_84 = arith.constant 0 : index
    %c0_85 = arith.constant 0 : index
    %230 = vector.load %arg11[%c0_84, %c0_85] : memref<1x256xf32, #tpu.memory_space<vmem>>, vector<1x256xf32>
    %c0_86 = arith.constant 0 : index
    %c0_87 = arith.constant 0 : index
    %231 = vector.load %arg12[%c0_86, %c0_87] : memref<1x256xf32, #tpu.memory_space<vmem>>, vector<1x256xf32>
    %cst_88 = arith.constant dense<0.000000e+00> : vector<32xf32>
    %232 = vector.multi_reduction <add>, %229, %cst_88 [1] : vector<32x256xf32> to vector<32xf32>
    %233 = vector.shape_cast %232 : vector<32xf32> to vector<32x1xf32>
    %cst_89 = arith.constant 2.560000e+02 : f32
    %234 = vector.broadcast %cst_89 : f32 to vector<32x1xf32>
    %235 = arith.divf %233, %234 : vector<32x1xf32>
    %236 = vector.broadcast %235 : vector<32x1xf32> to vector<32x256xf32>
    %237 = arith.subf %229, %236 : vector<32x256xf32>
    %238 = arith.mulf %237, %237 : vector<32x256xf32>
    %cst_90 = arith.constant dense<0.000000e+00> : vector<32xf32>
    %239 = vector.multi_reduction <add>, %238, %cst_90 [1] : vector<32x256xf32> to vector<32xf32>
    %240 = vector.shape_cast %239 : vector<32xf32> to vector<32x1xf32>
    %cst_91 = arith.constant 2.560000e+02 : f32
    %241 = vector.broadcast %cst_91 : f32 to vector<32x1xf32>
    %242 = arith.divf %240, %241 : vector<32x1xf32>
    %243 = vector.broadcast %235 : vector<32x1xf32> to vector<32x256xf32>
    %244 = arith.subf %229, %243 : vector<32x256xf32>
    %cst_92 = arith.constant 9.99999974E-6 : f32
    %245 = vector.broadcast %cst_92 : f32 to vector<32x1xf32>
    %246 = arith.addf %242, %245 : vector<32x1xf32>
    %247 = math.rsqrt %246 : vector<32x1xf32>
    %248 = vector.broadcast %247 : vector<32x1xf32> to vector<32x256xf32>
    %249 = arith.mulf %244, %248 : vector<32x256xf32>
    %250 = vector.broadcast %230 : vector<1x256xf32> to vector<32x256xf32>
    %251 = arith.mulf %249, %250 : vector<32x256xf32>
    %252 = vector.broadcast %231 : vector<1x256xf32> to vector<32x256xf32>
    %253 = arith.addf %251, %252 : vector<32x256xf32>
    %c0_93 = arith.constant 0 : index
    %c0_94 = arith.constant 0 : index
    %254 = vector.load %arg13[%c0_93, %c0_94] : memref<32x256xf32, #tpu.memory_space<vmem>>, vector<32x256xf32>
    tpu.vector_store %arg13[%c0_93, %c0_94], %253 {strides = array<i32>} : memref<32x256xf32, #tpu.memory_space<vmem>>, vector<32x256xf32>,
    return
  }
}

</mosaic_0001>

<bundles_post_ra>
// kernel: seed_model_forward.7
= control target key start
LH: loop header
LB: loop body
LE: loop exit
PB: predicated region body
PF: predicated region fallthrough
CT: control target
= control target key end

     0   :  { %v509_v3 = vmov 0   ;;  %vm39_vm0 = vcmask 261120   ;;  %v510_v30 = vmov 0.0|0.0   ;;  %vm511_vm1 = vmmov 0   ;;  %s680_s0 = inlined_call_operand.vmem [shape: f32[32,256], index: 0, kind: input, shape index: {}]   ;;  %s681_s2 = inlined_call_operand.vmem [shape: bf16[256,128], index: 2, kind: input, shape index: {}]   ;;  %s682_s1 = inlined_call_operand.vmem [shape: bf16[2,32], index: 1, kind: input, shape index: {}]   ;;  %s683_s4 = inlined_call_operand.vmem [shape: f32[128,1], index: 4, kind: input, shape index: {}]   ;;  %s684_s5 = inlined_call_operand.<no memory space> [shape: f32[1,1], index: 5, kind: input, shape index: {}]   ;;  %s685_s3 = inlined_call_operand.vmem [shape: f32[1,128], index: 3, kind: input, shape index: {}]   ;;  %s686_s6 = inlined_call_operand.vmem [shape: f32[2,1], index: 6, kind: output, shape index: {}]  }
   0x1   :  { %v28_v0 = vld [vmem:[%s680_s0 + $0x8] sm:$0xff]  ;;  %v30_v1 = vld [vmem:[%s680_s0 + $0x18] sm:$0xff]  ;;  %v27_v2 = vld [vmem:[%s680_s0] sm:$0xff]  ;;  %75 = vmatprep.mubr.bf16.mxu0 %v509_v3  ;;  %v512_v61 = vmov 0.0   ;;  %v11_v62 = vstv %s684_s5  ;;  %vm361_vm2 = vcmask 1024  }
   0x2   :  { %v36_v4 = vpack.c.bf16 %v30_v1, %v28_v0  ;;  %v29_v5 = vld [vmem:[%s680_s0 + $0x10] sm:$0xff]  ;;  %v32_v6 = vld [vmem:[%s680_s0 + $0x28] sm:$0xff]  ;;  %v34_v7 = vld [vmem:[%s680_s0 + $0x38] sm:$0xff]  ;;  %12 = vst [vmem:[#allocation2] sm:$0x1] %v11_v62 }
   0x3   :  { %v35_v8 = vpack.c.bf16 %v29_v5, %v27_v2  ;;  %v38_v9 = vpack.c.bf16 %v34_v7, %v32_v6  ;;  %v31_v10 = vld [vmem:[%s680_s0 + $0x20] sm:$0xff]  ;;  %v33_v11 = vld [vmem:[%s680_s0 + $0x30] sm:$0xff]  ;;  %v491_v15 = vld [vmem:[%s681_s2 + $0x48] sm:$0xff]  }
   0x4   :  { %43 = vmatprep.subr.bf16.mxu0 %v36_v4  ;;  %v489_v12 = vld [vmem:[%s681_s2 + $0x40] sm:$0xff]   ;;  %v37_v13 = vpack.c.bf16 %v33_v11, %v31_v10  ;;  %v492_v16 = vld [vmem:[%s681_s2 + $0x8] sm:$0xff]   ;;  %v493_v17 = vld [vmem:[%s681_s2 + $0x50] sm:$0xff]  }
   0x5   :  { %44 = vmatpush1.bf16.msra.mxu0 %v35_v8  ;;  %v490_v14 = vld [vmem:[%s681_s2] sm:$0xff]   ;;  %387 = vmatprep.subr.bf16.mxu1 %v489_v12  ;;  %v494_v19 = vld [vmem:[%s681_s2 + $0x10] sm:$0xff]   ;;  %v495_v20 = vld [vmem:[%s681_s2 + $0x58] sm:$0xff]  }
   0x6   :  { %45 = vmatprep.subr.bf16.mxu0 %v38_v9  ;;  %388 = vmatpush3.bf16.msra.mxu1 %v490_v14  ;;  %v26_v18 = vld [vmem:[%s682_s1] sm:$0x1]  ;;  %v496_v21 = vld [vmem:[%s681_s2 + $0x18] sm:$0xff]   ;;  %v499_v24 = vld [vmem:[%s681_s2 + $0x68] sm:$0xff]  }
   0x7   :  { %389 = vmatprep.subr.bf16.mxu1 %v491_v15  ;;  %v497_v22 = vld [vmem:[%s681_s2 + $0x60] sm:$0xff]   ;;  %v500_v25 = vld [vmem:[%s681_s2 + $0x28] sm:$0xff]   ;;  %v501_v26 = vld [vmem:[%s681_s2 + $0x70] sm:$0xff]  }
   0x8   :  { %v498_v23 = vld [vmem:[%s681_s2 + $0x20] sm:$0xff]   ;;  %v502_v27 = vld [vmem:[%s681_s2 + $0x30] sm:$0xff]   ;;  %v503_v28 = vld [vmem:[%s681_s2 + $0x78] sm:$0xff]  }
   0x9   :  { %46 = vmatpush1.bf16.msra.mxu0 %v37_v13  ;;  %v504_v29 = vld [vmem:[%s681_s2 + $0x38] sm:$0xff]   ;;  %v262_v31 = vld [vmem:[%s683_s4] sm:$0xff]  ;;  %v263_v32 = vld [vmem:[%s683_s4 + $0x8] sm:$0xff] }
   0xa   :  { %390 = vmatpush3.bf16.msra.mxu1 %v492_v16  ;;  %461 = vmatprep.subr.bf16.mxu0 %v510_v30  ;;  %v264_v33 = vld [vmem:[%s683_s4 + $0x10] sm:$0xff]  ;;  %v462_v34 = vpack.c.bf16 %v263_v32, %v262_v31  ;;  %v265_v35 = vld [vmem:[%s683_s4 + $0x18] sm:$0xff]  ;;  %v266_v37 = vld [vmem:[%s683_s4 + $0x20] sm:$0xff] }
   0xb   :  { %391 = vmatprep.subr.bf16.mxu1 %v493_v17  ;;  %v465_v36 = vpack.c.bf16 %v265_v35, %v264_v33  ;;  %v267_v38 = vld [vmem:[%s683_s4 + $0x28] sm:$0xff]  ;;  %v268_v40 = vld [vmem:[%s683_s4 + $0x30] sm:$0xff]  ;;  %v269_v41 = vld [vmem:[%s683_s4 + $0x38] sm:$0xff] }
   0xc   :  { %367 = vmatmul.mubr.msk.bf16.vlgmr.msra.gmra.mrb[0].mxu0 %vm39_vm0, %v26_v18  ;;  %v468_v39 = vpack.c.bf16 %v267_v38, %v266_v37  ;;  %v471_v42 = vpack.c.bf16 %v269_v41, %v268_v40  ;;  %v270_v43 = vld [vmem:[%s683_s4 + $0x40] sm:$0xff]  ;;  %v271_v44 = vld [vmem:[%s683_s4 + $0x48] sm:$0xff]  ;;  %v272_v46 = vld [vmem:[%s683_s4 + $0x50] sm:$0xff] }
   0xd   :  { %463 = vmatpush3.bf16.msra.mxu0 %v462_v34  ;;  %v474_v45 = vpack.c.bf16 %v271_v44, %v270_v43  ;;  %v273_v47 = vld [vmem:[%s683_s4 + $0x58] sm:$0xff]  ;;  %v274_v55 = vld [vmem:[%s683_s4 + $0x60] sm:$0xff]  ;;  %v275_v56 = vld [vmem:[%s683_s4 + $0x68] sm:$0xff]  ;;  %458 = vmatprep.mubr.msk.f32.mxu0 %vm511_vm1, %v512_v61 }
   0xe   :  { %392 = vmatpush3.bf16.msra.mxu1 %v494_v19  ;;  %464 = vmatprep.subr.bf16.mxu0 %v510_v30  ;;  %v477_v48 = vpack.c.bf16 %v273_v47, %v272_v46  ;;  %v480_v57 = vpack.c.bf16 %v275_v56, %v274_v55  ;;  %v276_v58 = vld [vmem:[%s683_s4 + $0x70] sm:$0xff]  ;;  %v277_v59 = vld [vmem:[%s683_s4 + $0x78] sm:$0xff]  ;;  %v368_v0 = vld [vmem:[%s685_s3] ss:$0 sm:$0xff] }
   0xf   :  { %393 = vmatprep.subr.bf16.mxu1 %v495_v20  ;;  %v483_v60 = vpack.c.bf16 %v277_v59, %v276_v58  ;;  %v385_v7 = vld [vmem:[#allocation2] ss:$0 sm:$0xff] }
  0x11   :  { %466 = vmatpush3.bf16.msra.mxu0 %v465_v36 }
  0x12   :  { %394 = vmatpush3.bf16.msra.mxu1 %v496_v21  ;;  %467 = vmatprep.subr.bf16.mxu0 %v510_v30 }
  0x13   :  { %395 = vmatprep.subr.bf16.mxu1 %v497_v22 }
  0x15   :  { %469 = vmatpush3.bf16.msra.mxu0 %v468_v39 }
  0x16   :  { %396 = vmatpush3.bf16.msra.mxu1 %v498_v23  ;;  %470 = vmatprep.subr.bf16.mxu0 %v510_v30 }
  0x17   :  { %397 = vmatprep.subr.bf16.mxu1 %v499_v24 }
  0x19   :  { %472 = vmatpush3.bf16.msra.mxu0 %v471_v42 }
  0x1a   :  { %398 = vmatpush3.bf16.msra.mxu1 %v500_v25  ;;  %473 = vmatprep.subr.bf16.mxu0 %v510_v30 }
  0x1b   :  { %399 = vmatprep.subr.bf16.mxu1 %v501_v26 }
  0x1d   :  { %475 = vmatpush3.bf16.msra.mxu0 %v474_v45 }
  0x1e   :  { %400 = vmatpush3.bf16.msra.mxu1 %v502_v27  ;;  %476 = vmatprep.subr.bf16.mxu0 %v510_v30 }
  0x1f   :  { %401 = vmatprep.subr.bf16.mxu1 %v503_v28 }
  0x21   :  { %478 = vmatpush3.bf16.msra.mxu0 %v477_v48 }
  0x22   :  { %402 = vmatpush3.bf16.msra.mxu1 %v504_v29  ;;  %479 = vmatprep.subr.bf16.mxu0 %v510_v30 }
  0x25   :  { %481 = vmatpush3.bf16.msra.mxu0 %v480_v57 }
  0x26   :  { %482 = vmatprep.subr.bf16.mxu0 %v510_v30 }
  0x29   :  { %484 = vmatpush3.bf16.msra.mxu0 %v483_v60 }
  0xdf   :  { %v77_v49 = vpop.f32.mrb[0].mxu0 }
  0xe0   :  { %v79_v50 = vpop.f32.mrb[1].mxu0  ;;  %v84_v53 = vpack.c.bf16 %v77_v49, %v77_v49 }
  0xe1   :  { %v81_v51 = vpop.f32.mrb[2].mxu0  ;;  %v85_v52 = vpack.c.bf16 %v79_v50, %v79_v50 }
  0xe2   :  { %v82_v54 = vpop.f32.mrb[3].mxu0 }
  0xe3   :  { %253 = vmatprep.mubr.bf16.mxu1 %v85_v52 }
  0xe4   :  { %254 = vmatmul.mubr.bf16.vlgmr.msra.gmra.mrb[0].mxu1 %v84_v53 }
 0x1b7   :  { %v403_v63 = vpop.f32.mrb[0].mxu1 }
 0x1b8   :  { %v404_v1 = vpop.f32.mrb[1].mxu1 }
 0x1b9   :  { %v405_v2 = vadd.f32 %v404_v1, %v403_v63  ;;  %v406_v3 = vpop.f32.mrb[2].mxu1 }
 0x1ba   :  { %v407_v4 = vpop.f32.mrb[3].mxu1 }
 0x1bb   :  { %v256_v5 = vadd.f32 %v405_v2, %v368_v0 }
 0x1bd   :  { %v261_v6 = vmax.f32 %v256_v5, 0.0 }
 0x1bf   :  { %459 = vmatmul.mubr.f32.vlgmr.msra.gmra.mrb[4].mxu0 %v261_v6 }
 0x292   :  { %v351_v8 = vpop.f32.mrb[4].mxu0 }
 0x293   :  { %v352_v9 = vadd.f32 %v385_v7, %v351_v8  ;;  %v460_v10 = vpop.f32.mrb[5].mxu0 }
 0x295   :  { %v386_v11 = vmul.f32 -1.442695, %v352_v9 }
 0x297   :  { %505 = vpow2.f32 %v386_v11 }
 0x2a1   :  { %v506_v12 = vpop.eup %505 }
 0x2a2   :  { %v358_v13 = vadd.f32 1.0, %v506_v12 }
 0x2a4   :  { %507 = vrcp.f32 %v358_v13 }
 0x2ae   :  { %v508_v14 = vpop.eup %507 }
 0x2af   :  { %362 = vst.msk [vmem:[%s686_s6] sm:$0x3] %vm361_vm2, %v508_v14 }

// kernel: seed_model_forward.4
= control target key start
LH: loop header
LB: loop body
LE: loop exit
PB: predicated region body
PF: predicated region fallthrough
CT: control target
= control target key end

     0   :  { %vm275_vm0 = vcmask 293888   ;;  %vm372_vm1 = vcmask 1041408   ;;  %vm945_vm2 = vcmask 261120   ;;  %s1675_s1 = inlined_call_operand.vmem [shape: bf16[36,32], index: 1, kind: input, shape index: {}]   ;;  %s1676_s0 = inlined_call_operand.vmem [shape: bf16[512,36], index: 0, kind: input, shape index: {}]   ;;  %s1677_s3 = inlined_call_operand.vmem [shape: bf16[32,512], index: 3, kind: input, shape index: {}]   ;;  %s1678_s2 = inlined_call_operand.vmem [shape: f32[1,32], index: 2, kind: input, shape index: {}]   ;;  %s1679_s4 = inlined_call_operand.vmem [shape: bf16[32,256], index: 4, kind: input, shape index: {}]   ;;  %s1680_s5 = inlined_call_operand.vmem [shape: f32[1,256], index: 5, kind: input, shape index: {}]   ;;  %s1681_s6 = inlined_call_operand.vmem [shape: f32[32,256], index: 6, kind: output, shape index: {}]  }
   0x1   :  { %v1269_v0 = vld [vmem:[%s1675_s1] sm:$0xff]   ;;  %v1270_v1 = vld [vmem:[%s1675_s1 + $0x8] sm:$0xff]   ;;  %v1271_v2 = vld [vmem:[%s1675_s1 + $0x10] ss:$0 sps:$4 sm:$0x33]  }
   0x2   :  { %1190 = vmatprep.subr.bf16.mxu0 %v1269_v0  ;;  %v1272_v3 = vld [vmem:[%s1676_s0] sm:$0xff]   ;;  %1260 = vmatprep.subr.bf16.mxu1 %v1269_v0  ;;  %v374_v4 = vsel %vm372_vm1, %v1271_v2, 0  ;;  %v1273_v5 = vld [vmem:[%s1676_s0 + $0x8] sm:$0xff]   ;;  %v1274_v6 = vld [vmem:[%s1676_s0 + $0x10] sm:$0xff]  }
   0x3   :  { %1191 = vmatpush3.bf16.msra.mxu0 %v1269_v0  ;;  %1263 = vmatpush3.bf16.msra.mxu1 %v1269_v0  ;;  %v1275_v7 = vld [vmem:[%s1676_s0 + $0x18] sm:$0xff]   ;;  %v1276_v8 = vld [vmem:[%s1676_s0 + $0x20] sm:$0xff]   ;;  %v1289_v10 = vld [vmem:[%s1676_s0 + $0xc8] sm:$0xff]  }
   0x4   :  { %1192 = vmatprep.subr.bf16.mxu0 %v1270_v1  ;;  %1196 = vmatprep.mubr.msk.bf16.mxu0 %vm275_vm0, %v1272_v3  ;;  %v1288_v9 = vld [vmem:[%s1676_s0 + $0xc0] sm:$0xff]   ;;  %v1292_v11 = vld [vmem:[%s1676_s0 + $0xd0] sm:$0xff]   ;;  %v1277_v12 = vld [vmem:[%s1676_s0 + $0x28] sm:$0xff]  }
   0x5   :  { %1261 = vmatprep.subr.bf16.mxu1 %v1270_v1  ;;  %1244 = vmatprep.mubr.msk.bf16.mxu1 %vm275_vm0, %v1288_v9  ;;  %v1278_v13 = vld [vmem:[%s1676_s0 + $0x30] sm:$0xff]   ;;  %v1293_v14 = vld [vmem:[%s1676_s0 + $0xd8] sm:$0xff]   ;;  %v1296_v15 = vld [vmem:[%s1676_s0 + $0xe0] sm:$0xff]  }
   0x6   :  { %v1279_v16 = vld [vmem:[%s1676_s0 + $0x38] sm:$0xff]   ;;  %v1297_v17 = vld [vmem:[%s1676_s0 + $0xe8] sm:$0xff]   ;;  %v1280_v18 = vld [vmem:[%s1676_s0 + $0x40] sm:$0xff]  }
   0x7   :  { %1193 = vmatpush3.bf16.msra.mxu0 %v1270_v1  ;;  %1264 = vmatpush3.bf16.msra.mxu1 %v1270_v1  ;;  %v1300_v19 = vld [vmem:[%s1676_s0 + $0xf0] sm:$0xff]   ;;  %v1281_v20 = vld [vmem:[%s1676_s0 + $0x48] sm:$0xff]   ;;  %v1301_v21 = vld [vmem:[%s1676_s0 + $0xf8] sm:$0xff]  }
   0x8   :  { %1266 = vmatprep.subr.msk.bf16.mxu0 %vm372_vm1, %v1271_v2  ;;  %1267 = vmatprep.subr.msk.bf16.mxu1 %vm372_vm1, %v1271_v2  ;;  %v1282_v22 = vld [vmem:[%s1676_s0 + $0x50] sm:$0xff]   ;;  %v1283_v23 = vld [vmem:[%s1676_s0 + $0x58] sm:$0xff]   ;;  %v1284_v24 = vld [vmem:[%s1676_s0 + $0x60] sm:$0xff]  }
   0x9   :  { %v1285_v25 = vld [vmem:[%s1676_s0 + $0x68] sm:$0xff]   ;;  %v1286_v26 = vld [vmem:[%s1676_s0 + $0x70] sm:$0xff]   ;;  %v1287_v27 = vld [vmem:[%s1676_s0 + $0x78] sm:$0xff]  }
   0xa   :  { %v1290_v28 = vld [vmem:[%s1676_s0 + $0x80] sm:$0xff]   ;;  %v1291_v29 = vld [vmem:[%s1676_s0 + $0x88] sm:$0xff]   ;;  %v1294_v30 = vld [vmem:[%s1676_s0 + $0x90] sm:$0xff]  }
   0xb   :  { %1195 = vmatpush3.bf16.msra.mxu0 %v374_v4  ;;  %1265 = vmatpush3.bf16.msra.mxu1 %v374_v4  ;;  %v1295_v31 = vld [vmem:[%s1676_s0 + $0x98] sm:$0xff]   ;;  %v1298_v32 = vld [vmem:[%s1676_s0 + $0xa0] sm:$0xff]   ;;  %v1299_v33 = vld [vmem:[%s1676_s0 + $0xa8] sm:$0xff]  }
   0xc   :  { %v1302_v34 = vld [vmem:[%s1676_s0 + $0xb0] sm:$0xff]   ;;  %v1303_v35 = vld [vmem:[%s1676_s0 + $0xb8] sm:$0xff]   ;;  %v1501_v37 = vld [vmem:[%s1678_s2] ss:$0 sm:$0xff] }
   0xd   :  { %v1306_v36 = vld [vmem:[%s1677_s3 + $0x4] ss:$16 sps:$4 sm:$0xff]  }
   0xe   :  { %1197 = vmatmul.mubr.msk.bf16.vlgmr.msra.gmra.mrb[0].mxu0 %vm275_vm0, %v1273_v5  ;;  %1245 = vmatmul.mubr.msk.bf16.vlgmr.msra.gmra.mrb[0].mxu1 %vm275_vm0, %v1289_v10 }
   0xf   :  { %1200 = vmatprep.mubr.msk.bf16.mxu0 %vm275_vm0, %v1274_v6  ;;  %1248 = vmatprep.mubr.msk.bf16.mxu1 %vm275_vm0, %v1292_v11 }
  0x16   :  { %1201 = vmatmul.mubr.msk.bf16.gmra.mrb[4].mxu0 %vm275_vm0, %v1275_v7  ;;  %1249 = vmatmul.mubr.msk.bf16.gmra.mrb[4].mxu1 %vm275_vm0, %v1293_v14 }
  0x17   :  { %1204 = vmatprep.mubr.msk.bf16.mxu0 %vm275_vm0, %v1276_v8  ;;  %1252 = vmatprep.mubr.msk.bf16.mxu1 %vm275_vm0, %v1296_v15 }
  0x1e   :  { %1205 = vmatmul.mubr.msk.bf16.gmra.mrb[8].mxu0 %vm275_vm0, %v1277_v12  ;;  %1253 = vmatmul.mubr.msk.bf16.gmra.mrb[8].mxu1 %vm275_vm0, %v1297_v17 }
  0x1f   :  { %1208 = vmatprep.mubr.msk.bf16.mxu0 %vm275_vm0, %v1278_v13  ;;  %1256 = vmatprep.mubr.msk.bf16.mxu1 %vm275_vm0, %v1300_v19 }
  0x26   :  { %1209 = vmatmul.mubr.msk.bf16.gmra.mrb[12].mxu0 %vm275_vm0, %v1279_v16  ;;  %1257 = vmatmul.mubr.msk.bf16.gmra.mrb[12].mxu1 %vm275_vm0, %v1301_v21 }
  0x27   :  { %1212 = vmatprep.mubr.msk.bf16.mxu0 %vm275_vm0, %v1280_v18  ;;  %841 = vmatprep.mubr.bf16.mxu1 %v1306_v36 }
  0x2e   :  { %1213 = vmatmul.mubr.msk.bf16.gmra.mrb[16].mxu0 %vm275_vm0, %v1281_v20 }
  0x2f   :  { %1216 = vmatprep.mubr.msk.bf16.mxu0 %vm275_vm0, %v1282_v22 }
  0x36   :  { %1217 = vmatmul.mubr.msk.bf16.gmra.mrb[20].mxu0 %vm275_vm0, %v1283_v23 }
  0x37   :  { %1220 = vmatprep.mubr.msk.bf16.mxu0 %vm275_vm0, %v1284_v24 }
  0x3e   :  { %1221 = vmatmul.mubr.msk.bf16.gmra.mrb[24].mxu0 %vm275_vm0, %v1285_v25 }
  0x3f   :  { %1224 = vmatprep.mubr.msk.bf16.mxu0 %vm275_vm0, %v1286_v26 }
  0x46   :  { %1225 = vmatmul.mubr.msk.bf16.gmra.mrb[28].mxu0 %vm275_vm0, %v1287_v27 }
  0x47   :  { %1228 = vmatprep.mubr.msk.bf16.mxu0 %vm275_vm0, %v1290_v28 }
  0x4e   :  { %1229 = vmatmul.mubr.msk.bf16.gmra.mrb[32].mxu0 %vm275_vm0, %v1291_v29 }
  0x4f   :  { %1232 = vmatprep.mubr.msk.bf16.mxu0 %vm275_vm0, %v1294_v30 }
  0x56   :  { %1233 = vmatmul.mubr.msk.bf16.gmra.mrb[36].mxu0 %vm275_vm0, %v1295_v31 }
  0x57   :  { %1236 = vmatprep.mubr.msk.bf16.mxu0 %vm275_vm0, %v1298_v32 }
  0x5e   :  { %1237 = vmatmul.mubr.msk.bf16.gmra.mrb[40].mxu0 %vm275_vm0, %v1299_v33 }
  0x5f   :  { %1240 = vmatprep.mubr.msk.bf16.mxu0 %vm275_vm0, %v1302_v34 }
  0x66   :  { %1241 = vmatmul.mubr.msk.bf16.gmra.mrb[44].mxu0 %vm275_vm0, %v1303_v35 }
  0xe1   :  { %v1198_v38 = vpop.f32.mrb[0].mxu0  ;;  %v1246_v53 = vpop.f32.mrb[0].mxu1 }
  0xe2   :  { %v419_v39 = vadd.f32 %v1198_v38, %v1501_v37  ;;  %v410_v40 = vpop.f32.mrb[1].mxu0  ;;  %v611_v56 = vadd.f32 %v1246_v53, %v1501_v37  ;;  %v602_v57 = vpop.f32.mrb[1].mxu1 }
  0xe3   :  { %v411_v41 = vadd.f32 %v1501_v37, %v410_v40  ;;  %v1199_v42 = vpop.f32.mrb[2].mxu0  ;;  %v603_v60 = vadd.f32 %v1501_v37, %v602_v57  ;;  %v1247_v61 = vpop.f32.mrb[2].mxu1 }
  0xe4   :  { %v422_v43 = vadd.f32 %v1199_v42, %v1501_v37  ;;  %v413_v44 = vpop.f32.mrb[3].mxu0  ;;  %v667_v46 = vmax.f32 %v419_v39, 0.0  ;;  %v715_v0 = vmax.f32 %v611_v56, 0.0  ;;  %v614_v1 = vadd.f32 %v1247_v61, %v1501_v37  ;;  %v605_v2 = vpop.f32.mrb[3].mxu1 }
  0xe5   :  { %v414_v45 = vadd.f32 %v1501_v37, %v413_v44  ;;  %v665_v48 = vmax.f32 %v411_v41, 0.0  ;;  %v713_v4 = vmax.f32 %v603_v60, 0.0  ;;  %v606_v5 = vadd.f32 %v1501_v37, %v605_v2 }
  0xe6   :  { %v668_v47 = vmax.f32 %v422_v43, 0.0  ;;  %v716_v8 = vmax.f32 %v614_v1, 0.0 }
  0xe7   :  { %v666_v49 = vmax.f32 %v414_v45, 0.0  ;;  %v714_v11 = vmax.f32 %v606_v5, 0.0 }
  0xe8   :  { %v1507_v50 = vpack.c.bf16 %v668_v47, %v667_v46  ;;  %v1521_v13 = vpack.c.bf16 %v716_v8, %v715_v0 }
  0xe9   :  { %v1509_v51 = vpack.c.bf16 %v666_v49, %v665_v48  ;;  %v1202_v52 = vpop.f32.mrb[4].mxu0  ;;  %v1525_v16 = vpack.c.bf16 %v714_v11, %v713_v4  ;;  %v1250_v17 = vpop.f32.mrb[4].mxu1 }
  0xea   :  { %v435_v54 = vadd.f32 %v1202_v52, %v1501_v37  ;;  %v426_v55 = vpop.f32.mrb[5].mxu0  ;;  %v627_v20 = vadd.f32 %v1250_v17, %v1501_v37  ;;  %v618_v21 = vpop.f32.mrb[5].mxu1 }
  0xeb   :  { %v427_v58 = vadd.f32 %v1501_v37, %v426_v55  ;;  %v1203_v59 = vpop.f32.mrb[6].mxu0  ;;  %v619_v24 = vadd.f32 %v1501_v37, %v618_v21  ;;  %v1251_v25 = vpop.f32.mrb[6].mxu1 }
  0xec   :  { %v438_v62 = vadd.f32 %v1203_v59, %v1501_v37  ;;  %v429_v63 = vpop.f32.mrb[7].mxu0  ;;  %v671_v6 = vmax.f32 %v435_v54, 0.0  ;;  %v719_v28 = vmax.f32 %v627_v20, 0.0  ;;  %v630_v29 = vadd.f32 %v1251_v25, %v1501_v37  ;;  %v621_v30 = vpop.f32.mrb[7].mxu1 }
  0xed   :  { %v430_v3 = vadd.f32 %v1501_v37, %v429_v63  ;;  %v669_v9 = vmax.f32 %v427_v58, 0.0  ;;  %v717_v32 = vmax.f32 %v619_v24, 0.0  ;;  %v622_v33 = vadd.f32 %v1501_v37, %v621_v30 }
  0xee   :  { %v672_v7 = vmax.f32 %v438_v62, 0.0  ;;  %v720_v36 = vmax.f32 %v630_v29, 0.0 }
  0xef   :  { %v670_v10 = vmax.f32 %v430_v3, 0.0  ;;  %v718_v40 = vmax.f32 %v622_v33, 0.0 }
  0xf0   :  { %v1519_v12 = vpack.c.bf16 %v672_v7, %v671_v6  ;;  %v1537_v42 = vpack.c.bf16 %v720_v36, %v719_v28 }
  0xf1   :  { %v1523_v14 = vpack.c.bf16 %v670_v10, %v669_v9  ;;  %v1206_v15 = vpop.f32.mrb[8].mxu0  ;;  %v1541_v45 = vpack.c.bf16 %v718_v40, %v717_v32  ;;  %v1254_v46 = vpop.f32.mrb[8].mxu1 }
  0xf2   :  { %v451_v18 = vadd.f32 %v1206_v15, %v1501_v37  ;;  %v442_v19 = vpop.f32.mrb[9].mxu0  ;;  %v643_v49 = vadd.f32 %v1254_v46, %v1501_v37  ;;  %v634_v52 = vpop.f32.mrb[9].mxu1 }
  0xf3   :  { %v443_v22 = vadd.f32 %v1501_v37, %v442_v19  ;;  %v1207_v23 = vpop.f32.mrb[10].mxu0  ;;  %v635_v55 = vadd.f32 %v1501_v37, %v634_v52  ;;  %v1255_v56 = vpop.f32.mrb[10].mxu1 }
  0xf4   :  { %v454_v26 = vadd.f32 %v1207_v23, %v1501_v37  ;;  %v445_v27 = vpop.f32.mrb[11].mxu0  ;;  %v675_v34 = vmax.f32 %v451_v18, 0.0  ;;  %v723_v59 = vmax.f32 %v643_v49, 0.0  ;;  %v646_v60 = vadd.f32 %v1255_v56, %v1501_v37  ;;  %v637_v61 = vpop.f32.mrb[11].mxu1 }
  0xf5   :  { %v446_v31 = vadd.f32 %v1501_v37, %v445_v27  ;;  %v673_v38 = vmax.f32 %v443_v22, 0.0  ;;  %v721_v63 = vmax.f32 %v635_v55, 0.0  ;;  %v638_v0 = vadd.f32 %v1501_v37, %v637_v61 }
  0xf6   :  { %v676_v35 = vmax.f32 %v454_v26, 0.0  ;;  %v724_v3 = vmax.f32 %v646_v60, 0.0 }
  0xf7   :  { %v674_v39 = vmax.f32 %v446_v31, 0.0  ;;  %v722_v6 = vmax.f32 %v638_v0, 0.0 }
  0xf8   :  { %v1535_v41 = vpack.c.bf16 %v676_v35, %v675_v34  ;;  %v1553_v8 = vpack.c.bf16 %v724_v3, %v723_v59 }
  0xf9   :  { %v1539_v43 = vpack.c.bf16 %v674_v39, %v673_v38  ;;  %v1210_v44 = vpop.f32.mrb[12].mxu0  ;;  %v1557_v11 = vpack.c.bf16 %v722_v6, %v721_v63  ;;  %v1258_v15 = vpop.f32.mrb[12].mxu1 }
  0xfa   :  { %v467_v47 = vadd.f32 %v1210_v44, %v1501_v37  ;;  %v458_v48 = vpop.f32.mrb[13].mxu0  ;;  %v659_v19 = vadd.f32 %v1258_v15, %v1501_v37  ;;  %v650_v20 = vpop.f32.mrb[13].mxu1 }
  0xfb   :  { %v459_v53 = vadd.f32 %v1501_v37, %v458_v48  ;;  %v1211_v54 = vpop.f32.mrb[14].mxu0  ;;  %v651_v23 = vadd.f32 %v1501_v37, %v650_v20  ;;  %v1259_v24 = vpop.f32.mrb[14].mxu1 }
  0xfc   :  { %v470_v57 = vadd.f32 %v1211_v54, %v1501_v37  ;;  %v461_v58 = vpop.f32.mrb[15].mxu0  ;;  %v679_v1 = vmax.f32 %v467_v47, 0.0  ;;  %v727_v27 = vmax.f32 %v659_v19, 0.0  ;;  %v662_v28 = vadd.f32 %v1259_v24, %v1501_v37  ;;  %v653_v29 = vpop.f32.mrb[15].mxu1 }
  0xfd   :  { %v462_v62 = vadd.f32 %v1501_v37, %v461_v58  ;;  %v677_v4 = vmax.f32 %v459_v53, 0.0  ;;  %v725_v31 = vmax.f32 %v651_v23, 0.0  ;;  %v654_v32 = vadd.f32 %v1501_v37, %v653_v29 }
  0xfe   :  { %v680_v2 = vmax.f32 %v470_v57, 0.0  ;;  %v728_v35 = vmax.f32 %v662_v28, 0.0 }
  0xff   :  { %v678_v5 = vmax.f32 %v462_v62, 0.0  ;;  %v726_v39 = vmax.f32 %v654_v32, 0.0 }
 0x100   :  { %v1551_v7 = vpack.c.bf16 %v680_v2, %v679_v1  ;;  %v1567_v44 = vpack.c.bf16 %v728_v35, %v727_v27 }
 0x101   :  { %v1555_v9 = vpack.c.bf16 %v678_v5, %v677_v4  ;;  %v1214_v10 = vpop.f32.mrb[16].mxu0  ;;  %v1569_v48 = vpack.c.bf16 %v726_v39, %v725_v31 }
 0x102   :  { %v483_v17 = vadd.f32 %v1214_v10, %v1501_v37  ;;  %v474_v18 = vpop.f32.mrb[17].mxu0 }
 0x103   :  { %v475_v21 = vadd.f32 %v1501_v37, %v474_v18  ;;  %v1215_v22 = vpop.f32.mrb[18].mxu0 }
 0x104   :  { %v486_v25 = vadd.f32 %v1215_v22, %v1501_v37  ;;  %v477_v26 = vpop.f32.mrb[19].mxu0  ;;  %v683_v33 = vmax.f32 %v483_v17, 0.0 }
 0x105   :  { %v478_v30 = vadd.f32 %v1501_v37, %v477_v26  ;;  %v681_v36 = vmax.f32 %v475_v21, 0.0 }
 0x106   :  { %v684_v34 = vmax.f32 %v486_v25, 0.0 }
 0x107   :  { %v682_v38 = vmax.f32 %v478_v30, 0.0 }
 0x108   :  { %v746_v40 = vpack.c.bf16 %v684_v34, %v683_v33 }
 0x109   :  { %v745_v46 = vpack.c.bf16 %v682_v38, %v681_v36  ;;  %v1218_v47 = vpop.f32.mrb[20].mxu0 }
 0x10a   :  { %v499_v49 = vadd.f32 %v1218_v47, %v1501_v37  ;;  %v490_v52 = vpop.f32.mrb[21].mxu0 }
 0x10b   :  { %v491_v53 = vadd.f32 %v1501_v37, %v490_v52  ;;  %v1219_v54 = vpop.f32.mrb[22].mxu0  ;;  %1134 = vmatprep.subr.bf16.mxu1 %v745_v46 }
 0x10c   :  { %v502_v55 = vadd.f32 %v1219_v54, %v1501_v37  ;;  %v493_v56 = vpop.f32.mrb[23].mxu0  ;;  %1135 = vmatpush3.bf16.msra.mxu1 %v1509_v51  ;;  %v687_v58 = vmax.f32 %v499_v49, 0.0  ;;  %v1304_v49 = vld [vmem:[%s1677_s3] ss:$16 sps:$4 sm:$0xff]  }
 0x10d   :  { %v494_v57 = vadd.f32 %v1501_v37, %v493_v56  ;;  %1136 = vmatprep.subr.bf16.mxu1 %v746_v40  ;;  %v685_v60 = vmax.f32 %v491_v53, 0.0  ;;  %v1307_v53 = vld [vmem:[%s1677_s3 + $0x24] ss:$16 sps:$4 sm:$0xff]  }
 0x10e   :  { %v688_v59 = vmax.f32 %v502_v55, 0.0 }
 0x10f   :  { %v686_v61 = vmax.f32 %v494_v57, 0.0 }
 0x110   :  { %v748_v62 = vpack.c.bf16 %v688_v59, %v687_v58  ;;  %1137 = vmatpush3.bf16.msra.mxu1 %v1507_v50 }
 0x111   :  { %v747_v63 = vpack.c.bf16 %v686_v61, %v685_v60  ;;  %v1222_v0 = vpop.f32.mrb[24].mxu0 }
 0x112   :  { %v515_v1 = vadd.f32 %v1222_v0, %v1501_v37  ;;  %v506_v2 = vpop.f32.mrb[25].mxu0  ;;  %v1309_v0 = vld [vmem:[%s1677_s3 + $0x20] ss:$16 sps:$4 sm:$0xff]  }
 0x113   :  { %v507_v3 = vadd.f32 %v1501_v37, %v506_v2  ;;  %v1223_v4 = vpop.f32.mrb[26].mxu0  ;;  %1138 = vmatprep.subr.bf16.mxu1 %v747_v63  ;;  %v1312_v2 = vld [vmem:[%s1677_s3 + $0xc] ss:$16 sps:$4 sm:$0xff]  }
 0x114   :  { %v518_v51 = vadd.f32 %v1223_v4, %v1501_v37  ;;  %v509_v5 = vpop.f32.mrb[27].mxu0  ;;  %1139 = vmatpush3.bf16.msra.mxu1 %v1523_v14  ;;  %v691_v10 = vmax.f32 %v515_v1, 0.0 }
 0x115   :  { %v510_v6 = vadd.f32 %v1501_v37, %v509_v5  ;;  %1140 = vmatprep.subr.bf16.mxu1 %v748_v62  ;;  %v689_v50 = vmax.f32 %v507_v3, 0.0 }
 0x116   :  { %v692_v15 = vmax.f32 %v518_v51, 0.0 }
 0x117   :  { %v690_v17 = vmax.f32 %v510_v6, 0.0 }
 0x118   :  { %v750_v18 = vpack.c.bf16 %v692_v15, %v691_v10  ;;  %1141 = vmatpush3.bf16.msra.mxu1 %v1519_v12 }
 0x119   :  { %v749_v19 = vpack.c.bf16 %v690_v17, %v689_v50  ;;  %v1226_v20 = vpop.f32.mrb[28].mxu0 }
 0x11a   :  { %v531_v21 = vadd.f32 %v1226_v20, %v1501_v37  ;;  %v522_v22 = vpop.f32.mrb[29].mxu0 }
 0x11b   :  { %v523_v23 = vadd.f32 %v1501_v37, %v522_v22  ;;  %v1227_v24 = vpop.f32.mrb[30].mxu0  ;;  %1142 = vmatprep.subr.bf16.mxu1 %v749_v19 }
 0x11c   :  { %v534_v14 = vadd.f32 %v1227_v24, %v1501_v37  ;;  %v525_v25 = vpop.f32.mrb[31].mxu0  ;;  %1143 = vmatpush3.bf16.msra.mxu1 %v1539_v43  ;;  %v695_v27 = vmax.f32 %v531_v21, 0.0 }
 0x11d   :  { %v526_v26 = vadd.f32 %v1501_v37, %v525_v25  ;;  %1144 = vmatprep.subr.bf16.mxu1 %v750_v18  ;;  %v693_v12 = vmax.f32 %v523_v23, 0.0 }
 0x11e   :  { %v696_v28 = vmax.f32 %v534_v14, 0.0 }
 0x11f   :  { %v694_v29 = vmax.f32 %v526_v26, 0.0 }
 0x120   :  { %v752_v30 = vpack.c.bf16 %v696_v28, %v695_v27  ;;  %1145 = vmatpush3.bf16.msra.mxu1 %v1535_v41 }
 0x121   :  { %v751_v31 = vpack.c.bf16 %v694_v29, %v693_v12  ;;  %v1230_v32 = vpop.f32.mrb[32].mxu0 }
 0x122   :  { %v547_v33 = vadd.f32 %v1230_v32, %v1501_v37  ;;  %v538_v34 = vpop.f32.mrb[33].mxu0  ;;  %v1310_v32 = vld [vmem:[%s1677_s3 + $0x8] ss:$16 sps:$4 sm:$0xff]  }
 0x123   :  { %v539_v35 = vadd.f32 %v1501_v37, %v538_v34  ;;  %v1231_v36 = vpop.f32.mrb[34].mxu0  ;;  %1146 = vmatprep.subr.bf16.mxu1 %v751_v31  ;;  %v1321_v34 = vld [vmem:[%s1679_s4 + $0x14] ss:$8 sps:$4 sm:$0xff]  }
 0x124   :  { %v699_v43 = vmax.f32 %v547_v33, 0.0  ;;  %v550_v38 = vadd.f32 %v1231_v36, %v1501_v37  ;;  %v541_v39 = vpop.f32.mrb[35].mxu0  ;;  %1147 = vmatpush3.bf16.msra.mxu1 %v1555_v9  ;;  %v1319_v33 = vld [vmem:[%s1679_s4 + $0x10] ss:$8 sps:$4 sm:$0xff]  }
 0x125   :  { %v542_v40 = vadd.f32 %v1501_v37, %v541_v39  ;;  %1148 = vmatprep.subr.bf16.mxu1 %v752_v30  ;;  %v697_v41 = vmax.f32 %v539_v35, 0.0  ;;  %v1322_v35 = vmov 0  }
 0x126   :  { %v700_v46 = vmax.f32 %v550_v38, 0.0 }
 0x127   :  { %v698_v47 = vmax.f32 %v542_v40, 0.0 }
 0x128   :  { %v754_v52 = vpack.c.bf16 %v700_v46, %v699_v43  ;;  %1149 = vmatpush3.bf16.msra.mxu1 %v1551_v7 }
 0x129   :  { %v753_v54 = vpack.c.bf16 %v698_v47, %v697_v41  ;;  %v1234_v55 = vpop.f32.mrb[36].mxu0  ;;  %1162 = vmatprep.subr.bf16.mxu1 %v1525_v16 }
 0x12a   :  { %v563_v9 = vadd.f32 %v1234_v55, %v1501_v37  ;;  %v554_v56 = vpop.f32.mrb[37].mxu0 }
 0x12b   :  { %v555_v57 = vadd.f32 %v1501_v37, %v554_v56  ;;  %v1235_v58 = vpop.f32.mrb[38].mxu0  ;;  %842 = vmatmul.mubr.bf16.vlgmr.msra.gmra.mrb[16].mxu1 %v1304_v49 }
 0x12c   :  { %v703_v59 = vmax.f32 %v563_v9, 0.0  ;;  %v566_v60 = vadd.f32 %v1235_v58, %v1501_v37  ;;  %v557_v61 = vpop.f32.mrb[39].mxu0  ;;  %1163 = vmatpush3.bf16.msra.mxu1 %v753_v54  ;;  %849 = vmatprep.mubr.bf16.mxu1 %v1307_v53 }
 0x12d   :  { %v558_v7 = vadd.f32 %v1501_v37, %v557_v61  ;;  %1164 = vmatprep.subr.bf16.mxu1 %v1521_v13  ;;  %v701_v63 = vmax.f32 %v555_v57, 0.0 }
 0x12e   :  { %v704_v62 = vmax.f32 %v566_v60, 0.0 }
 0x12f   :  { %v702_v16 = vmax.f32 %v558_v7, 0.0 }
 0x130   :  { %v756_v1 = vpack.c.bf16 %v704_v62, %v703_v59  ;;  %1165 = vmatpush3.bf16.msra.mxu1 %v754_v52 }
 0x131   :  { %v755_v3 = vpack.c.bf16 %v702_v16, %v701_v63  ;;  %v1238_v4 = vpop.f32.mrb[40].mxu0  ;;  %1166 = vmatprep.subr.bf16.mxu1 %v1541_v45 }
 0x132   :  { %v579_v51 = vadd.f32 %v1238_v4, %v1501_v37  ;;  %v570_v13 = vpop.f32.mrb[41].mxu0 }
 0x133   :  { %v571_v5 = vadd.f32 %v1501_v37, %v570_v13  ;;  %v1239_v6 = vpop.f32.mrb[42].mxu0  ;;  %850 = vmatmul.mubr.bf16.gmra.mrb[20].mxu1 %v1309_v0  ;;  %v915_v13 = vlaneseq }
 0x134   :  { %v707_v10 = vmax.f32 %v579_v51, 0.0  ;;  %v582_v15 = vadd.f32 %v1239_v6, %v1501_v37  ;;  %v573_v50 = vpop.f32.mrb[43].mxu0  ;;  %1167 = vmatpush3.bf16.msra.mxu1 %v755_v3  ;;  %890 = vmatprep.mubr.bf16.mxu1 %v1312_v2 }
 0x135   :  { %v574_v17 = vadd.f32 %v1501_v37, %v573_v50  ;;  %1168 = vmatprep.subr.bf16.mxu1 %v1537_v42  ;;  %v705_v19 = vmax.f32 %v571_v5, 0.0  ;;  %v916_v5 = vshrl.u32 %v915_v13, 7 }
 0x136   :  { %v708_v18 = vmax.f32 %v582_v15, 0.0 }
 0x137   :  { %v706_v45 = vmax.f32 %v574_v17, 0.0  ;;  %v917_v6 = vsub.s32 0, %v916_v5  ;;  %v921_v15 = vsub.s32 1, %v916_v5 }
 0x138   :  { %v758_v20 = vpack.c.bf16 %v708_v18, %v707_v10  ;;  %1169 = vmatpush3.bf16.msra.mxu1 %v756_v1  ;;  %v913_v10 = vld [vmem:[%s1680_s5] sm:$0x3] }
 0x139   :  { %v757_v21 = vpack.c.bf16 %v706_v45, %v705_v19  ;;  %v1242_v22 = vpop.f32.mrb[44].mxu0  ;;  %1170 = vmatprep.subr.bf16.mxu1 %v1557_v11  ;;  %v918_v50 = vrot.slane %v913_v10, %v917_v6  ;;  %v922_v17 = vrot.slane %v913_v10, %v921_v15 }
 0x13a   :  { %v595_v23 = vadd.f32 %v1242_v22, %v1501_v37  ;;  %v586_v24 = vpop.f32.mrb[45].mxu0 }
 0x13b   :  { %v587_v14 = vadd.f32 %v1501_v37, %v586_v24  ;;  %v1243_v25 = vpop.f32.mrb[46].mxu0 }
 0x13c   :  { %v711_v26 = vmax.f32 %v595_v23, 0.0  ;;  %v598_v27 = vadd.f32 %v1243_v25, %v1501_v37  ;;  %v589_v28 = vpop.f32.mrb[47].mxu0  ;;  %1171 = vmatpush3.bf16.msra.mxu1 %v757_v21 }
 0x13d   :  { %v590_v42 = vadd.f32 %v1501_v37, %v589_v28  ;;  %1172 = vmatprep.subr.bf16.mxu1 %v1553_v8  ;;  %v709_v29 = vmax.f32 %v587_v14, 0.0  ;;  %v1313_v37 = vld [vmem:[%s1677_s3 + $0x2c] ss:$16 sps:$4 sm:$0xff]   ;;  %v1315_v8 = vld [vmem:[%s1677_s3 + $0x28] ss:$16 sps:$4 sm:$0xff]  }
 0x13e   :  { %v712_v12 = vmax.f32 %v598_v27, 0.0 }
 0x13f   :  { %v710_v30 = vmax.f32 %v590_v42, 0.0 }
 0x140   :  { %v760_v31 = vpack.c.bf16 %v712_v12, %v711_v26  ;;  %1173 = vmatpush3.bf16.msra.mxu1 %v758_v20 }
 0x141   :  { %v759_v11 = vpack.c.bf16 %v710_v30, %v709_v29  ;;  %1174 = vmatprep.subr.bf16.mxu1 %v1569_v48  ;;  %v1318_v48 = vld [vmem:[%s1679_s4 + $0x4] ss:$8 sps:$4 sm:$0xff]  }
 0x144   :  { %1175 = vmatpush3.bf16.msra.mxu1 %v759_v11 }
 0x145   :  { %1176 = vmatprep.subr.bf16.mxu1 %v1567_v44  ;;  %v1316_v44 = vld [vmem:[%s1679_s4] ss:$8 sps:$4 sm:$0xff]  }
 0x148   :  { %1177 = vmatpush3.bf16.msra.mxu1 %v760_v31 }
 0x149   :  { %952 = vmatprep.subr.bf16.mxu1 %v1318_v48 }
 0x14b   :  { %891 = vmatmul.mubr.bf16.vlgmr.msra.gmra.mrb[24].mxu1 %v1310_v32 }
 0x14c   :  { %898 = vmatprep.mubr.bf16.mxu1 %v1313_v37  ;;  %953 = vmatpush1.bf16.msra.mxu1 %v1316_v44 }
 0x14d   :  { %954 = vmatprep.subr.bf16.mxu1 %v1321_v34 }
 0x150   :  { %955 = vmatpush1.bf16.msra.mxu1 %v1319_v33 }
 0x153   :  { %899 = vmatmul.mubr.bf16.gmra.mrb[28].mxu1 %v1315_v8 }
 0x154   :  { %984 = vmatprep.mubr.bf16.mxu1 %v1322_v35 }
 0x1fe   :  { %v1150_v36 = vpop.f32.mrb[16].mxu1 }
 0x1ff   :  { %v1151_v43 = vpop.f32.mrb[17].mxu1 }
 0x200   :  { %v1152_v38 = vadd.f32 %v1151_v43, %v1150_v36  ;;  %v1153_v39 = vpop.f32.mrb[18].mxu1 }
 0x201   :  { %v1154_v40 = vpop.f32.mrb[19].mxu1 }
 0x202   :  { %v1155_v46 = vadd.f32 %v1154_v40, %v1153_v39 }
 0x206   :  { %v1156_v41 = vpop.f32.mrb[20].mxu1 }
 0x207   :  { %v1157_v47 = vpop.f32.mrb[21].mxu1 }
 0x208   :  { %v1158_v49 = vadd.f32 %v1157_v47, %v1156_v41  ;;  %v1159_v52 = vpop.f32.mrb[22].mxu1 }
 0x209   :  { %v1160_v53 = vpop.f32.mrb[23].mxu1 }
 0x20a   :  { %v1161_v54 = vadd.f32 %v1160_v53, %v1159_v52 }
 0x21e   :  { %v1178_v55 = vpop.f32.mrb[24].mxu1 }
 0x21f   :  { %v1179_v9 = vpop.f32.mrb[25].mxu1 }
 0x220   :  { %v1180_v56 = vadd.f32 %v1179_v9, %v1178_v55  ;;  %v1181_v57 = vpop.f32.mrb[26].mxu1 }
 0x221   :  { %v1182_v58 = vpop.f32.mrb[27].mxu1 }
 0x222   :  { %v893_v59 = vadd.f32 %v1180_v56, %v1152_v38  ;;  %v1183_v60 = vadd.f32 %v1182_v58, %v1181_v57 }
 0x224   :  { %v896_v61 = vadd.f32 %v1183_v60, %v1155_v46 }
 0x226   :  { %v907_v7 = vpack.c.bf16 %v896_v61, %v893_v59  ;;  %v1184_v62 = vpop.f32.mrb[28].mxu1 }
 0x227   :  { %v1185_v63 = vpop.f32.mrb[29].mxu1 }
 0x228   :  { %v1186_v16 = vadd.f32 %v1185_v63, %v1184_v62  ;;  %v1187_v0 = vpop.f32.mrb[30].mxu1  ;;  %1097 = vmatmul.mubr.msk.bf16.vlgmr.msra.gmra.mrb[32].mxu1 %vm945_vm2, %v907_v7 }
 0x229   :  { %v1188_v1 = vpop.f32.mrb[31].mxu1  ;;  %994 = vmatprep.mubr.bf16.mxu1 %v1322_v35 }
 0x22a   :  { %v901_v2 = vadd.f32 %v1186_v16, %v1158_v49  ;;  %v1189_v3 = vadd.f32 %v1188_v1, %v1187_v0 }
 0x22c   :  { %v904_v4 = vadd.f32 %v1189_v3, %v1161_v54 }
 0x22e   :  { %v908_v51 = vpack.c.bf16 %v904_v4, %v901_v2 }
 0x230   :  { %1098 = vmatmul.mubr.msk.bf16.gmra.mrb[36].mxu1 %vm945_vm2, %v908_v51 }
 0x2fb   :  { %v986_v18 = vpop.f32.mrb[32].mxu1 }
 0x2fc   :  { %v987_v19 = vadd.f32 %v986_v18, %v918_v50  ;;  %v988_v45 = vpop.f32.mrb[33].mxu1 }
 0x2fd   :  { %v989_v20 = vadd.f32 %v988_v45, %v922_v17  ;;  %v990_v21 = vpop.f32.mrb[34].mxu1 }
 0x2fe   :  { %1005 = vst [vmem:[%s1681_s6] sm:$0xff] %v987_v19  ;;  %v991_v22 = vadd.f32 %v990_v21, %v918_v50  ;;  %v992_v23 = vpop.f32.mrb[35].mxu1 }
 0x2ff   :  { %1006 = vst [vmem:[%s1681_s6 + $0x8] sm:$0xff] %v989_v20  ;;  %v993_v24 = vadd.f32 %v992_v23, %v922_v17 }
 0x300   :  { %1007 = vst [vmem:[%s1681_s6 + $0x10] sm:$0xff] %v991_v22 }
 0x301   :  { %1008 = vst [vmem:[%s1681_s6 + $0x18] sm:$0xff] %v993_v24 }
 0x303   :  { %v996_v14 = vpop.f32.mrb[36].mxu1 }
 0x304   :  { %v997_v25 = vadd.f32 %v996_v14, %v918_v50  ;;  %v998_v26 = vpop.f32.mrb[37].mxu1 }
 0x305   :  { %v999_v27 = vadd.f32 %v998_v26, %v922_v17  ;;  %v1000_v28 = vpop.f32.mrb[38].mxu1 }
 0x306   :  { %1009 = vst [vmem:[%s1681_s6 + $0x20] sm:$0xff] %v997_v25  ;;  %v1001_v42 = vadd.f32 %v1000_v28, %v918_v50  ;;  %v1002_v12 = vpop.f32.mrb[39].mxu1 }
 0x307   :  { %1010 = vst [vmem:[%s1681_s6 + $0x28] sm:$0xff] %v999_v27  ;;  %v1003_v29 = vadd.f32 %v1002_v12, %v922_v17 }
 0x308   :  { %1011 = vst [vmem:[%s1681_s6 + $0x30] sm:$0xff] %v1001_v42 }
 0x309   :  { %1012 = vst [vmem:[%s1681_s6 + $0x38] sm:$0xff] %v1003_v29 }

// kernel: seed_model_forward.5
= control target key start
LH: loop header
LB: loop body
LE: loop exit
PB: predicated region body
PF: predicated region fallthrough
CT: control target
= control target key end

     0   :  { %vm4295_vm0 = vmmov 0   ;;  %vm827_vm1 = vcmask 523264   ;;  %vm877_vm2 = vcmask 130048   ;;  %vm1081_vm3 = vcmask 1048064   ;;  %s5686_s1 = inlined_call_operand.vmem [shape: bf16[256,768], index: 1, kind: input, shape index: {}]   ;;  %s5687_s0 = inlined_call_operand.vmem [shape: f32[32,256], index: 0, kind: input, shape index: {}]   ;;  %s5688_s2 = inlined_call_operand.vmem [shape: f32[1,768], index: 2, kind: input, shape index: {}]   ;;  %s5689_s3 = inlined_call_operand.vmem [shape: bf16[256,256], index: 3, kind: input, shape index: {}]   ;;  %s5690_s4 = inlined_call_operand.vmem [shape: f32[1,256], index: 4, kind: input, shape index: {}]   ;;  %s5691_s7 = inlined_call_operand.vmem [shape: bf16[256,512], index: 7, kind: input, shape index: {}]   ;;  %s5692_s9 = inlined_call_operand.vmem [shape: bf16[512,256], index: 9, kind: input, shape index: {}]   ;;  %s5693_s5 = inlined_call_operand.vmem [shape: f32[1,256], index: 5, kind: input, shape index: {}]   ;;  %s5694_s6 = inlined_call_operand.vmem [shape: f32[1,256], index: 6, kind: input, shape index: {}]   ;;  %s5695_s8 = inlined_call_operand.vmem [shape: f32[1,512], index: 8, kind: input, shape index: {}]   ;;  %s5696_s10 = inlined_call_operand.vmem [shape: f32[1,256], index: 10, kind: input, shape index: {}]   ;;  %s5697_s11 = inlined_call_operand.vmem [shape: f32[1,256], index: 11, kind: input, shape index: {}]   ;;  %s5698_s12 = inlined_call_operand.vmem [shape: f32[1,256], index: 12, kind: input, shape index: {}]   ;;  %s5699_s13 = inlined_call_operand.vmem [shape: f32[32,256], index: 13, kind: output, shape index: {}]  }
   0x1   :  { %v3822_v0 = vld [vmem:[%s5686_s1 + $0xc] ss:$24 sps:$4 sm:$0xff]   ;;  %v3824_v1 = vld [vmem:[%s5686_s1 + $0x8] ss:$24 sps:$4 sm:$0xff]   ;;  %v3825_v2 = vld [vmem:[%s5686_s1 + $0x3c] ss:$24 sps:$4 sm:$0xff]  }
   0x2   :  { %718 = vmatprep.subr.bf16.mxu1 %v3822_v0  ;;  %v3827_v3 = vld [vmem:[%s5686_s1 + $0x38] ss:$24 sps:$4 sm:$0xff]   ;;  %v3828_v4 = vld [vmem:[%s5686_s1 + $0x4] ss:$24 sps:$4 sm:$0xff]   ;;  %v3834_v7 = vld [vmem:[%s5686_s1 + $0x34] ss:$24 sps:$4 sm:$0xff]  }
   0x3   :  { %719 = vmatpush1.bf16.msra.mxu1 %v3824_v1  ;;  %v3830_v5 = vld [vmem:[%s5686_s1 + $0x6c] ss:$24 sps:$4 sm:$0xff]   ;;  %v3832_v6 = vld [vmem:[%s5686_s1] ss:$24 sps:$4 sm:$0xff]   ;;  %665 = vmatprep.subr.bf16.mxu0 %v3828_v4  ;;  %v3836_v9 = vld [vmem:[%s5686_s1 + $0x9c] ss:$24 sps:$4 sm:$0xff]  }
   0x4   :  { %720 = vmatprep.subr.bf16.mxu1 %v3825_v2  ;;  %666 = vmatpush1.bf16.msra.mxu0 %v3832_v6  ;;  %v3833_v8 = vld [vmem:[%s5686_s1 + $0x68] ss:$24 sps:$4 sm:$0xff]   ;;  %v3840_v11 = vld [vmem:[%s5686_s1 + $0x64] ss:$24 sps:$4 sm:$0xff]   ;;  %v3839_v12 = vld [vmem:[%s5686_s1 + $0x98] ss:$24 sps:$4 sm:$0xff]  }
   0x5   :  { %v3838_v10 = vld [vmem:[%s5686_s1 + $0x30] ss:$24 sps:$4 sm:$0xff]   ;;  %667 = vmatprep.subr.bf16.mxu0 %v3834_v7  ;;  %v3844_v13 = vld [vmem:[%s5686_s1 + $0x60] ss:$24 sps:$4 sm:$0xff]   ;;  %v3846_v14 = vld [vmem:[%s5686_s1 + $0x94] ss:$24 sps:$4 sm:$0xff]  }
   0x6   :  { %v3842_v15 = vld [vmem:[%s5686_s1 + $0xcc] ss:$24 sps:$4 sm:$0xff]   ;;  %v3850_v16 = vld [vmem:[%s5686_s1 + $0x90] ss:$24 sps:$4 sm:$0xff]   ;;  %v3848_v19 = vld [vmem:[%s5686_s1 + $0xfc] ss:$24 sps:$4 sm:$0xff]  }
   0x7   :  { %721 = vmatpush1.bf16.msra.mxu1 %v3827_v3  ;;  %v3845_v17 = vld [vmem:[%s5686_s1 + $0xc8] ss:$24 sps:$4 sm:$0xff]   ;;  %v3852_v18 = vld [vmem:[%s5686_s1 + $0xc4] ss:$24 sps:$4 sm:$0xff]   ;;  %v3851_v20 = vld [vmem:[%s5686_s1 + $0xf8] ss:$24 sps:$4 sm:$0xff]  }
   0x8   :  { %722 = vmatprep.subr.bf16.mxu1 %v3830_v5  ;;  %668 = vmatpush1.bf16.msra.mxu0 %v3838_v10  ;;  %v3856_v21 = vld [vmem:[%s5686_s1 + $0xc0] ss:$24 sps:$4 sm:$0xff]   ;;  %v3858_v22 = vld [vmem:[%s5686_s1 + $0xf4] ss:$24 sps:$4 sm:$0xff]   ;;  %v3862_v24 = vld [vmem:[%s5686_s1 + $0xf0] ss:$24 sps:$4 sm:$0xff]  }
   0x9   :  { %669 = vmatprep.subr.bf16.mxu0 %v3840_v11  ;;  %v3854_v23 = vld [vmem:[%s5686_s1 + $0x12c] ss:$24 sps:$4 sm:$0xff]   ;;  %v3857_v25 = vld [vmem:[%s5686_s1 + $0x128] ss:$24 sps:$4 sm:$0xff]   ;;  %v3860_v27 = vld [vmem:[%s5686_s1 + $0x15c] ss:$24 sps:$4 sm:$0xff]  }
   0xa   :  { %v3864_v26 = vld [vmem:[%s5686_s1 + $0x124] ss:$24 sps:$4 sm:$0xff]   ;;  %v3863_v28 = vld [vmem:[%s5686_s1 + $0x158] ss:$24 sps:$4 sm:$0xff]   ;;  %v3870_v30 = vld [vmem:[%s5686_s1 + $0x154] ss:$24 sps:$4 sm:$0xff]  }
   0xb   :  { %723 = vmatpush1.bf16.msra.mxu1 %v3833_v8  ;;  %v3868_v29 = vld [vmem:[%s5686_s1 + $0x120] ss:$24 sps:$4 sm:$0xff]   ;;  %v3866_v31 = vld [vmem:[%s5686_s1 + $0x18c] ss:$24 sps:$4 sm:$0xff]   ;;  %v3874_v32 = vld [vmem:[%s5686_s1 + $0x150] ss:$24 sps:$4 sm:$0xff]  }
   0xc   :  { %724 = vmatprep.subr.bf16.mxu1 %v3836_v9  ;;  %670 = vmatpush1.bf16.msra.mxu0 %v3844_v13  ;;  %v3869_v33 = vld [vmem:[%s5686_s1 + $0x188] ss:$24 sps:$4 sm:$0xff]   ;;  %v3876_v34 = vld [vmem:[%s5686_s1 + $0x184] ss:$24 sps:$4 sm:$0xff]   ;;  %v3875_v36 = vld [vmem:[%s5686_s1 + $0x1b8] ss:$24 sps:$4 sm:$0xff]  }
   0xd   :  { %671 = vmatprep.subr.bf16.mxu0 %v3846_v14  ;;  %v3872_v35 = vld [vmem:[%s5686_s1 + $0x1bc] ss:$24 sps:$4 sm:$0xff]   ;;  %v3880_v37 = vld [vmem:[%s5686_s1 + $0x180] ss:$24 sps:$4 sm:$0xff]   ;;  %v3878_v39 = vld [vmem:[%s5686_s1 + $0x1ec] ss:$24 sps:$4 sm:$0xff]  }
   0xe   :  { %v3882_v38 = vld [vmem:[%s5686_s1 + $0x1b4] ss:$24 sps:$4 sm:$0xff]   ;;  %v3886_v40 = vld [vmem:[%s5686_s1 + $0x1b0] ss:$24 sps:$4 sm:$0xff]   ;;  %v3888_v43 = vld [vmem:[%s5686_s1 + $0x1e4] ss:$24 sps:$4 sm:$0xff]  }
   0xf   :  { %725 = vmatpush1.bf16.msra.mxu1 %v3839_v12  ;;  %v3881_v41 = vld [vmem:[%s5686_s1 + $0x1e8] ss:$24 sps:$4 sm:$0xff]   ;;  %v3884_v42 = vld [vmem:[%s5686_s1 + $0x21c] ss:$24 sps:$4 sm:$0xff]   ;;  %v3887_v48 = vld [vmem:[%s5686_s1 + $0x218] ss:$24 sps:$4 sm:$0xff]  }
  0x10   :  { %726 = vmatprep.subr.bf16.mxu1 %v3842_v15  ;;  %672 = vmatpush1.bf16.msra.mxu0 %v3850_v16  ;;  %v46_v44 = vld [vmem:[%s5687_s0 + $0x8] sm:$0xff]  ;;  %v48_v45 = vld [vmem:[%s5687_s0 + $0x18] sm:$0xff]  ;;  %v45_v0 = vld [vmem:[%s5687_s0] sm:$0xff] }
  0x11   :  { %673 = vmatprep.subr.bf16.mxu0 %v3852_v18  ;;  %v4505_v46 = vpack.c.bf16 %v48_v45, %v46_v44  ;;  %v3892_v47 = vld [vmem:[%s5686_s1 + $0x1e0] ss:$24 sps:$4 sm:$0xff]   ;;  %v3894_v49 = vld [vmem:[%s5686_s1 + $0x214] ss:$24 sps:$4 sm:$0xff]   ;;  %v3898_v51 = vld [vmem:[%s5686_s1 + $0x210] ss:$24 sps:$4 sm:$0xff]   ;;  %v155_v45 = vlaneseq }
  0x12   :  { %v3890_v50 = vld [vmem:[%s5686_s1 + $0x24c] ss:$24 sps:$4 sm:$0xff]   ;;  %v3893_v52 = vld [vmem:[%s5686_s1 + $0x248] ss:$24 sps:$4 sm:$0xff]   ;;  %v3896_v54 = vld [vmem:[%s5686_s1 + $0x27c] ss:$24 sps:$4 sm:$0xff]  }
  0x13   :  { %727 = vmatpush1.bf16.msra.mxu1 %v3845_v17  ;;  %750 = vmatprep.mubr.bf16.mxu1 %v4505_v46  ;;  %v3900_v53 = vld [vmem:[%s5686_s1 + $0x244] ss:$24 sps:$4 sm:$0xff]   ;;  %v3904_v55 = vld [vmem:[%s5686_s1 + $0x240] ss:$24 sps:$4 sm:$0xff]   ;;  %v3906_v57 = vld [vmem:[%s5686_s1 + $0x274] ss:$24 sps:$4 sm:$0xff]  }
  0x14   :  { %728 = vmatprep.subr.bf16.mxu1 %v3848_v19  ;;  %674 = vmatpush1.bf16.msra.mxu0 %v3856_v21  ;;  %v3899_v56 = vld [vmem:[%s5686_s1 + $0x278] ss:$24 sps:$4 sm:$0xff]   ;;  %v3902_v58 = vld [vmem:[%s5686_s1 + $0x2ac] ss:$24 sps:$4 sm:$0xff]   ;;  %v3905_v60 = vld [vmem:[%s5686_s1 + $0x2a8] ss:$24 sps:$4 sm:$0xff]  }
  0x15   :  { %675 = vmatprep.subr.bf16.mxu0 %v3858_v22  ;;  %697 = vmatprep.mubr.bf16.mxu0 %v4505_v46  ;;  %v3910_v59 = vld [vmem:[%s5686_s1 + $0x270] ss:$24 sps:$4 sm:$0xff]   ;;  %v3912_v61 = vld [vmem:[%s5686_s1 + $0x2a4] ss:$24 sps:$4 sm:$0xff]   ;;  %v3914_v1 = vld [vmem:[%s5686_s1 + $0x2a0] ss:$24 sps:$4 sm:$0xff]  }
  0x16   :  { %v3908_v62 = vld [vmem:[%s5686_s1 + $0x2dc] ss:$24 sps:$4 sm:$0xff]   ;;  %v3911_v63 = vld [vmem:[%s5686_s1 + $0x2d8] ss:$24 sps:$4 sm:$0xff]   ;;  %v50_v6 = vld [vmem:[%s5687_s0 + $0x28] sm:$0xff]  ;;  %v4294_v44 = vmov 0.0  }
  0x17   :  { %729 = vmatpush1.bf16.msra.mxu1 %v3851_v20  ;;  %v47_v2 = vld [vmem:[%s5687_s0 + $0x10] sm:$0xff]  ;;  %v52_v8 = vld [vmem:[%s5687_s0 + $0x38] sm:$0xff]  ;;  %v49_v12 = vld [vmem:[%s5687_s0 + $0x20] sm:$0xff] }
  0x18   :  { %730 = vmatprep.subr.bf16.mxu1 %v3854_v23  ;;  %676 = vmatpush1.bf16.msra.mxu0 %v3862_v24  ;;  %v3915_v3 = vld [vmem:[%s5686_s1 + $0x2d4] ss:$24 sps:$4 sm:$0xff]   ;;  %v4572_v4 = vpack.c.bf16 %v47_v2, %v45_v0  ;;  %v3917_v5 = vld [vmem:[%s5686_s1 + $0x2d0] ss:$24 sps:$4 sm:$0xff]   ;;  %v4586_v9 = vpack.c.bf16 %v52_v8, %v50_v6  ;;  %v3923_v11 = vld [vmem:[%s5686_s1 + $0x44] ss:$24 sps:$4 sm:$0xff]  }
  0x19   :  { %677 = vmatprep.subr.bf16.mxu0 %v3864_v26  ;;  %v3920_v7 = vld [vmem:[%s5686_s1 + $0x14] ss:$24 sps:$4 sm:$0xff]   ;;  %v3918_v10 = vld [vmem:[%s5686_s1 + $0x10] ss:$24 sps:$4 sm:$0xff]   ;;  %v3921_v14 = vld [vmem:[%s5686_s1 + $0x40] ss:$24 sps:$4 sm:$0xff]  }
  0x1a   :  { %v51_v13 = vld [vmem:[%s5687_s0 + $0x30] sm:$0xff]  ;;  %v3929_v18 = vld [vmem:[%s5686_s1 + $0xa4] ss:$24 sps:$4 sm:$0xff]   ;;  %v3927_v19 = vld [vmem:[%s5686_s1 + $0xa0] ss:$24 sps:$4 sm:$0xff]  }
  0x1b   :  { %731 = vmatpush1.bf16.msra.mxu1 %v3857_v25  ;;  %v3926_v15 = vld [vmem:[%s5686_s1 + $0x74] ss:$24 sps:$4 sm:$0xff]   ;;  %v55_v16 = vpack.c.bf16 %v51_v13, %v49_v12  ;;  %v3924_v17 = vld [vmem:[%s5686_s1 + $0x70] ss:$24 sps:$4 sm:$0xff]   ;;  %v3935_v22 = vld [vmem:[%s5686_s1 + $0x104] ss:$24 sps:$4 sm:$0xff]  }
  0x1c   :  { %732 = vmatprep.subr.bf16.mxu1 %v3860_v27  ;;  %678 = vmatpush1.bf16.msra.mxu0 %v3868_v29  ;;  %v3932_v20 = vld [vmem:[%s5686_s1 + $0xd4] ss:$24 sps:$4 sm:$0xff]   ;;  %v3930_v21 = vld [vmem:[%s5686_s1 + $0xd0] ss:$24 sps:$4 sm:$0xff]   ;;  %v3933_v23 = vld [vmem:[%s5686_s1 + $0x100] ss:$24 sps:$4 sm:$0xff]  }
  0x1d   :  { %679 = vmatprep.subr.bf16.mxu0 %v3870_v30  ;;  %v3938_v24 = vld [vmem:[%s5686_s1 + $0x134] ss:$24 sps:$4 sm:$0xff]   ;;  %v3936_v25 = vld [vmem:[%s5686_s1 + $0x130] ss:$24 sps:$4 sm:$0xff]   ;;  %v3941_v26 = vld [vmem:[%s5686_s1 + $0x164] ss:$24 sps:$4 sm:$0xff]  }
  0x1e   :  { %v3939_v27 = vld [vmem:[%s5686_s1 + $0x160] ss:$24 sps:$4 sm:$0xff]   ;;  %v3942_v29 = vld [vmem:[%s5686_s1 + $0x190] ss:$24 sps:$4 sm:$0xff]   ;;  %v3947_v30 = vld [vmem:[%s5686_s1 + $0x1c4] ss:$24 sps:$4 sm:$0xff]  }
  0x1f   :  { %733 = vmatpush1.bf16.msra.mxu1 %v3863_v28  ;;  %v3944_v28 = vld [vmem:[%s5686_s1 + $0x194] ss:$24 sps:$4 sm:$0xff]  }
  0x20   :  { %734 = vmatprep.subr.bf16.mxu1 %v3866_v31  ;;  %680 = vmatpush1.bf16.msra.mxu0 %v3874_v32  ;;  %v3945_v31 = vld [vmem:[%s5686_s1 + $0x1c0] ss:$24 sps:$4 sm:$0xff]   ;;  %v3950_v32 = vld [vmem:[%s5686_s1 + $0x1f4] ss:$24 sps:$4 sm:$0xff]  }
  0x21   :  { %681 = vmatprep.subr.bf16.mxu0 %v3876_v34  ;;  %v3953_v34 = vld [vmem:[%s5686_s1 + $0x224] ss:$24 sps:$4 sm:$0xff]  }
  0x23   :  { %735 = vmatpush1.bf16.msra.mxu1 %v3869_v33  ;;  %v3948_v33 = vld [vmem:[%s5686_s1 + $0x1f0] ss:$24 sps:$4 sm:$0xff]  }
  0x24   :  { %736 = vmatprep.subr.bf16.mxu1 %v3872_v35  ;;  %682 = vmatpush1.bf16.msra.mxu0 %v3880_v37  ;;  %v3951_v35 = vld [vmem:[%s5686_s1 + $0x220] ss:$24 sps:$4 sm:$0xff]   ;;  %v3954_v37 = vld [vmem:[%s5686_s1 + $0x250] ss:$24 sps:$4 sm:$0xff]  }
  0x25   :  { %683 = vmatprep.subr.bf16.mxu0 %v3882_v38  ;;  %v3959_v38 = vld [vmem:[%s5686_s1 + $0x284] ss:$24 sps:$4 sm:$0xff]  }
  0x27   :  { %737 = vmatpush1.bf16.msra.mxu1 %v3875_v36  ;;  %v3956_v36 = vld [vmem:[%s5686_s1 + $0x254] ss:$24 sps:$4 sm:$0xff]  }
  0x28   :  { %738 = vmatprep.subr.bf16.mxu1 %v3878_v39  ;;  %684 = vmatpush1.bf16.msra.mxu0 %v3886_v40  ;;  %v3957_v39 = vld [vmem:[%s5686_s1 + $0x280] ss:$24 sps:$4 sm:$0xff]   ;;  %v3962_v40 = vld [vmem:[%s5686_s1 + $0x2b4] ss:$24 sps:$4 sm:$0xff]  }
  0x29   :  { %685 = vmatprep.subr.bf16.mxu0 %v3888_v43  ;;  %v3963_v43 = vld [vmem:[%s5686_s1 + $0x2e0] ss:$24 sps:$4 sm:$0xff]  }
  0x2b   :  { %739 = vmatpush1.bf16.msra.mxu1 %v3881_v41  ;;  %v3960_v41 = vld [vmem:[%s5686_s1 + $0x2b0] ss:$24 sps:$4 sm:$0xff]  }
  0x2c   :  { %740 = vmatprep.subr.bf16.mxu1 %v3884_v42  ;;  %686 = vmatpush1.bf16.msra.mxu0 %v3892_v47  ;;  %v3965_v42 = vld [vmem:[%s5686_s1 + $0x2e4] ss:$24 sps:$4 sm:$0xff]  }
  0x2d   :  { %687 = vmatprep.subr.bf16.mxu0 %v3894_v49 }
  0x2f   :  { %741 = vmatpush1.bf16.msra.mxu1 %v3887_v48  ;;  %v153_v48 = vld [vmem:[%s5688_s2] sm:$0x3f]  ;;  %s4296_s2 = smov 64  }
  0x30   :  { %742 = vmatprep.subr.bf16.mxu1 %v3890_v50  ;;  %688 = vmatpush1.bf16.msra.mxu0 %v3898_v51 }
  0x31   :  { %689 = vmatprep.subr.bf16.mxu0 %v3900_v53 }
  0x33   :  { %743 = vmatpush1.bf16.msra.mxu1 %v3893_v52 }
  0x34   :  { %744 = vmatprep.subr.bf16.mxu1 %v3896_v54  ;;  %690 = vmatpush1.bf16.msra.mxu0 %v3904_v55 }
  0x35   :  { %691 = vmatprep.subr.bf16.mxu0 %v3906_v57 }
  0x37   :  { %745 = vmatpush1.bf16.msra.mxu1 %v3899_v56 }
  0x38   :  { %746 = vmatprep.subr.bf16.mxu1 %v3902_v58  ;;  %692 = vmatpush1.bf16.msra.mxu0 %v3910_v59 }
  0x39   :  { %693 = vmatprep.subr.bf16.mxu0 %v3912_v61 }
  0x3b   :  { %747 = vmatpush1.bf16.msra.mxu1 %v3905_v60 }
  0x3c   :  { %748 = vmatprep.subr.bf16.mxu1 %v3908_v62  ;;  %694 = vmatpush1.bf16.msra.mxu0 %v3914_v1 }
  0x3d   :  { %695 = vmatprep.subr.bf16.mxu0 %v3915_v3 }
  0x3f   :  { %749 = vmatpush1.bf16.msra.mxu1 %v3911_v63 }
  0x40   :  { %696 = vmatpush1.bf16.msra.mxu0 %v3917_v5  ;;  %3731 = vmatprep.subr.bf16.mxu1 %v4294_v44 }
  0x41   :  { %771 = vmatprep.subr.bf16.mxu0 %v3920_v7 }
  0x42   :  { %751 = vmatmul.mubr.bf16.vlgmr.msra.gmra.mrb[0].mxu1 %v4572_v4 }
  0x43   :  { %760 = vmatprep.mubr.bf16.mxu1 %v4586_v9  ;;  %698 = vmatmul.mubr.bf16.vlgmr.msra.gmra.mrb[0].mxu0 %v4572_v4 }
  0x44   :  { %772 = vmatpush1.bf16.msra.mxu0 %v3918_v10  ;;  %707 = vmatprep.mubr.bf16.mxu0 %v4586_v9 }
  0x45   :  { %773 = vmatprep.subr.bf16.mxu0 %v3923_v11 }
  0x48   :  { %774 = vmatpush1.bf16.msra.mxu0 %v3921_v14 }
  0x49   :  { %775 = vmatprep.subr.bf16.mxu0 %v3926_v15 }
  0x4a   :  { %761 = vmatmul.mubr.bf16.gmra.mrb[4].mxu1 %v55_v16 }
  0x4b   :  { %708 = vmatmul.mubr.bf16.gmra.mrb[4].mxu0 %v55_v16  ;;  %3733 = vmatprep.mubr.msk.bf16.mxu1 %vm4295_vm0, %v4294_v44 }
  0x4c   :  { %776 = vmatpush1.bf16.msra.mxu0 %v3924_v17  ;;  %803 = vmatprep.mubr.bf16.mxu0 %v4505_v46  ;;  %v4700_v46 = vshrl.u32 %v155_v45, 7 }
  0x4d   :  { %777 = vmatprep.subr.bf16.mxu0 %v3929_v18 }
  0x4e   :  { %v165_v47 = vsub.s32 2, %v4700_v46  ;;  %v169_v49 = vsub.s32 3, %v4700_v46  ;;  %v4708_v50 = vsub.s32 0, %v4700_v46  ;;  %v4711_v51 = vsub.s32 1, %v4700_v46 }
  0x50   :  { %778 = vmatpush1.bf16.msra.mxu0 %v3927_v19  ;;  %v4715_v52 = vrot.slane %v153_v48, %v165_v47  ;;  %v4719_v54 = vrot.slane %v153_v48, %v169_v49  ;;  %v158_v55 = vrot.slane %v153_v48, %v4708_v50  ;;  %v162_v57 = vrot.slane %v153_v48, %v4711_v51 }
  0x51   :  { %779 = vmatprep.subr.bf16.mxu0 %v3932_v20 }
  0x54   :  { %780 = vmatpush1.bf16.msra.mxu0 %v3930_v21 }
  0x55   :  { %781 = vmatprep.subr.bf16.mxu0 %v3935_v22 }
  0x58   :  { %782 = vmatpush1.bf16.msra.mxu0 %v3933_v23 }
  0x59   :  { %783 = vmatprep.subr.bf16.mxu0 %v3938_v24 }
  0x5c   :  { %784 = vmatpush1.bf16.msra.mxu0 %v3936_v25  ;;  %v173_v25 = vsub.s32 4, %v4700_v46 }
  0x5d   :  { %785 = vmatprep.subr.bf16.mxu0 %v3941_v26  ;;  %v177_v26 = vsub.s32 5, %v4700_v46 }
  0x60   :  { %786 = vmatpush1.bf16.msra.mxu0 %v3939_v27  ;;  %v174_v27 = vrot.slane %v153_v48, %v173_v25 }
  0x61   :  { %787 = vmatprep.subr.bf16.mxu0 %v3944_v28  ;;  %v178_v28 = vrot.slane %v153_v48, %v177_v26 }
  0x64   :  { %788 = vmatpush1.bf16.msra.mxu0 %v3942_v29 }
  0x65   :  { %789 = vmatprep.subr.bf16.mxu0 %v3947_v30 }
  0x68   :  { %790 = vmatpush1.bf16.msra.mxu0 %v3945_v31 }
  0x69   :  { %791 = vmatprep.subr.bf16.mxu0 %v3950_v32 }
  0x6c   :  { %792 = vmatpush1.bf16.msra.mxu0 %v3948_v33 }
  0x6d   :  { %793 = vmatprep.subr.bf16.mxu0 %v3953_v34 }
  0x70   :  { %794 = vmatpush1.bf16.msra.mxu0 %v3951_v35 }
  0x71   :  { %795 = vmatprep.subr.bf16.mxu0 %v3956_v36 }
  0x74   :  { %796 = vmatpush1.bf16.msra.mxu0 %v3954_v37 }
  0x75   :  { %797 = vmatprep.subr.bf16.mxu0 %v3959_v38 }
  0x78   :  { %798 = vmatpush1.bf16.msra.mxu0 %v3957_v39 }
  0x79   :  { %799 = vmatprep.subr.bf16.mxu0 %v3962_v40 }
  0x7c   :  { %800 = vmatpush1.bf16.msra.mxu0 %v3960_v41 }
  0x7d   :  { %801 = vmatprep.subr.bf16.mxu0 %v3965_v42 }
  0x80   :  { %802 = vmatpush1.bf16.msra.mxu0 %v3963_v43 }
  0x81   :  { %3707 = vmatprep.subr.bf16.mxu0 %v4294_v44 }
  0x83   :  { %804 = vmatmul.mubr.bf16.vlgmr.msra.gmra.mrb[8].mxu0 %v4572_v4 }
  0x84   :  { %813 = vmatprep.mubr.bf16.mxu0 %v4586_v9 }
  0x8b   :  { %814 = vmatmul.mubr.bf16.gmra.mrb[12].mxu0 %v55_v16 }
  0x8c   :  { %3709 = vmatprep.mubr.msk.bf16.mxu0 %vm4295_vm0, %v4294_v44 }
 0x115   :  { %v752_v53 = vpop.f32.mrb[0].mxu1 }
 0x116   :  { %v754_v56 = vpop.f32.mrb[1].mxu1  ;;  %v753_v59 = vadd.f32 %v752_v53, %v4715_v52  ;;  %v699_v62 = vpop.f32.mrb[0].mxu0 }
 0x117   :  { %v756_v58 = vpop.f32.mrb[2].mxu1  ;;  %v755_v63 = vadd.f32 %v754_v56, %v4719_v54  ;;  %v700_v1 = vadd.f32 %v699_v62, %v158_v55  ;;  %v701_v2 = vpop.f32.mrb[1].mxu0 }
 0x118   :  { %v757_v60 = vadd.f32 %v756_v58, %v4715_v52  ;;  %v758_v61 = vpop.f32.mrb[3].mxu1  ;;  %v702_v4 = vadd.f32 %v701_v2, %v162_v57  ;;  %v703_v5 = vpop.f32.mrb[2].mxu0 }
 0x119   :  { %v759_v0 = vadd.f32 %v758_v61, %v4719_v54  ;;  %v704_v7 = vadd.f32 %v703_v5, %v158_v55  ;;  %v705_v8 = vpop.f32.mrb[3].mxu0 }
 0x11a   :  { %v4727_v3 = vpack.c.bf16 %v757_v60, %v753_v59  ;;  %v706_v10 = vadd.f32 %v705_v8, %v162_v57 }
 0x11b   :  { %v4729_v6 = vpack.c.bf16 %v759_v0, %v755_v63  ;;  %v4735_v12 = vpack.c.bf16 %v704_v7, %v700_v1 }
 0x11c   :  { %v832_v9 = vsel %vm827_vm1, %v4727_v3, 0  ;;  %v4737_v14 = vpack.c.bf16 %v706_v10, %v702_v4 }
 0x11d   :  { %3708 = vmatpush3.bf16.xpose.msra.mxu0 %v832_v9  ;;  %v1091_v11 = vsel %vm827_vm1, %v4729_v6, 0  ;;  %v762_v13 = vpop.f32.mrb[4].mxu1 }
 0x11e   :  { %3732 = vmatpush3.bf16.xpose.msra.mxu1 %v1091_v11  ;;  %3713 = vmatprep.subr.bf16.mxu0 %v4294_v44  ;;  %v709_v15 = vpop.f32.mrb[4].mxu0  ;;  %v763_v58 = vadd.f32 %v762_v13, %v4715_v52 }
 0x11f   :  { %3737 = vmatprep.subr.bf16.mxu1 %v4294_v44  ;;  %v710_v16 = vadd.f32 %v709_v15, %v158_v55  ;;  %v711_v17 = vpop.f32.mrb[5].mxu0 }
 0x120   :  { %v712_v18 = vadd.f32 %v711_v17, %v162_v57  ;;  %v713_v19 = vpop.f32.mrb[6].mxu0 }
 0x121   :  { %v714_v20 = vadd.f32 %v713_v19, %v158_v55  ;;  %v715_v21 = vpop.f32.mrb[7].mxu0 }
 0x122   :  { %v716_v22 = vadd.f32 %v715_v21, %v162_v57  ;;  %v764_v57 = vpop.f32.mrb[5].mxu1 }
 0x123   :  { %v4745_v23 = vpack.c.bf16 %v714_v20, %v710_v16  ;;  %v766_v59 = vpop.f32.mrb[6].mxu1  ;;  %v765_v61 = vadd.f32 %v764_v57, %v4719_v54 }
 0x124   :  { %3710 = vmatmul.mubr.msk.bf16.vlgmr.msra.gmra.mrb[16].mxu0 %vm827_vm1, %v4735_v12  ;;  %v4749_v24 = vpack.c.bf16 %v716_v22, %v712_v18  ;;  %v768_v60 = vpop.f32.mrb[7].mxu1  ;;  %v767_v62 = vadd.f32 %v766_v59, %v4715_v52 }
 0x125   :  { %3734 = vmatmul.mubr.msk.bf16.vlgmr.msra.gmra.mrb[8].mxu1 %vm827_vm1, %v4737_v14  ;;  %3715 = vmatprep.mubr.msk.bf16.mxu0 %vm4295_vm0, %v4294_v44  ;;  %v769_v63 = vadd.f32 %v768_v60, %v4719_v54 }
 0x126   :  { %3739 = vmatprep.mubr.msk.bf16.mxu1 %vm4295_vm0, %v4294_v44  ;;  %v4771_v0 = vpack.c.bf16 %v767_v62, %v763_v58 }
 0x127   :  { %v4773_v1 = vpack.c.bf16 %v769_v63, %v765_v61 }
 0x156   :  { %v805_v29 = vpop.f32.mrb[8].mxu0 }
 0x157   :  { %v806_v30 = vadd.f32 %v805_v29, %v174_v27  ;;  %v807_v31 = vpop.f32.mrb[9].mxu0 }
 0x158   :  { %v808_v32 = vadd.f32 %v807_v31, %v178_v28  ;;  %v809_v33 = vpop.f32.mrb[10].mxu0 }
 0x159   :  { %v810_v34 = vadd.f32 %v809_v33, %v174_v27  ;;  %v811_v35 = vpop.f32.mrb[11].mxu0 }
 0x15a   :  { %v812_v36 = vadd.f32 %v811_v35, %v178_v28 }
 0x15b   :  { %v4755_v37 = vpack.c.bf16 %v810_v34, %v806_v30 }
 0x15c   :  { %v4757_v38 = vpack.c.bf16 %v812_v36, %v808_v32 }
 0x15d   :  { %3714 = vmatpush3.bf16.msra.mxu0 %v4755_v37 }
 0x15e   :  { %v815_v39 = vpop.f32.mrb[12].mxu0  ;;  %3738 = vmatpush3.bf16.msra.mxu1 %v4757_v38  ;;  %3719 = vmatprep.subr.bf16.mxu0 %v4294_v44 }
 0x15f   :  { %v816_v40 = vadd.f32 %v815_v39, %v174_v27  ;;  %v817_v41 = vpop.f32.mrb[13].mxu0  ;;  %3743 = vmatprep.subr.bf16.mxu1 %v4294_v44 }
 0x160   :  { %v818_v42 = vadd.f32 %v817_v41, %v178_v28  ;;  %v819_v43 = vpop.f32.mrb[14].mxu0 }
 0x161   :  { %v820_v45 = vadd.f32 %v819_v43, %v174_v27  ;;  %v821_v48 = vpop.f32.mrb[15].mxu0 }
 0x162   :  { %v822_v53 = vadd.f32 %v821_v48, %v178_v28 }
 0x163   :  { %v4763_v55 = vpack.c.bf16 %v820_v45, %v816_v40 }
 0x164   :  { %v4765_v56 = vpack.c.bf16 %v822_v53, %v818_v42 }
 0x1f7   :  { %v868_v2 = vpop.f32.mrb[16].mxu0 }
 0x1f8   :  { %v875_v4 = vmul.f32 0.125, %v868_v2  ;;  %v3711_v5 = vpop.f32.mrb[17].mxu0  ;;  %v1127_v7 = vpop.f32.mrb[8].mxu1 }
 0x1f9   :  { %v871_v8 = vpop.f32.mrb[18].mxu0  ;;  %v3735_v9 = vpop.f32.mrb[9].mxu1 }
 0x1fa   :  { %v878_v10 = vsel %vm877_vm2, %v875_v4, -inf  ;;  %v876_v11 = vmul.f32 0.125, %v871_v8  ;;  %v1130_v13 = vpop.f32.mrb[10].mxu1  ;;  %v3712_v15 = vpop.f32.mrb[19].mxu0 }
 0x1fb   :  { %879 = vmax.xlane.f32.xlu0 %v878_v10  ;;  %v3736_v52 = vpop.f32.mrb[11].mxu1  ;;  %v1135_v16 = vmul.f32 0.125, %v1130_v13 }
 0x1fc   :  { %v881_v54 = vsel %vm877_vm2, %v876_v11, -inf }
 0x1fd   :  { %v1139_v17 = vsel %vm877_vm2, %v1135_v16, -inf }
 0x1ff   :  { %882 = vmax.xlane.f32.xlu0 %v881_v54 }
 0x215   :  { %951 = vrot.lane.b32.xlu0 %v4727_v3, %s4296_s2  ;;  %v1134_v3 = vmul.f32 0.125, %v1127_v7 }
 0x217   :  { %v1136_v30 = vsel %vm877_vm2, %v1134_v3, -inf }
 0x234   :  { %1140 = vmax.xlane.f32.xlu0 %v1139_v17 }
 0x288   :  { %v880_v18 = vpop.xlane.xlu0 %879 }
 0x289   :  { %v884_v19 = vsub.f32 %v875_v4, %v880_v18 }
 0x28b   :  { %v886_v20 = vmul.f32 1.442695, %v884_v19 }
 0x28c   :  { %v883_v21 = vpop.xlane.xlu0 %882 }
 0x28d   :  { %4206 = vpow2.f32 %v886_v20  ;;  %v885_v22 = vsub.f32 %v876_v11, %v883_v21 }
 0x28f   :  { %v888_v25 = vmul.f32 1.442695, %v885_v22 }
 0x290   :  { %v952_v39 = vpop.permute.xlu0 %951 }
 0x291   :  { %4208 = vpow2.f32 %v888_v25  ;;  %v957_v41 = vsel %vm827_vm1, %v952_v39, 0 }
 0x297   :  { %v4207_v26 = vpop.eup %4206 }
 0x298   :  { %v890_v27 = vsel %vm877_vm2, %v4207_v26, 0.0 }
 0x299   :  { %891 = vadd.xlane.f32.xlu1 %v890_v27 }
 0x29b   :  { %v4209_v28 = vpop.eup %4208 }
 0x29c   :  { %v893_v29 = vsel %vm877_vm2, %v4209_v28, 0.0 }
 0x29d   :  { %894 = vadd.xlane.f32.xlu1 %v893_v29 }
 0x2ae   :  { %948 = vrot.lane.b32.xlu1 %v4735_v12, %s4296_s2 }
 0x2c1   :  { %v1141_v43 = vpop.xlane.xlu0 %1140 }
 0x2c2   :  { %v1143_v48 = vsub.f32 %v1135_v16, %v1141_v43 }
 0x2c4   :  { %v1146_v57 = vmul.f32 1.442695, %v1143_v48 }
 0x2d2   :  { %1137 = vmax.xlane.f32.xlu1 %v1136_v30 }
 0x326   :  { %v892_v31 = vpop.xlane.xlu1 %891 }
 0x327   :  { %4210 = vrcp.f32 %v892_v31 }
 0x32a   :  { %v895_v32 = vpop.xlane.xlu1 %894 }
 0x32b   :  { %4212 = vrcp.f32 %v895_v32 }
 0x32e   :  { %v949_v12 = vpop.permute.xlu1 %948 }
 0x331   :  { %v4211_v33 = vpop.eup %4210 }
 0x332   :  { %v898_v35 = vmul.f32 %v4211_v33, %v4207_v26 }
 0x335   :  { %v4213_v34 = vpop.eup %4212 }
 0x336   :  { %v899_v36 = vmul.f32 %v4213_v34, %v4209_v28 }
 0x338   :  { %v900_v40 = vpack.c.bf16 %v899_v36, %v898_v35 }
 0x33a   :  { %3716 = vmatmul.mubr.msk.bf16.vlgmr.msra.gmra.mrb[20].mxu0 %vm877_vm2, %v900_v40 }
 0x33b   :  { %3720 = vmatpush3.bf16.xpose.msra.mxu0 %v957_v41  ;;  %3721 = vmatprep.mubr.msk.bf16.mxu0 %vm4295_vm0, %v4294_v44 }
 0x33c   :  { %3725 = vmatprep.subr.bf16.mxu0 %v4294_v44 }
 0x342   :  { %3722 = vmatmul.mubr.msk.bf16.vlgmr.msra.gmra.mrb[24].mxu0 %vm827_vm1, %v949_v12  ;;  %v1348_v12 = vsel %vm827_vm1, %v4771_v0, 0 }
 0x343   :  { %3727 = vmatprep.mubr.msk.bf16.mxu0 %vm4295_vm0, %v4294_v44 }
 0x35f   :  { %v1138_v42 = vpop.xlane.xlu1 %1137 }
 0x360   :  { %v1142_v45 = vsub.f32 %v1134_v3, %v1138_v42 }
 0x362   :  { %v1144_v53 = vmul.f32 1.442695, %v1142_v45 }
 0x364   :  { %4214 = vpow2.f32 %v1144_v53 }
 0x365   :  { %4216 = vpow2.f32 %v1146_v57 }
 0x36e   :  { %v4215_v9 = vpop.eup %4214 }
 0x36f   :  { %v4217_v11 = vpop.eup %4216  ;;  %v1148_v13 = vsel %vm877_vm2, %v4215_v9, 0.0 }
 0x370   :  { %v1151_v15 = vsel %vm877_vm2, %v4217_v11, 0.0 }
 0x40d   :  { %v938_v58 = vpop.f32.mrb[20].mxu0 }
 0x40e   :  { %945 = vst.msk [vmem:[#allocation2] sm:$0xff] %vm827_vm1, %v938_v58  ;;  %v3717_v59 = vpop.f32.mrb[21].mxu0 }
 0x40f   :  { %v941_v60 = vpop.f32.mrb[22].mxu0 }
 0x410   :  { %946 = vst.msk [vmem:[#allocation2 + $0x10] sm:$0xff] %vm827_vm1, %v941_v60  ;;  %v3718_v61 = vpop.f32.mrb[23].mxu0 }
 0x415   :  { %v993_v62 = vpop.f32.mrb[24].mxu0 }
 0x416   :  { %v1000_v63 = vmul.f32 0.125, %v993_v62  ;;  %v3723_v2 = vpop.f32.mrb[25].mxu0 }
 0x417   :  { %v996_v4 = vpop.f32.mrb[26].mxu0 }
 0x418   :  { %v1001_v5 = vmul.f32 0.125, %v996_v4  ;;  %v3724_v7 = vpop.f32.mrb[27].mxu0  ;;  %v1002_v8 = vsel %vm877_vm2, %v1000_v63, -inf }
 0x419   :  { %1003 = vmax.xlane.f32.xlu0 %v1002_v8 }
 0x41a   :  { %v1005_v10 = vsel %vm877_vm2, %v1001_v5, -inf }
 0x41b   :  { %1006 = vmax.xlane.f32.xlu1 %v1005_v10 }
 0x41d   :  { %1149 = vadd.xlane.f32.xlu0 %v1148_v13 }
 0x41f   :  { %1152 = vadd.xlane.f32.xlu1 %v1151_v15 }
 0x433   :  { %1209 = vrot.lane.b32.xlu0 %v4729_v6, %s4296_s2 }
 0x437   :  { %1026 = vrot.lane.b32.xlu0 %v4755_v37, %s4296_s2 }
 0x43b   :  { %1463 = vrot.lane.b32.xlu0 %v4745_v23, %s4296_s2 }
 0x43f   :  { %1720 = vrot.lane.b32.xlu0 %v4749_v24, %s4296_s2 }
 0x4a6   :  { %v1004_v52 = vpop.xlane.xlu0 %1003 }
 0x4a7   :  { %v1008_v54 = vsub.f32 %v1000_v63, %v1004_v52 }
 0x4a8   :  { %v1007_v16 = vpop.xlane.xlu1 %1006 }
 0x4a9   :  { %v1010_v17 = vmul.f32 1.442695, %v1008_v54  ;;  %v1009_v18 = vsub.f32 %v1001_v5, %v1007_v16 }
 0x4aa   :  { %v1150_v19 = vpop.xlane.xlu0 %1149 }
 0x4ab   :  { %4218 = vpow2.f32 %v1010_v17  ;;  %v1012_v20 = vmul.f32 1.442695, %v1009_v18 }
 0x4ac   :  { %4220 = vrcp.f32 %v1150_v19  ;;  %v1153_v21 = vpop.xlane.xlu1 %1152 }
 0x4ad   :  { %4222 = vpow2.f32 %v1012_v20 }
 0x4ae   :  { %4224 = vrcp.f32 %v1153_v21  ;;  %v1210_v6 = vpop.permute.xlu0 %1209 }
 0x4af   :  { %v1215_v32 = vsel %vm827_vm1, %v1210_v6, 0 }
 0x4b2   :  { %v1027_v37 = vpop.permute.xlu0 %1026 }
 0x4b3   :  { %3726 = vmatpush3.bf16.msra.mxu0 %v1027_v37 }
 0x4b4   :  { %3755 = vmatprep.subr.bf16.mxu0 %v4294_v44 }
 0x4b5   :  { %v4219_v22 = vpop.eup %4218 }
 0x4b6   :  { %v4221_v25 = vpop.eup %4220  ;;  %v1014_v26 = vsel %vm877_vm2, %v4219_v22, 0.0  ;;  %v1464_v45 = vpop.permute.xlu0 %1463 }
 0x4b7   :  { %v4223_v27 = vpop.eup %4222  ;;  %1015 = vadd.xlane.f32.xlu1 %v1014_v26  ;;  %v1156_v29 = vmul.f32 %v4221_v25, %v4215_v9 }
 0x4b8   :  { %v4225_v28 = vpop.eup %4224  ;;  %v1017_v30 = vsel %vm877_vm2, %v4223_v27, 0.0 }
 0x4b9   :  { %v1157_v3 = vmul.f32 %v4225_v28, %v4217_v11 }
 0x4ba   :  { %v1721_v53 = vpop.permute.xlu0 %1720 }
 0x4bb   :  { %1018 = vadd.xlane.f32.xlu1 %v1017_v30  ;;  %v1158_v31 = vpack.c.bf16 %v1157_v3, %v1156_v29 }
 0x4bd   :  { %3740 = vmatmul.mubr.msk.bf16.vlgmr.msra.gmra.mrb[12].mxu1 %vm877_vm2, %v1158_v31 }
 0x4be   :  { %3744 = vmatpush3.bf16.xpose.msra.mxu1 %v1215_v32  ;;  %3745 = vmatprep.mubr.msk.bf16.mxu1 %vm4295_vm0, %v4294_v44 }
 0x4bf   :  { %3749 = vmatprep.subr.bf16.mxu1 %v4294_v44 }
 0x4cc   :  { %1206 = vrot.lane.b32.xlu1 %v4737_v14, %s4296_s2 }
 0x4d0   :  { %1466 = vrot.lane.b32.xlu1 %v4771_v0, %s4296_s2  ;;  %v1605_v0 = vsel %vm827_vm1, %v4773_v1, 0 }
 0x4d4   :  { %1723 = vrot.lane.b32.xlu1 %v4773_v1, %s4296_s2 }
 0x544   :  { %v1016_v33 = vpop.xlane.xlu1 %1015 }
 0x545   :  { %4226 = vrcp.f32 %v1016_v33 }
 0x548   :  { %v1019_v34 = vpop.xlane.xlu1 %1018 }
 0x549   :  { %4228 = vrcp.f32 %v1019_v34 }
 0x54c   :  { %v1207_v35 = vpop.permute.xlu1 %1206 }
 0x54d   :  { %3746 = vmatmul.mubr.msk.bf16.vlgmr.msra.gmra.mrb[16].mxu1 %vm827_vm1, %v1207_v35 }
 0x54e   :  { %3751 = vmatprep.mubr.msk.bf16.mxu1 %vm4295_vm0, %v4294_v44 }
 0x54f   :  { %v4227_v36 = vpop.eup %4226 }
 0x550   :  { %v1022_v40 = vmul.f32 %v4227_v36, %v4219_v22  ;;  %v1467_v42 = vpop.permute.xlu1 %1466 }
 0x551   :  { %v1472_v43 = vsel %vm827_vm1, %v1467_v42, 0 }
 0x553   :  { %v4229_v39 = vpop.eup %4228 }
 0x554   :  { %v1023_v14 = vmul.f32 %v4229_v39, %v4223_v27  ;;  %v1724_v48 = vpop.permute.xlu1 %1723 }
 0x556   :  { %v1024_v41 = vpack.c.bf16 %v1023_v14, %v1022_v40 }
 0x558   :  { %3728 = vmatmul.mubr.msk.bf16.vlgmr.msra.gmra.mrb[28].mxu0 %vm877_vm2, %v1024_v41 }
 0x559   :  { %3756 = vmatpush3.bf16.xpose.msra.mxu0 %v1348_v12  ;;  %3757 = vmatprep.mubr.msk.bf16.mxu0 %vm4295_vm0, %v4294_v44 }
 0x55a   :  { %3767 = vmatprep.subr.bf16.mxu0 %v4294_v44 }
 0x560   :  { %3758 = vmatmul.mubr.msk.bf16.vlgmr.msra.gmra.mrb[32].mxu0 %vm827_vm1, %v4745_v23  ;;  %v1729_v23 = vsel %vm827_vm1, %v1724_v48, 0 }
 0x561   :  { %3768 = vmatpush3.bf16.xpose.msra.mxu0 %v1472_v43  ;;  %3769 = vmatprep.mubr.msk.bf16.mxu0 %vm4295_vm0, %v4294_v44 }
 0x562   :  { %3779 = vmatprep.subr.bf16.mxu0 %v4294_v44 }
 0x568   :  { %3770 = vmatmul.mubr.msk.bf16.vlgmr.msra.gmra.mrb[36].mxu0 %vm827_vm1, %v1464_v45 }
 0x569   :  { %3780 = vmatpush3.bf16.xpose.msra.mxu0 %v1605_v0  ;;  %3781 = vmatprep.mubr.msk.bf16.mxu0 %vm4295_vm0, %v4294_v44 }
 0x56a   :  { %3791 = vmatprep.subr.bf16.mxu0 %v4294_v44 }
 0x570   :  { %3782 = vmatmul.mubr.msk.bf16.vlgmr.msra.gmra.mrb[40].mxu0 %vm827_vm1, %v4749_v24 }
 0x571   :  { %3792 = vmatpush3.bf16.xpose.msra.mxu0 %v1729_v23  ;;  %3793 = vmatprep.mubr.msk.bf16.mxu0 %vm4295_vm0, %v4294_v44 }
 0x578   :  { %3794 = vmatmul.mubr.msk.bf16.vlgmr.msra.gmra.mrb[44].mxu0 %vm827_vm1, %v1721_v53 }
 0x590   :  { %v1196_v1 = vpop.f32.mrb[12].mxu1 }
 0x591   :  { %1203 = vst.msk [vmem:[#allocation2 + $0x8] sm:$0xff] %vm827_vm1, %v1196_v1  ;;  %v3741_v57 = vpop.f32.mrb[13].mxu1 }
 0x592   :  { %v1199_v58 = vpop.f32.mrb[14].mxu1 }
 0x593   :  { %1204 = vst.msk [vmem:[#allocation2 + $0x18] sm:$0xff] %vm827_vm1, %v1199_v58  ;;  %v3742_v59 = vpop.f32.mrb[15].mxu1 }
 0x620   :  { %v1251_v60 = vpop.f32.mrb[16].mxu1 }
 0x621   :  { %v1258_v61 = vmul.f32 0.125, %v1251_v60  ;;  %v3747_v62 = vpop.f32.mrb[17].mxu1 }
 0x622   :  { %v1254_v63 = vpop.f32.mrb[18].mxu1 }
 0x623   :  { %v1259_v24 = vmul.f32 0.125, %v1254_v63  ;;  %v3748_v2 = vpop.f32.mrb[19].mxu1  ;;  %v1260_v4 = vsel %vm877_vm2, %v1258_v61, -inf }
 0x624   :  { %1261 = vmax.xlane.f32.xlu1 %v1260_v4 }
 0x625   :  { %v1263_v5 = vsel %vm877_vm2, %v1259_v24, -inf }
 0x626   :  { %1264 = vmax.xlane.f32.xlu0 %v1263_v5 }
 0x62b   :  { %v4852_v7 = vpop.f32.mrb[28].mxu0 }
 0x62c   :  { %v3729_v8 = vpop.f32.mrb[29].mxu0 }
 0x62d   :  { %v4854_v9 = vpop.f32.mrb[30].mxu0 }
 0x62e   :  { %v3730_v10 = vpop.f32.mrb[31].mxu0 }
 0x633   :  { %v1384_v11 = vpop.f32.mrb[32].mxu0 }
 0x634   :  { %v1391_v13 = vmul.f32 0.125, %v1384_v11  ;;  %v3759_v15 = vpop.f32.mrb[33].mxu0 }
 0x635   :  { %v1387_v52 = vpop.f32.mrb[34].mxu0 }
 0x636   :  { %v1392_v54 = vmul.f32 0.125, %v1387_v52  ;;  %v3760_v16 = vpop.f32.mrb[35].mxu0  ;;  %v1393_v17 = vsel %vm877_vm2, %v1391_v13, -inf }
 0x637   :  { %1394 = vmax.xlane.f32.xlu0 %v1393_v17 }
 0x638   :  { %v1396_v18 = vsel %vm877_vm2, %v1392_v54, -inf }
 0x63b   :  { %1397 = vmax.xlane.f32.xlu0 %v1396_v18  ;;  %v1508_v19 = vpop.f32.mrb[36].mxu0 }
 0x63c   :  { %v1515_v20 = vmul.f32 0.125, %v1508_v19  ;;  %v3771_v21 = vpop.f32.mrb[37].mxu0 }
 0x63d   :  { %v1511_v6 = vpop.f32.mrb[38].mxu0 }
 0x63e   :  { %v1516_v37 = vmul.f32 0.125, %v1511_v6  ;;  %v3772_v22 = vpop.f32.mrb[39].mxu0  ;;  %v1517_v25 = vsel %vm877_vm2, %v1515_v20, -inf }
 0x63f   :  { %1518 = vmax.xlane.f32.xlu1 %v1517_v25 }
 0x640   :  { %v1520_v26 = vsel %vm877_vm2, %v1516_v37, -inf }
 0x641   :  { %1521 = vmax.xlane.f32.xlu0 %v1520_v26 }
 0x643   :  { %v1641_v27 = vpop.f32.mrb[40].mxu0 }
 0x644   :  { %v4860_v28 = vmul.f32 0.125, %v1641_v27  ;;  %v3783_v29 = vpop.f32.mrb[41].mxu0 }
 0x645   :  { %v1644_v3 = vpop.f32.mrb[42].mxu0 }
 0x646   :  { %v1649_v30 = vmul.f32 0.125, %v1644_v3  ;;  %v3784_v31 = vpop.f32.mrb[43].mxu0  ;;  %v1650_v32 = vsel %vm877_vm2, %v4860_v28, -inf }
 0x647   :  { %1651 = vmax.xlane.f32.xlu1 %v1650_v32 }
 0x648   :  { %v1653_v33 = vsel %vm877_vm2, %v1649_v30, -inf }
 0x649   :  { %1654 = vmax.xlane.f32.xlu0 %v1653_v33 }
 0x64b   :  { %v1765_v34 = vpop.f32.mrb[44].mxu0 }
 0x64c   :  { %v1772_v35 = vmul.f32 0.125, %v1765_v34  ;;  %v3795_v36 = vpop.f32.mrb[45].mxu0 }
 0x64d   :  { %v1768_v39 = vpop.f32.mrb[46].mxu0 }
 0x64e   :  { %v1773_v40 = vmul.f32 0.125, %v1768_v39  ;;  %v3796_v14 = vpop.f32.mrb[47].mxu0  ;;  %v1774_v41 = vsel %vm877_vm2, %v1772_v35, -inf }
 0x64f   :  { %1775 = vmax.xlane.f32.xlu1 %v1774_v41 }
 0x650   :  { %v1777_v12 = vsel %vm877_vm2, %v1773_v40, -inf }
 0x651   :  { %1778 = vmax.xlane.f32.xlu0 %v1777_v12 }
 0x6b1   :  { %v1262_v42 = vpop.xlane.xlu1 %1261 }
 0x6b2   :  { %v1266_v43 = vsub.f32 %v1258_v61, %v1262_v42 }
 0x6b3   :  { %v1265_v45 = vpop.xlane.xlu0 %1264 }
 0x6b4   :  { %v1268_v0 = vmul.f32 1.442695, %v1266_v43  ;;  %v1267_v48 = vsub.f32 %v1259_v24, %v1265_v45 }
 0x6b6   :  { %4230 = vpow2.f32 %v1268_v0  ;;  %v1270_v23 = vmul.f32 1.442695, %v1267_v48 }
 0x6b8   :  { %4232 = vpow2.f32 %v1270_v23 }
 0x6c0   :  { %v4867_v53 = vpop.eup %4230 }
 0x6c1   :  { %v1272_v1 = vsel %vm877_vm2, %v4867_v53, 0.0 }
 0x6c2   :  { %v4871_v57 = vpop.eup %4232  ;;  %1273 = vadd.xlane.f32.xlu1 %v1272_v1 }
 0x6c3   :  { %v1275_v58 = vsel %vm877_vm2, %v4871_v57, 0.0 }
 0x6c4   :  { %v1395_v59 = vpop.xlane.xlu0 %1394  ;;  %1276 = vadd.xlane.f32.xlu0 %v1275_v58 }
 0x6c5   :  { %v1399_v60 = vsub.f32 %v1391_v13, %v1395_v59 }
 0x6c7   :  { %v1401_v61 = vmul.f32 1.442695, %v1399_v60 }
 0x6c8   :  { %v1398_v62 = vpop.xlane.xlu0 %1397 }
 0x6c9   :  { %4234 = vpow2.f32 %v1401_v61  ;;  %v1400_v63 = vsub.f32 %v1392_v54, %v1398_v62 }
 0x6cb   :  { %v1403_v24 = vmul.f32 1.442695, %v1400_v63 }
 0x6cc   :  { %v1519_v2 = vpop.xlane.xlu1 %1518 }
 0x6cd   :  { %4236 = vpow2.f32 %v1403_v24  ;;  %v1523_v4 = vsub.f32 %v1515_v20, %v1519_v2 }
 0x6ce   :  { %v1522_v5 = vpop.xlane.xlu0 %1521 }
 0x6cf   :  { %v1525_v8 = vmul.f32 1.442695, %v1523_v4  ;;  %v1524_v10 = vsub.f32 %v1516_v37, %v1522_v5 }
 0x6d1   :  { %4238 = vpow2.f32 %v1525_v8  ;;  %v1527_v11 = vmul.f32 1.442695, %v1524_v10 }
 0x6d3   :  { %v4875_v15 = vpop.eup %4234  ;;  %4240 = vpow2.f32 %v1527_v11  ;;  %1284 = vrot.lane.b32.xlu1 %v4757_v38, %s4296_s2 }
 0x6d4   :  { %v1405_v13 = vsel %vm877_vm2, %v4875_v15, 0.0  ;;  %v1652_v17 = vpop.xlane.xlu1 %1651 }
 0x6d5   :  { %1406 = vadd.xlane.f32.xlu0 %v1405_v13  ;;  %v1656_v29 = vsub.f32 %v4860_v28, %v1652_v17 }
 0x6d6   :  { %v1655_v52 = vpop.xlane.xlu0 %1654 }
 0x6d7   :  { %v4881_v54 = vpop.eup %4236  ;;  %v1657_v16 = vsub.f32 %v1649_v30, %v1655_v52  ;;  %v1658_v31 = vmul.f32 1.442695, %v1656_v29  ;;  %v3980_v29 = vld [vmem:[%s5689_s3 + $0x44] ss:$8 sps:$4 sm:$0xff]  }
 0x6d8   :  { %v1408_v18 = vsel %vm877_vm2, %v4881_v54, 0.0 }
 0x6d9   :  { %v1660_v19 = vmul.f32 1.442695, %v1657_v16  ;;  %1409 = vadd.xlane.f32.xlu0 %v1408_v18 }
 0x6db   :  { %v4885_v20 = vpop.eup %4238  ;;  %4242 = vpow2.f32 %v1660_v19 }
 0x6dc   :  { %v1776_v21 = vpop.xlane.xlu1 %1775  ;;  %v1529_v38 = vsel %vm877_vm2, %v4885_v20, 0.0 }
 0x6dd   :  { %v4889_v6 = vpop.eup %4240  ;;  %v1780_v37 = vsub.f32 %v1772_v35, %v1776_v21  ;;  %1530 = vadd.xlane.f32.xlu0 %v1529_v38  ;;  %v3966_v38 = vld [vmem:[%s5689_s3] ss:$8 sps:$4 sm:$0xff]  }
 0x6de   :  { %v1779_v22 = vpop.xlane.xlu0 %1778  ;;  %v1532_v27 = vsel %vm877_vm2, %v4889_v6, 0.0 }
 0x6df   :  { %v1782_v25 = vmul.f32 1.442695, %v1780_v37  ;;  %v1781_v26 = vsub.f32 %v1773_v40, %v1779_v22  ;;  %v3971_v37 = vld [vmem:[%s5689_s3 + $0x14] ss:$8 sps:$4 sm:$0xff]   ;;  %v3974_v22 = vld [vmem:[%s5689_s3 + $0x24] ss:$8 sps:$4 sm:$0xff]  }
 0x6e1   :  { %4244 = vpow2.f32 %v1782_v25  ;;  %v1784_v3 = vmul.f32 1.442695, %v1781_v26  ;;  %1533 = vadd.xlane.f32.xlu0 %v1532_v27  ;;  %v3972_v25 = vld [vmem:[%s5689_s3 + $0x20] ss:$8 sps:$4 sm:$0xff]   ;;  %v3977_v26 = vld [vmem:[%s5689_s3 + $0x34] ss:$8 sps:$4 sm:$0xff]  }
 0x6e2   :  { %v3975_v27 = vld [vmem:[%s5689_s3 + $0x30] ss:$8 sps:$4 sm:$0xff]  }
 0x6e3   :  { %4246 = vpow2.f32 %v1784_v3  ;;  %v3978_v3 = vld [vmem:[%s5689_s3 + $0x40] ss:$8 sps:$4 sm:$0xff]  }
 0x6e4   :  { %4248 = vpow2.f32 %v1658_v31  ;;  %v3981_v31 = vld [vmem:[%s5689_s3 + $0x50] ss:$8 sps:$4 sm:$0xff]  }
 0x6e5   :  { %v4894_v30 = vpop.eup %4242 }
 0x6e6   :  { %v1665_v32 = vsel %vm877_vm2, %v4894_v30, 0.0 }
 0x6e7   :  { %1666 = vadd.xlane.f32.xlu0 %v1665_v32  ;;  %v3986_v32 = vld [vmem:[%s5689_s3 + $0x64] ss:$8 sps:$4 sm:$0xff]  }
 0x6eb   :  { %v4898_v33 = vpop.eup %4244 }
 0x6ec   :  { %v1786_v34 = vsel %vm877_vm2, %v4898_v33, 0.0 }
 0x6ed   :  { %v4902_v35 = vpop.eup %4246  ;;  %1787 = vadd.xlane.f32.xlu0 %v1786_v34  ;;  %v3989_v34 = vld [vmem:[%s5689_s3 + $0x74] ss:$8 sps:$4 sm:$0xff]  }
 0x6ee   :  { %v1789_v28 = vsel %vm877_vm2, %v4902_v35, 0.0  ;;  %v4249_v36 = vpop.eup %4248 }
 0x6ef   :  { %v1662_v39 = vsel %vm877_vm2, %v4249_v36, 0.0 }
 0x6f1   :  { %1790 = vadd.xlane.f32.xlu0 %v1789_v28  ;;  %v3992_v28 = vld [vmem:[%s5689_s3 + $0x84] ss:$8 sps:$4 sm:$0xff]  }
 0x6f7   :  { %1663 = vadd.xlane.f32.xlu1 %v1662_v39  ;;  %v3995_v39 = vld [vmem:[%s5689_s3 + $0x94] ss:$8 sps:$4 sm:$0xff]  }
 0x707   :  { %1541 = vrot.lane.b32.xlu0 %v4763_v55, %s4296_s2 }
 0x708   :  { %1798 = vrot.lane.b32.xlu1 %v4765_v56, %s4296_s2 }
 0x74f   :  { %v1274_v40 = vpop.xlane.xlu1 %1273 }
 0x750   :  { %4250 = vrcp.f32 %v1274_v40  ;;  %v3993_v40 = vld [vmem:[%s5689_s3 + $0x90] ss:$8 sps:$4 sm:$0xff]  }
 0x751   :  { %v1277_v14 = vpop.xlane.xlu0 %1276 }
 0x752   :  { %4252 = vrcp.f32 %v1277_v14  ;;  %v3998_v14 = vld [vmem:[%s5689_s3 + $0xa4] ss:$8 sps:$4 sm:$0xff]  }
 0x753   :  { %v1285_v41 = vpop.permute.xlu1 %1284 }
 0x754   :  { %3750 = vmatpush3.bf16.msra.mxu1 %v1285_v41  ;;  %v3996_v41 = vld [vmem:[%s5689_s3 + $0xa0] ss:$8 sps:$4 sm:$0xff]  }
 0x755   :  { %3761 = vmatprep.subr.bf16.mxu1 %v4294_v44 }
 0x75a   :  { %v4251_v12 = vpop.eup %4250 }
 0x75b   :  { %v1280_v43 = vmul.f32 %v4251_v12, %v4867_v53  ;;  %v3999_v12 = vld [vmem:[%s5689_s3 + $0xb0] ss:$8 sps:$4 sm:$0xff]  }
 0x75c   :  { %v4253_v42 = vpop.eup %4252 }
 0x75d   :  { %v1281_v45 = vmul.f32 %v4253_v42, %v4871_v57  ;;  %v4001_v42 = vld [vmem:[%s5689_s3 + $0xb4] ss:$8 sps:$4 sm:$0xff]  }
 0x75f   :  { %v1282_v0 = vpack.c.bf16 %v1281_v45, %v1280_v43  ;;  %v4002_v43 = vld [vmem:[%s5689_s3 + $0xc0] ss:$8 sps:$4 sm:$0xff]   ;;  %v4004_v45 = vld [vmem:[%s5689_s3 + $0xc4] ss:$8 sps:$4 sm:$0xff]  }
 0x761   :  { %3752 = vmatmul.mubr.msk.bf16.vlgmr.msra.gmra.mrb[20].mxu1 %vm877_vm2, %v1282_v0  ;;  %v4005_v0 = vld [vmem:[%s5689_s3 + $0xd0] ss:$8 sps:$4 sm:$0xff]  }
 0x762   :  { %3762 = vmatpush3.bf16.msra.mxu1 %v4763_v55  ;;  %v1407_v48 = vpop.xlane.xlu0 %1406  ;;  %3763 = vmatprep.mubr.msk.bf16.mxu1 %vm4295_vm0, %v4294_v44 }
 0x763   :  { %3773 = vmatprep.subr.bf16.mxu1 %v4294_v44  ;;  %4254 = vrcp.f32 %v1407_v48  ;;  %v4007_v48 = vld [vmem:[%s5689_s3 + $0xd4] ss:$8 sps:$4 sm:$0xff]  }
 0x766   :  { %v1410_v23 = vpop.xlane.xlu0 %1409 }
 0x767   :  { %4256 = vrcp.f32 %v1410_v23 }
 0x76a   :  { %v1531_v1 = vpop.xlane.xlu0 %1530 }
 0x76d   :  { %v4255_v58 = vpop.eup %4254 }
 0x76e   :  { %v1534_v59 = vpop.xlane.xlu0 %1533  ;;  %v1413_v57 = vmul.f32 %v4255_v58, %v4875_v15  ;;  %v4010_v58 = vld [vmem:[%s5689_s3 + $0xe4] ss:$8 sps:$4 sm:$0xff]  }
 0x76f   :  { %4258 = vrcp.f32 %v1534_v59 }
 0x770   :  { %4260 = vrcp.f32 %v1531_v1  ;;  %v4008_v1 = vld [vmem:[%s5689_s3 + $0xe0] ss:$8 sps:$4 sm:$0xff]  }
 0x771   :  { %v4257_v53 = vpop.eup %4256 }
 0x772   :  { %v1414_v60 = vmul.f32 %v4257_v53, %v4881_v54 }
 0x774   :  { %v1415_v61 = vpack.c.bf16 %v1414_v60, %v1413_v57  ;;  %v1667_v55 = vpop.xlane.xlu0 %1666  ;;  %v4013_v57 = vld [vmem:[%s5689_s3 + $0xf4] ss:$8 sps:$4 sm:$0xff]  }
 0x775   :  { %4262 = vrcp.f32 %v1667_v55 }
 0x776   :  { %3764 = vmatmul.mubr.msk.bf16.vlgmr.msra.gmra.mrb[24].mxu1 %vm877_vm2, %v1415_v61  ;;  %v4011_v61 = vld [vmem:[%s5689_s3 + $0xf0] ss:$8 sps:$4 sm:$0xff]  }
 0x777   :  { %3775 = vmatprep.mubr.msk.bf16.mxu1 %vm4295_vm0, %v4294_v44 }
 0x779   :  { %v4259_v63 = vpop.eup %4258 }
 0x77a   :  { %v1788_v62 = vpop.xlane.xlu0 %1787  ;;  %v4261_v2 = vpop.eup %4260  ;;  %v1538_v4 = vmul.f32 %v4259_v63, %v4889_v6  ;;  %v3968_v6 = vld [vmem:[%s5689_s3 + $0x4] ss:$8 sps:$4 sm:$0xff]  }
 0x77b   :  { %v1537_v5 = vmul.f32 %v4261_v2, %v4885_v20  ;;  %2071 = vmatprep.subr.bf16.mxu0 %v3968_v6 }
 0x77c   :  { %2072 = vmatpush1.bf16.msra.mxu0 %v3966_v38 }
 0x77d   :  { %v1539_v11 = vpack.c.bf16 %v1538_v4, %v1537_v5  ;;  %2073 = vmatprep.subr.bf16.mxu0 %v3971_v37 }
 0x77e   :  { %v1791_v24 = vpop.xlane.xlu0 %1790 }
 0x77f   :  { %v4263_v15 = vpop.eup %4262 }
 0x780   :  { %v1671_v52 = vmul.f32 %v4263_v15, %v4894_v30  ;;  %v3983_v30 = vld [vmem:[%s5689_s3 + $0x54] ss:$8 sps:$4 sm:$0xff]  }
 0x782   :  { %v1542_v8 = vpop.permute.xlu0 %1541 }
 0x783   :  { %3774 = vmatpush3.bf16.msra.mxu1 %v1542_v8 }
 0x784   :  { %v1664_v10 = vpop.xlane.xlu1 %1663  ;;  %3785 = vmatprep.subr.bf16.mxu1 %v4294_v44 }
 0x785   :  { %4264 = vrcp.f32 %v1664_v10 }
 0x786   :  { %3776 = vmatmul.mubr.msk.bf16.vlgmr.msra.gmra.mrb[28].mxu1 %vm877_vm2, %v1539_v11  ;;  %4266 = vrcp.f32 %v1791_v24 }
 0x787   :  { %3786 = vmatpush3.bf16.msra.mxu1 %v4765_v56  ;;  %3787 = vmatprep.mubr.msk.bf16.mxu1 %vm4295_vm0, %v4294_v44  ;;  %4268 = vrcp.f32 %v1788_v62 }
 0x788   :  { %3797 = vmatprep.subr.bf16.mxu1 %v4294_v44  ;;  %v1799_v18 = vpop.permute.xlu1 %1798 }
 0x78f   :  { %v4265_v13 = vpop.eup %4264 }
 0x790   :  { %v1670_v54 = vmul.f32 %v4265_v13, %v4249_v36  ;;  %v4267_v17 = vpop.eup %4266  ;;  %v3990_v36 = vld [vmem:[%s5689_s3 + $0x80] ss:$8 sps:$4 sm:$0xff]  }
 0x791   :  { %v4269_v19 = vpop.eup %4268  ;;  %v1795_v56 = vmul.f32 %v4267_v17, %v4902_v35  ;;  %v3987_v35 = vld [vmem:[%s5689_s3 + $0x70] ss:$8 sps:$4 sm:$0xff]  }
 0x792   :  { %v1672_v16 = vpack.c.bf16 %v1671_v52, %v1670_v54  ;;  %v1794_v20 = vmul.f32 %v4269_v19, %v4898_v33  ;;  %v3984_v33 = vld [vmem:[%s5689_s3 + $0x60] ss:$8 sps:$4 sm:$0xff]  }
 0x794   :  { %3788 = vmatmul.mubr.msk.bf16.vlgmr.msra.gmra.mrb[32].mxu1 %vm877_vm2, %v1672_v16  ;;  %v1796_v21 = vpack.c.bf16 %v1795_v56, %v1794_v20 }
 0x795   :  { %3798 = vmatpush3.bf16.msra.mxu1 %v1799_v18  ;;  %3799 = vmatprep.mubr.msk.bf16.mxu1 %vm4295_vm0, %v4294_v44  ;;  %v3969_v44 = vld [vmem:[%s5689_s3 + $0x10] ss:$8 sps:$4 sm:$0xff]  }
 0x796   :  { %2074 = vmatpush1.bf16.msra.mxu0 %v3969_v44 }
 0x797   :  { %2075 = vmatprep.subr.bf16.mxu0 %v3974_v22 }
 0x79a   :  { %2076 = vmatpush1.bf16.msra.mxu0 %v3972_v25 }
 0x79b   :  { %2077 = vmatprep.subr.bf16.mxu0 %v3977_v26 }
 0x79c   :  { %3800 = vmatmul.mubr.msk.bf16.vlgmr.msra.gmra.mrb[36].mxu1 %vm877_vm2, %v1796_v21 }
 0x79e   :  { %2078 = vmatpush1.bf16.msra.mxu0 %v3975_v27 }
 0x79f   :  { %2079 = vmatprep.subr.bf16.mxu0 %v3980_v29 }
 0x7a2   :  { %2080 = vmatpush1.bf16.msra.mxu0 %v3978_v3 }
 0x7a3   :  { %2081 = vmatprep.subr.bf16.mxu0 %v3983_v30 }
 0x7a6   :  { %2082 = vmatpush1.bf16.msra.mxu0 %v3981_v31 }
 0x7a7   :  { %2083 = vmatprep.subr.bf16.mxu0 %v3986_v32 }
 0x7aa   :  { %2084 = vmatpush1.bf16.msra.mxu0 %v3984_v33  ;;  %v1899_v33 = vld [vmem:[%s5690_s4] sm:$0x3] }
 0x7ab   :  { %2085 = vmatprep.subr.bf16.mxu0 %v3989_v34  ;;  %v1904_v34 = vrot.slane %v1899_v33, %v4708_v50 }
 0x7ae   :  { %2086 = vmatpush1.bf16.msra.mxu0 %v3987_v35  ;;  %v1908_v35 = vrot.slane %v1899_v33, %v4711_v51  ;;  %v4046_v33 = vld [vmem:[%s5691_s7 + $0xa4] ss:$16 sps:$4 sm:$0xff]  }
 0x7af   :  { %2087 = vmatprep.subr.bf16.mxu0 %v3992_v28 }
 0x7b2   :  { %2088 = vmatpush1.bf16.msra.mxu0 %v3990_v36 }
 0x7b3   :  { %2089 = vmatprep.subr.bf16.mxu0 %v3995_v39 }
 0x7b6   :  { %2090 = vmatpush1.bf16.msra.mxu0 %v3993_v40 }
 0x7b7   :  { %2091 = vmatprep.subr.bf16.mxu0 %v3998_v14 }
 0x7ba   :  { %2092 = vmatpush1.bf16.msra.mxu0 %v3996_v41  ;;  %v4286_v41 = vld [vmem:[%s5687_s0] sm:$0xff] }
 0x7bb   :  { %2093 = vmatprep.subr.bf16.mxu0 %v4001_v42 }
 0x7be   :  { %2094 = vmatpush1.bf16.msra.mxu0 %v3999_v12 }
 0x7bf   :  { %2095 = vmatprep.subr.bf16.mxu0 %v4004_v45  ;;  %v4287_v45 = vld [vmem:[%s5687_s0 + $0x8] sm:$0xff] }
 0x7c2   :  { %2096 = vmatpush1.bf16.msra.mxu0 %v4002_v43 }
 0x7c3   :  { %2097 = vmatprep.subr.bf16.mxu0 %v4007_v48 }
 0x7c6   :  { %2098 = vmatpush1.bf16.msra.mxu0 %v4005_v0 }
 0x7c7   :  { %2099 = vmatprep.subr.bf16.mxu0 %v4010_v58  ;;  %v4289_v58 = vld [vmem:[%s5687_s0 + $0x18] sm:$0xff] }
 0x7ca   :  { %2100 = vmatpush1.bf16.msra.mxu0 %v4008_v1 }
 0x7cb   :  { %2101 = vmatprep.subr.bf16.mxu0 %v4013_v57 }
 0x7ce   :  { %2102 = vmatpush1.bf16.msra.mxu0 %v4011_v61 }
 0x834   :  { %v1324_v23 = vpop.f32.mrb[20].mxu1 }
 0x835   :  { %1333 = vrot.lane.b32.xlu0 %v1324_v23, %s4296_s2  ;;  %v3753_v59 = vpop.f32.mrb[21].mxu1  ;;  %v4288_v23 = vld [vmem:[%s5687_s0 + $0x10] sm:$0xff] }
 0x836   :  { %v1327_v53 = vpop.f32.mrb[22].mxu1 }
 0x837   :  { %v3754_v60 = vpop.f32.mrb[23].mxu1 }
 0x839   :  { %1335 = vrot.lane.b32.xlu0 %v1327_v53, %s4296_s2 }
 0x83d   :  { %1075 = vrot.lane.b32.xlu0 %v4852_v7, %s4296_s2 }
 0x841   :  { %1077 = vrot.lane.b32.xlu0 %v4854_v9, %s4296_s2 }
 0x849   :  { %v1453_v55 = vpop.f32.mrb[24].mxu1 }
 0x84a   :  { %1460 = vst.msk [vmem:[#allocation2 + $0x20] sm:$0xff] %vm827_vm1, %v1453_v55  ;;  %v3765_v62 = vpop.f32.mrb[25].mxu1 }
 0x84b   :  { %v1456_v63 = vpop.f32.mrb[26].mxu1 }
 0x84c   :  { %1461 = vst.msk [vmem:[#allocation2 + $0x30] sm:$0xff] %vm827_vm1, %v1456_v63  ;;  %v3766_v24 = vpop.f32.mrb[27].mxu1 }
 0x84d   :  { %v4290_v24 = vld [vmem:[%s5687_s0 + $0x20] sm:$0xff] }
 0x859   :  { %v1581_v2 = vpop.f32.mrb[28].mxu1 }
 0x85a   :  { %v3777_v4 = vpop.f32.mrb[29].mxu1 }
 0x85b   :  { %v1584_v5 = vpop.f32.mrb[30].mxu1 }
 0x85c   :  { %v3778_v8 = vpop.f32.mrb[31].mxu1 }
 0x85d   :  { %v4291_v8 = vld [vmem:[%s5687_s0 + $0x28] sm:$0xff] }
 0x867   :  { %v1710_v10 = vpop.f32.mrb[32].mxu1 }
 0x868   :  { %1717 = vst.msk [vmem:[#allocation2 + $0x28] sm:$0xff] %vm827_vm1, %v1710_v10  ;;  %v3789_v11 = vpop.f32.mrb[33].mxu1 }
 0x869   :  { %v1713_v7 = vpop.f32.mrb[34].mxu1 }
 0x86a   :  { %1718 = vst.msk [vmem:[#allocation2 + $0x38] sm:$0xff] %vm827_vm1, %v1713_v7  ;;  %v3790_v9 = vpop.f32.mrb[35].mxu1  ;;  %v4292_v7 = vld [vmem:[%s5687_s0 + $0x30] sm:$0xff] }
 0x86f   :  { %v1838_v15 = vpop.f32.mrb[36].mxu1 }
 0x870   :  { %1847 = vrot.lane.b32.xlu0 %v1838_v15, %s4296_s2  ;;  %v3801_v13 = vpop.f32.mrb[37].mxu1  ;;  %v4293_v15 = vld [vmem:[%s5687_s0 + $0x38] sm:$0xff] }
 0x871   :  { %v1841_v52 = vpop.f32.mrb[38].mxu1 }
 0x872   :  { %1849 = vrot.lane.b32.xlu1 %v1841_v52, %s4296_s2  ;;  %v3802_v54 = vpop.f32.mrb[39].mxu1 }
 0x874   :  { %1590 = vrot.lane.b32.xlu0 %v1581_v2, %s4296_s2 }
 0x876   :  { %1592 = vrot.lane.b32.xlu1 %v1584_v5, %s4296_s2 }
 0x8a7   :  { %v1334_v16 = vpop.permute.xlu0 %1333 }
 0x8a8   :  { %1339 = vst.msk [vmem:[#allocation2 + $0x8] sm:$0xff] %vm1081_vm3, %v1334_v16  ;;  %v4014_v16 = vld [vmem:[%s5691_s7] ss:$16 sps:$4 sm:$0xff]  }
 0x8ab   :  { %v1336_v17 = vpop.permute.xlu0 %1335 }
 0x8ac   :  { %1340 = vst.msk [vmem:[#allocation2 + $0x18] sm:$0xff] %vm1081_vm3, %v1336_v17  ;;  %v4016_v17 = vld [vmem:[%s5691_s7 + $0x4] ss:$16 sps:$4 sm:$0xff]  }
 0x8ad   :  { %2647 = vmatprep.subr.bf16.mxu1 %v4016_v17  ;;  %v4074_v17 = vld [vmem:[%s5691_s7 + $0x140] ss:$16 sps:$4 sm:$0xff]  }
 0x8ae   :  { %2648 = vmatpush1.bf16.msra.mxu1 %v4014_v16 }
 0x8af   :  { %v1076_v18 = vpop.permute.xlu0 %1075  ;;  %v1856_v56 = vld [vmem:[#allocation2 + $0x8] sm:$0xff] }
 0x8b0   :  { %1082 = vst.msk [vmem:[#allocation2] sm:$0xff] %vm1081_vm3, %v1076_v18  ;;  %v4017_v18 = vld [vmem:[%s5691_s7 + $0x8] ss:$16 sps:$4 sm:$0xff]  }
 0x8b3   :  { %v1078_v19 = vpop.permute.xlu0 %1077  ;;  %v1858_v20 = vld [vmem:[#allocation2 + $0x18] sm:$0xff] }
 0x8b4   :  { %1083 = vst.msk [vmem:[#allocation2 + $0x10] sm:$0xff] %vm1081_vm3, %v1078_v19  ;;  %v1864_v21 = vpack.c.bf16 %v1858_v20, %v1856_v56  ;;  %v4019_v19 = vld [vmem:[%s5691_s7 + $0xc] ss:$16 sps:$4 sm:$0xff]   ;;  %v4020_v56 = vld [vmem:[%s5691_s7 + $0x20] ss:$16 sps:$4 sm:$0xff]  }
 0x8b5   :  { %v4022_v20 = vld [vmem:[%s5691_s7 + $0x24] ss:$16 sps:$4 sm:$0xff]   ;;  %2700 = vmatprep.subr.bf16.mxu0 %v4019_v19 }
 0x8b6   :  { %2103 = vmatprep.mubr.bf16.mxu0 %v1864_v21  ;;  %v4023_v21 = vld [vmem:[%s5691_s7 + $0x28] ss:$16 sps:$4 sm:$0xff]   ;;  %2649 = vmatprep.subr.bf16.mxu1 %v4022_v20  ;;  %v4082_v19 = vld [vmem:[%s5691_s7 + $0x164] ss:$16 sps:$4 sm:$0xff]   ;;  %v4080_v20 = vld [vmem:[%s5691_s7 + $0x160] ss:$16 sps:$4 sm:$0xff]  }
 0x8b7   :  { %v1855_v38 = vld [vmem:[#allocation2] sm:$0xff]  ;;  %2650 = vmatpush1.bf16.msra.mxu1 %v4020_v56  ;;  %v4085_v56 = vld [vmem:[%s5691_s7 + $0x16c] ss:$16 sps:$4 sm:$0xff]  }
 0x8bb   :  { %v1857_v6 = vld [vmem:[#allocation2 + $0x10] sm:$0xff] }
 0x8bc   :  { %v1863_v37 = vpack.c.bf16 %v1857_v6, %v1855_v38  ;;  %v4025_v38 = vld [vmem:[%s5691_s7 + $0x2c] ss:$16 sps:$4 sm:$0xff]   ;;  %v4028_v6 = vld [vmem:[%s5691_s7 + $0x44] ss:$16 sps:$4 sm:$0xff]  }
 0x8bd   :  { %2651 = vmatprep.subr.bf16.mxu1 %v4028_v6  ;;  %v4091_v6 = vld [vmem:[%s5691_s7 + $0x18c] ss:$16 sps:$4 sm:$0xff]  }
 0x8be   :  { %2104 = vmatmul.mubr.bf16.vlgmr.msra.gmra.mrb[48].mxu0 %v1863_v37  ;;  %v4026_v37 = vld [vmem:[%s5691_s7 + $0x40] ss:$16 sps:$4 sm:$0xff]  }
 0x8bf   :  { %2701 = vmatpush1.bf16.msra.mxu0 %v4017_v18  ;;  %2652 = vmatpush1.bf16.msra.mxu1 %v4026_v37  ;;  %v4077_v18 = vld [vmem:[%s5691_s7 + $0x148] ss:$16 sps:$4 sm:$0xff]   ;;  %v4086_v37 = vld [vmem:[%s5691_s7 + $0x180] ss:$16 sps:$4 sm:$0xff]  }
 0x8c0   :  { %2702 = vmatprep.subr.bf16.mxu0 %v4025_v38  ;;  %v4088_v38 = vld [vmem:[%s5691_s7 + $0x184] ss:$16 sps:$4 sm:$0xff]  }
 0x8c3   :  { %2703 = vmatpush1.bf16.msra.mxu0 %v4023_v21  ;;  %v4083_v21 = vld [vmem:[%s5691_s7 + $0x168] ss:$16 sps:$4 sm:$0xff]  }
 0x8e2   :  { %v1848_v44 = vpop.permute.xlu0 %1847 }
 0x8e3   :  { %1853 = vst.msk [vmem:[#allocation2 + $0x28] sm:$0xff] %vm1081_vm3, %v1848_v44  ;;  %v4031_v44 = vld [vmem:[%s5691_s7 + $0x4c] ss:$16 sps:$4 sm:$0xff]  }
 0x8e4   :  { %v1850_v22 = vpop.permute.xlu1 %1849  ;;  %2704 = vmatprep.subr.bf16.mxu0 %v4031_v44  ;;  %v4089_v44 = vld [vmem:[%s5691_s7 + $0x188] ss:$16 sps:$4 sm:$0xff]  }
 0x8e5   :  { %1854 = vst.msk [vmem:[#allocation2 + $0x38] sm:$0xff] %vm1081_vm3, %v1850_v22  ;;  %v4029_v22 = vld [vmem:[%s5691_s7 + $0x48] ss:$16 sps:$4 sm:$0xff]  }
 0x8e6   :  { %v1591_v25 = vpop.permute.xlu0 %1590  ;;  %2705 = vmatpush1.bf16.msra.mxu0 %v4029_v22  ;;  %v4094_v22 = vld [vmem:[%s5691_s7 + $0x1a4] ss:$16 sps:$4 sm:$0xff]  }
 0x8e7   :  { %1596 = vst.msk [vmem:[#allocation2 + $0x20] sm:$0xff] %vm1081_vm3, %v1591_v25  ;;  %v4034_v25 = vld [vmem:[%s5691_s7 + $0x64] ss:$16 sps:$4 sm:$0xff]  }
 0x8e8   :  { %v1593_v26 = vpop.permute.xlu1 %1592  ;;  %2653 = vmatprep.subr.bf16.mxu1 %v4034_v25  ;;  %v4097_v25 = vld [vmem:[%s5691_s7 + $0x1ac] ss:$16 sps:$4 sm:$0xff]  }
 0x8e9   :  { %1597 = vst.msk [vmem:[#allocation2 + $0x30] sm:$0xff] %vm1081_vm3, %v1593_v26  ;;  %v4037_v26 = vld [vmem:[%s5691_s7 + $0x6c] ss:$16 sps:$4 sm:$0xff]  }
 0x8ea   :  { %v1860_v27 = vld [vmem:[#allocation2 + $0x28] sm:$0xff]  ;;  %2706 = vmatprep.subr.bf16.mxu0 %v4037_v26  ;;  %v4092_v26 = vld [vmem:[%s5691_s7 + $0x1a0] ss:$16 sps:$4 sm:$0xff]  }
 0x8ec   :  { %v1862_v29 = vld [vmem:[#allocation2 + $0x38] sm:$0xff] }
 0x8ed   :  { %v1866_v3 = vpack.c.bf16 %v1862_v29, %v1860_v27  ;;  %v4032_v27 = vld [vmem:[%s5691_s7 + $0x60] ss:$16 sps:$4 sm:$0xff]   ;;  %v4035_v29 = vld [vmem:[%s5691_s7 + $0x68] ss:$16 sps:$4 sm:$0xff]  }
 0x8ee   :  { %v1859_v30 = vld [vmem:[#allocation2 + $0x20] sm:$0xff]  ;;  %2654 = vmatpush1.bf16.msra.mxu1 %v4032_v27  ;;  %2707 = vmatpush1.bf16.msra.mxu0 %v4035_v29  ;;  %v4095_v27 = vld [vmem:[%s5691_s7 + $0x1a8] ss:$16 sps:$4 sm:$0xff]  }
 0x8ef   :  { %2113 = vmatprep.mubr.bf16.mxu0 %v1866_v3  ;;  %v4040_v3 = vld [vmem:[%s5691_s7 + $0x84] ss:$16 sps:$4 sm:$0xff]   ;;  %v4098_v29 = vld [vmem:[%s5691_s7 + $0x1c0] ss:$16 sps:$4 sm:$0xff]  }
 0x8f0   :  { %v1861_v31 = vld [vmem:[#allocation2 + $0x30] sm:$0xff]  ;;  %2655 = vmatprep.subr.bf16.mxu1 %v4040_v3 }
 0x8f1   :  { %v1865_v32 = vpack.c.bf16 %v1861_v31, %v1859_v30  ;;  %v4043_v30 = vld [vmem:[%s5691_s7 + $0x8c] ss:$16 sps:$4 sm:$0xff]   ;;  %v4038_v31 = vld [vmem:[%s5691_s7 + $0x80] ss:$16 sps:$4 sm:$0xff]   ;;  %v4100_v3 = vld [vmem:[%s5691_s7 + $0x1c4] ss:$16 sps:$4 sm:$0xff]  }
 0x8f2   :  { %2708 = vmatprep.subr.bf16.mxu0 %v4043_v30  ;;  %2656 = vmatpush1.bf16.msra.mxu1 %v4038_v31  ;;  %v4101_v30 = vld [vmem:[%s5691_s7 + $0x1c8] ss:$16 sps:$4 sm:$0xff]   ;;  %v4103_v31 = vld [vmem:[%s5691_s7 + $0x1cc] ss:$16 sps:$4 sm:$0xff]  }
 0x8f3   :  { %2114 = vmatmul.mubr.bf16.gmra.mrb[52].mxu0 %v1865_v32  ;;  %v4041_v32 = vld [vmem:[%s5691_s7 + $0x88] ss:$16 sps:$4 sm:$0xff]   ;;  %2657 = vmatprep.subr.bf16.mxu1 %v4046_v33  ;;  %v4109_v33 = vld [vmem:[%s5691_s7 + $0x1ec] ss:$16 sps:$4 sm:$0xff]  }
 0x8f4   :  { %2709 = vmatpush1.bf16.msra.mxu0 %v4041_v32  ;;  %v4106_v32 = vld [vmem:[%s5691_s7 + $0x1e4] ss:$16 sps:$4 sm:$0xff]  }
 0x991   :  { %v2105_v28 = vpop.f32.mrb[48].mxu0 }
 0x992   :  { %v2106_v36 = vadd.f32 %v2105_v28, %v1904_v34  ;;  %v2107_v39 = vpop.f32.mrb[49].mxu0  ;;  %v4047_v28 = vld [vmem:[%s5691_s7 + $0xa8] ss:$16 sps:$4 sm:$0xff]  }
 0x993   :  { %v2108_v40 = vadd.f32 %v2107_v39, %v1908_v35  ;;  %v2109_v14 = vpop.f32.mrb[50].mxu0  ;;  %v4055_v39 = vld [vmem:[%s5691_s7 + $0xcc] ss:$16 sps:$4 sm:$0xff]  }
 0x994   :  { %v5065_v12 = vadd.f32 %v4286_v41, %v2106_v36  ;;  %v2110_v42 = vadd.f32 %v2109_v14, %v1904_v34  ;;  %v2111_v43 = vpop.f32.mrb[51].mxu0  ;;  %v4052_v36 = vld [vmem:[%s5691_s7 + $0xc4] ss:$16 sps:$4 sm:$0xff]   ;;  %v4053_v14 = vld [vmem:[%s5691_s7 + $0xc8] ss:$16 sps:$4 sm:$0xff]  }
 0x995   :  { %v5070_v0 = vadd.f32 %v4287_v45, %v2108_v40  ;;  %v2112_v48 = vadd.f32 %v2111_v43, %v1908_v35  ;;  %v4050_v40 = vld [vmem:[%s5691_s7 + $0xc0] ss:$16 sps:$4 sm:$0xff]   ;;  %v4058_v41 = vld [vmem:[%s5691_s7 + $0xe4] ss:$16 sps:$4 sm:$0xff]   ;;  %v4061_v43 = vld [vmem:[%s5691_s7 + $0xec] ss:$16 sps:$4 sm:$0xff]  }
 0x996   :  { %v5075_v1 = vadd.f32 %v4288_v23, %v2110_v42  ;;  %v4056_v42 = vld [vmem:[%s5691_s7 + $0xe0] ss:$16 sps:$4 sm:$0xff]   ;;  %v4059_v45 = vld [vmem:[%s5691_s7 + $0xe8] ss:$16 sps:$4 sm:$0xff]   ;;  %v4067_v23 = vld [vmem:[%s5691_s7 + $0x10c] ss:$16 sps:$4 sm:$0xff]  }
 0x997   :  { %v5080_v59 = vadd.f32 %v4289_v58, %v2112_v48  ;;  %v2134_v53 = vadd.f32 %v5070_v0, %v5065_v12  ;;  %v4064_v48 = vld [vmem:[%s5691_s7 + $0x104] ss:$16 sps:$4 sm:$0xff]   ;;  %v4062_v58 = vld [vmem:[%s5691_s7 + $0x100] ss:$16 sps:$4 sm:$0xff]  }
 0x999   :  { %2135 = vadd.xlane.f32.xlu0 %v2134_v53  ;;  %v2137_v57 = vadd.f32 %v5080_v59, %v5075_v1  ;;  %v4065_v53 = vld [vmem:[%s5691_s7 + $0x108] ss:$16 sps:$4 sm:$0xff]  }
 0x99b   :  { %2138 = vadd.xlane.f32.xlu1 %v2137_v57  ;;  %v4070_v57 = vld [vmem:[%s5691_s7 + $0x124] ss:$16 sps:$4 sm:$0xff]  }
 0x9c6   :  { %v2115_v60 = vpop.f32.mrb[52].mxu0 }
 0x9c7   :  { %v2116_v61 = vadd.f32 %v2115_v60, %v1904_v34  ;;  %v2117_v55 = vpop.f32.mrb[53].mxu0  ;;  %v4073_v60 = vld [vmem:[%s5691_s7 + $0x12c] ss:$16 sps:$4 sm:$0xff]  }
 0x9c8   :  { %v2118_v62 = vadd.f32 %v2117_v55, %v1908_v35  ;;  %v2119_v63 = vpop.f32.mrb[54].mxu0  ;;  %v4071_v55 = vld [vmem:[%s5691_s7 + $0x128] ss:$16 sps:$4 sm:$0xff]  }
 0x9c9   :  { %v5089_v2 = vadd.f32 %v4290_v24, %v2116_v61  ;;  %v2120_v4 = vadd.f32 %v2119_v63, %v1904_v34  ;;  %v2121_v5 = vpop.f32.mrb[55].mxu0  ;;  %v4049_v34 = vld [vmem:[%s5691_s7 + $0xac] ss:$16 sps:$4 sm:$0xff]   ;;  %v4068_v61 = vld [vmem:[%s5691_s7 + $0x120] ss:$16 sps:$4 sm:$0xff]  }
 0x9ca   :  { %v5094_v10 = vadd.f32 %v4291_v8, %v2118_v62  ;;  %v2122_v11 = vadd.f32 %v2121_v5, %v1908_v35  ;;  %v4044_v35 = vld [vmem:[%s5691_s7 + $0xa0] ss:$16 sps:$4 sm:$0xff]   ;;  %2710 = vmatprep.subr.bf16.mxu0 %v4049_v34 }
 0x9cb   :  { %v5099_v9 = vadd.f32 %v4292_v7, %v2120_v4  ;;  %2658 = vmatpush1.bf16.msra.mxu1 %v4044_v35  ;;  %2711 = vmatpush1.bf16.msra.mxu0 %v4047_v28  ;;  %v4104_v34 = vld [vmem:[%s5691_s7 + $0x1e0] ss:$16 sps:$4 sm:$0xff]   ;;  %v4107_v35 = vld [vmem:[%s5691_s7 + $0x1e8] ss:$16 sps:$4 sm:$0xff]  }
 0x9cc   :  { %v5104_v13 = vadd.f32 %v4293_v15, %v2122_v11  ;;  %v2140_v52 = vadd.f32 %v5094_v10, %v5089_v2  ;;  %2659 = vmatprep.subr.bf16.mxu1 %v4052_v36  ;;  %2712 = vmatprep.subr.bf16.mxu0 %v4055_v39 }
 0x9ce   :  { %2141 = vadd.xlane.f32.xlu0 %v2140_v52  ;;  %v2143_v54 = vadd.f32 %v5104_v13, %v5099_v9 }
 0x9cf   :  { %2660 = vmatpush1.bf16.msra.mxu1 %v4050_v40  ;;  %2713 = vmatpush1.bf16.msra.mxu0 %v4053_v14 }
 0x9d0   :  { %2661 = vmatprep.subr.bf16.mxu1 %v4058_v41  ;;  %2714 = vmatprep.subr.bf16.mxu0 %v4061_v43 }
 0x9d2   :  { %2144 = vadd.xlane.f32.xlu0 %v2143_v54 }
 0x9d3   :  { %2662 = vmatpush1.bf16.msra.mxu1 %v4056_v42  ;;  %2715 = vmatpush1.bf16.msra.mxu0 %v4059_v45 }
 0x9d4   :  { %2663 = vmatprep.subr.bf16.mxu1 %v4064_v48  ;;  %2716 = vmatprep.subr.bf16.mxu0 %v4067_v23 }
 0x9d7   :  { %2664 = vmatpush1.bf16.msra.mxu1 %v4062_v58  ;;  %2717 = vmatpush1.bf16.msra.mxu0 %v4065_v53  ;;  %v4112_v53 = vld [vmem:[%s5692_s9 + $0x4] ss:$8 sps:$4 sm:$0xff]  }
 0x9d8   :  { %2665 = vmatprep.subr.bf16.mxu1 %v4070_v57  ;;  %2718 = vmatprep.subr.bf16.mxu0 %v4073_v60 }
 0x9db   :  { %2666 = vmatpush1.bf16.msra.mxu1 %v4068_v61  ;;  %2719 = vmatpush1.bf16.msra.mxu0 %v4071_v55 }
 0xa26   :  { %v2136_v62 = vpop.xlane.xlu0 %2135 }
 0xa27   :  { %v2147_v63 = vmul.f32 0.00390625, %v2136_v62  ;;  %v2132_v62 = vld [vmem:[%s5693_s5] sm:$0x3] }
 0xa28   :  { %v2139_v24 = vpop.xlane.xlu1 %2138 }
 0xa29   :  { %v5231_v4 = vsub.f32 %v5065_v12, %v2147_v63  ;;  %v5234_v5 = vsub.f32 %v5070_v0, %v2147_v63  ;;  %v2148_v8 = vmul.f32 0.00390625, %v2139_v24  ;;  %v2133_v63 = vld [vmem:[%s5694_s6] sm:$0x3]  ;;  %v5352_v24 = vrot.slane %v2132_v62, %v4708_v50 }
 0xa2b   :  { %v5237_v11 = vsub.f32 %v5075_v1, %v2148_v8  ;;  %v5240_v7 = vsub.f32 %v5080_v59, %v2148_v8  ;;  %v2159_v15 = vmul.f32 %v5231_v4, %v5231_v4  ;;  %v2160_v52 = vmul.f32 %v5234_v5, %v5234_v5  ;;  %v4076_v1 = vld [vmem:[%s5691_s7 + $0x144] ss:$16 sps:$4 sm:$0xff]   ;;  %v4079_v59 = vld [vmem:[%s5691_s7 + $0x14c] ss:$16 sps:$4 sm:$0xff]  }
 0xa2c   :  { %2667 = vmatprep.subr.bf16.mxu1 %v4076_v1  ;;  %2720 = vmatprep.subr.bf16.mxu0 %v4079_v59  ;;  %v5355_v8 = vrot.slane %v2132_v62, %v4711_v51 }
 0xa2d   :  { %v2167_v54 = vadd.f32 %v2160_v52, %v2159_v15  ;;  %v2161_v12 = vmul.f32 %v5237_v11, %v5237_v11  ;;  %v2162_v0 = vmul.f32 %v5240_v7, %v5240_v7  ;;  %2668 = vmatpush1.bf16.msra.mxu1 %v4074_v17  ;;  %2721 = vmatpush1.bf16.msra.mxu0 %v4077_v18 }
 0xa2e   :  { %2669 = vmatprep.subr.bf16.mxu1 %v4082_v19  ;;  %2722 = vmatprep.subr.bf16.mxu0 %v4085_v56 }
 0xa2f   :  { %2168 = vadd.xlane.f32.xlu1 %v2167_v54  ;;  %v2170_v16 = vadd.f32 %v2162_v0, %v2161_v12  ;;  %v5360_v0 = vrot.slane %v2133_v63, %v4708_v50 }
 0xa31   :  { %2171 = vadd.xlane.f32.xlu0 %v2170_v16  ;;  %2670 = vmatpush1.bf16.msra.mxu1 %v4080_v20  ;;  %v5363_v16 = vrot.slane %v2133_v63, %v4711_v51  ;;  %v4146_v63 = vld [vmem:[%s5692_s9 + $0xc0] ss:$8 sps:$4 sm:$0xff]  }
 0xa32   :  { %2723 = vmatpush1.bf16.msra.mxu0 %v4083_v21  ;;  %2671 = vmatprep.subr.bf16.mxu1 %v4088_v38  ;;  %v4110_v38 = vld [vmem:[%s5692_s9] ss:$8 sps:$4 sm:$0xff]  }
 0xa33   :  { %2724 = vmatprep.subr.bf16.mxu0 %v4091_v6  ;;  %v4115_v6 = vld [vmem:[%s5692_s9 + $0x14] ss:$8 sps:$4 sm:$0xff]  }
 0xa35   :  { %2672 = vmatpush1.bf16.msra.mxu1 %v4086_v37  ;;  %v4113_v37 = vld [vmem:[%s5692_s9 + $0x10] ss:$8 sps:$4 sm:$0xff]  }
 0xa36   :  { %2725 = vmatpush1.bf16.msra.mxu0 %v4089_v44  ;;  %2673 = vmatprep.subr.bf16.mxu1 %v4094_v22  ;;  %v4118_v44 = vld [vmem:[%s5692_s9 + $0x24] ss:$8 sps:$4 sm:$0xff]   ;;  %v4116_v22 = vld [vmem:[%s5692_s9 + $0x20] ss:$8 sps:$4 sm:$0xff]  }
 0xa37   :  { %2726 = vmatprep.subr.bf16.mxu0 %v4097_v25  ;;  %v4121_v25 = vld [vmem:[%s5692_s9 + $0x34] ss:$8 sps:$4 sm:$0xff]  }
 0xa39   :  { %2674 = vmatpush1.bf16.msra.mxu1 %v4092_v26  ;;  %v4119_v26 = vld [vmem:[%s5692_s9 + $0x30] ss:$8 sps:$4 sm:$0xff]  }
 0xa3a   :  { %2727 = vmatpush1.bf16.msra.mxu0 %v4095_v27  ;;  %2675 = vmatprep.subr.bf16.mxu1 %v4100_v3  ;;  %v4124_v27 = vld [vmem:[%s5692_s9 + $0x44] ss:$8 sps:$4 sm:$0xff]   ;;  %v4127_v3 = vld [vmem:[%s5692_s9 + $0x54] ss:$8 sps:$4 sm:$0xff]  }
 0xa3b   :  { %2728 = vmatprep.subr.bf16.mxu0 %v4103_v31  ;;  %v4130_v31 = vld [vmem:[%s5692_s9 + $0x64] ss:$8 sps:$4 sm:$0xff]  }
 0xa3d   :  { %2676 = vmatpush1.bf16.msra.mxu1 %v4098_v29  ;;  %v4122_v29 = vld [vmem:[%s5692_s9 + $0x40] ss:$8 sps:$4 sm:$0xff]  }
 0xa3e   :  { %2729 = vmatpush1.bf16.msra.mxu0 %v4101_v30  ;;  %2677 = vmatprep.subr.bf16.mxu1 %v4106_v32  ;;  %v4125_v30 = vld [vmem:[%s5692_s9 + $0x50] ss:$8 sps:$4 sm:$0xff]   ;;  %v4128_v32 = vld [vmem:[%s5692_s9 + $0x60] ss:$8 sps:$4 sm:$0xff]  }
 0xa3f   :  { %2730 = vmatprep.subr.bf16.mxu0 %v4109_v33  ;;  %v4133_v33 = vld [vmem:[%s5692_s9 + $0x74] ss:$8 sps:$4 sm:$0xff]  }
 0xa41   :  { %2678 = vmatpush1.bf16.msra.mxu1 %v4104_v34  ;;  %v4131_v34 = vld [vmem:[%s5692_s9 + $0x70] ss:$8 sps:$4 sm:$0xff]  }
 0xa42   :  { %2731 = vmatpush1.bf16.msra.mxu0 %v4107_v35  ;;  %3173 = vmatprep.subr.bf16.mxu1 %v4112_v53  ;;  %v4140_v53 = vld [vmem:[%s5692_s9 + $0xa0] ss:$8 sps:$4 sm:$0xff]  }
 0xa5b   :  { %v2142_v28 = vpop.xlane.xlu0 %2141 }
 0xa5c   :  { %v2149_v36 = vmul.f32 0.00390625, %v2142_v28  ;;  %v4136_v28 = vld [vmem:[%s5692_s9 + $0x84] ss:$8 sps:$4 sm:$0xff]  }
 0xa5e   :  { %v5323_v39 = vsub.f32 %v5089_v2, %v2149_v36  ;;  %v5326_v40 = vsub.f32 %v5094_v10, %v2149_v36 }
 0xa5f   :  { %v2145_v14 = vpop.xlane.xlu0 %2144 }
 0xa60   :  { %v2150_v41 = vmul.f32 0.00390625, %v2145_v14  ;;  %v2163_v42 = vmul.f32 %v5323_v39, %v5323_v39  ;;  %v2164_v43 = vmul.f32 %v5326_v40, %v5326_v40 }
 0xa62   :  { %v5333_v45 = vsub.f32 %v5099_v9, %v2150_v41  ;;  %v5336_v48 = vsub.f32 %v5104_v13, %v2150_v41  ;;  %v2173_v23 = vadd.f32 %v2164_v43, %v2163_v42  ;;  %v4134_v41 = vld [vmem:[%s5692_s9 + $0x80] ss:$8 sps:$4 sm:$0xff]   ;;  %v4139_v43 = vld [vmem:[%s5692_s9 + $0x94] ss:$8 sps:$4 sm:$0xff]  }
 0xa64   :  { %2174 = vadd.xlane.f32.xlu1 %v2173_v23  ;;  %v2165_v2 = vmul.f32 %v5333_v45, %v5333_v45  ;;  %v2166_v10 = vmul.f32 %v5336_v48, %v5336_v48 }
 0xa66   :  { %v2176_v58 = vadd.f32 %v2166_v10, %v2165_v2  ;;  %v4137_v10 = vld [vmem:[%s5692_s9 + $0x90] ss:$8 sps:$4 sm:$0xff]  }
 0xa68   :  { %2177 = vadd.xlane.f32.xlu0 %v2176_v58  ;;  %v4142_v58 = vld [vmem:[%s5692_s9 + $0xa4] ss:$8 sps:$4 sm:$0xff]  }
 0xabc   :  { %v2169_v9 = vpop.xlane.xlu1 %2168 }
 0xabd   :  { %v2179_v57 = vmul.f32 0.00390625, %v2169_v9  ;;  %v4145_v9 = vld [vmem:[%s5692_s9 + $0xb4] ss:$8 sps:$4 sm:$0xff]  }
 0xabe   :  { %v2172_v60 = vpop.xlane.xlu0 %2171 }
 0xabf   :  { %v2183_v13 = vadd.f32 1e-05, %v2179_v57  ;;  %v2180_v61 = vmul.f32 0.00390625, %v2172_v60  ;;  %v4143_v60 = vld [vmem:[%s5692_s9 + $0xb0] ss:$8 sps:$4 sm:$0xff]  }
 0xac1   :  { %4270 = vrsqrt.f32 %v2183_v13  ;;  %v2184_v55 = vadd.f32 1e-05, %v2180_v61 }
 0xac3   :  { %4272 = vrsqrt.f32 %v2184_v55  ;;  %v4148_v55 = vld [vmem:[%s5692_s9 + $0xc4] ss:$8 sps:$4 sm:$0xff]  }
 0xacb   :  { %v4271_v15 = vpop.eup %4270 }
 0xacc   :  { %v2191_v52 = vmul.f32 %v4271_v15, %v5231_v4  ;;  %v2192_v54 = vmul.f32 %v4271_v15, %v5234_v5 }
 0xacd   :  { %v4273_v12 = vpop.eup %4272 }
 0xace   :  { %v2193_v1 = vmul.f32 %v4273_v12, %v5237_v11  ;;  %v2194_v59 = vmul.f32 %v4273_v12, %v5240_v7  ;;  %v2211_v17 = vmul.f32 %v5355_v8, %v2192_v54  ;;  %v2210_v18 = vmul.f32 %v5352_v24, %v2191_v52 }
 0xad0   :  { %v2213_v19 = vmul.f32 %v5355_v8, %v2194_v59  ;;  %v2212_v4 = vmul.f32 %v5352_v24, %v2193_v1  ;;  %v5372_v5 = vadd.f32 %v5363_v16, %v2211_v17  ;;  %v5378_v20 = vadd.f32 %v5360_v0, %v2210_v18 }
 0xad2   :  { %v5375_v56 = vadd.f32 %v5363_v16, %v2213_v19  ;;  %v5381_v11 = vadd.f32 %v5360_v0, %v2212_v4  ;;  %v4157_v19 = vld [vmem:[%s5692_s9 + $0xf4] ss:$8 sps:$4 sm:$0xff]   ;;  %v4155_v4 = vld [vmem:[%s5692_s9 + $0xf0] ss:$8 sps:$4 sm:$0xff]  }
 0xad4   :  { %v2238_v7 = vpack.c.bf16 %v5375_v56, %v5372_v5  ;;  %v2237_v21 = vpack.c.bf16 %v5381_v11, %v5378_v20 }
 0xad6   :  { %2679 = vmatprep.mubr.bf16.mxu1 %v2238_v7  ;;  %2732 = vmatprep.mubr.bf16.mxu0 %v2238_v7  ;;  %v4160_v7 = vld [vmem:[%s5692_s9 + $0x104] ss:$8 sps:$4 sm:$0xff]  }
 0xad7   :  { %2680 = vmatmul.mubr.bf16.vlgmr.msra.gmra.mrb[40].mxu1 %v2237_v21  ;;  %2733 = vmatmul.mubr.bf16.vlgmr.msra.gmra.mrb[56].mxu0 %v2237_v21  ;;  %v2305_v21 = vld [vmem:[%s5695_s8] sm:$0xf] }
 0xad8   :  { %3174 = vmatpush1.bf16.msra.mxu1 %v4110_v38  ;;  %v5511_v38 = vrot.slane %v2305_v21, %v4708_v50 }
 0xad9   :  { %3175 = vmatprep.subr.bf16.mxu1 %v4115_v6  ;;  %v5515_v6 = vrot.slane %v2305_v21, %v165_v47 }
 0xadc   :  { %3176 = vmatpush1.bf16.msra.mxu1 %v4113_v37  ;;  %v5518_v37 = vrot.slane %v2305_v21, %v4711_v51 }
 0xadd   :  { %3177 = vmatprep.subr.bf16.mxu1 %v4118_v44  ;;  %v5522_v44 = vrot.slane %v2305_v21, %v169_v49  ;;  %v4193_v21 = vld [vmem:[%s5692_s9 + $0x1b4] ss:$8 sps:$4 sm:$0xff]  }
 0xae0   :  { %3178 = vmatpush1.bf16.msra.mxu1 %v4116_v22 }
 0xae1   :  { %3179 = vmatprep.subr.bf16.mxu1 %v4121_v25 }
 0xae4   :  { %3180 = vmatpush1.bf16.msra.mxu1 %v4119_v26 }
 0xae5   :  { %3181 = vmatprep.subr.bf16.mxu1 %v4124_v27 }
 0xae8   :  { %3182 = vmatpush1.bf16.msra.mxu1 %v4122_v29 }
 0xae9   :  { %3183 = vmatprep.subr.bf16.mxu1 %v4127_v3 }
 0xaec   :  { %3184 = vmatpush1.bf16.msra.mxu1 %v4125_v30 }
 0xaed   :  { %3185 = vmatprep.subr.bf16.mxu1 %v4130_v31 }
 0xaf0   :  { %3186 = vmatpush1.bf16.msra.mxu1 %v4128_v32 }
 0xaf1   :  { %v2175_v35 = vpop.xlane.xlu1 %2174  ;;  %3187 = vmatprep.subr.bf16.mxu1 %v4133_v33 }
 0xaf2   :  { %v2181_v36 = vmul.f32 0.00390625, %v2175_v35 }
 0xaf4   :  { %v2185_v14 = vadd.f32 1e-05, %v2181_v36  ;;  %3188 = vmatpush1.bf16.msra.mxu1 %v4131_v34 }
 0xaf5   :  { %v2178_v42 = vpop.xlane.xlu0 %2177  ;;  %3189 = vmatprep.subr.bf16.mxu1 %v4136_v28 }
 0xaf6   :  { %4274 = vrsqrt.f32 %v2185_v14  ;;  %v2182_v23 = vmul.f32 0.00390625, %v2178_v42 }
 0xaf8   :  { %v2186_v2 = vadd.f32 1e-05, %v2182_v23  ;;  %3190 = vmatpush1.bf16.msra.mxu1 %v4134_v41 }
 0xaf9   :  { %3191 = vmatprep.subr.bf16.mxu1 %v4139_v43 }
 0xafa   :  { %4276 = vrsqrt.f32 %v2186_v2 }
 0xafc   :  { %3192 = vmatpush1.bf16.msra.mxu1 %v4137_v10 }
 0xafd   :  { %3193 = vmatprep.subr.bf16.mxu1 %v4142_v58 }
 0xb00   :  { %v4275_v57 = vpop.eup %4274  ;;  %3194 = vmatpush1.bf16.msra.mxu1 %v4140_v53 }
 0xb01   :  { %v2196_v13 = vmul.f32 %v4275_v57, %v5326_v40  ;;  %v2195_v61 = vmul.f32 %v4275_v57, %v5323_v39  ;;  %3195 = vmatprep.subr.bf16.mxu1 %v4145_v9  ;;  %v4151_v39 = vld [vmem:[%s5692_s9 + $0xd4] ss:$8 sps:$4 sm:$0xff]  }
 0xb03   :  { %v2215_v52 = vmul.f32 %v5355_v8, %v2196_v13  ;;  %v2214_v40 = vmul.f32 %v5352_v24, %v2195_v61  ;;  %v4163_v13 = vld [vmem:[%s5692_s9 + $0x114] ss:$8 sps:$4 sm:$0xff]   ;;  %v4161_v61 = vld [vmem:[%s5692_s9 + $0x110] ss:$8 sps:$4 sm:$0xff]  }
 0xb04   :  { %v4277_v62 = vpop.eup %4276  ;;  %3196 = vmatpush1.bf16.msra.mxu1 %v4143_v60  ;;  %v4158_v60 = vld [vmem:[%s5692_s9 + $0x100] ss:$8 sps:$4 sm:$0xff]  }
 0xb05   :  { %v2198_v15 = vmul.f32 %v4277_v62, %v5336_v48  ;;  %v2197_v54 = vmul.f32 %v4277_v62, %v5333_v45  ;;  %3197 = vmatprep.subr.bf16.mxu1 %v4148_v55  ;;  %v4149_v48 = vld [vmem:[%s5692_s9 + $0xd0] ss:$8 sps:$4 sm:$0xff]   ;;  %v5477_v59 = vadd.f32 %v5363_v16, %v2215_v52  ;;  %v5483_v17 = vadd.f32 %v5360_v0, %v2214_v40  ;;  %v4166_v55 = vld [vmem:[%s5692_s9 + $0x124] ss:$8 sps:$4 sm:$0xff]   ;;  %v4164_v62 = vld [vmem:[%s5692_s9 + $0x120] ss:$8 sps:$4 sm:$0xff]  }
 0xb06   :  { %v4172_v52 = vld [vmem:[%s5692_s9 + $0x144] ss:$8 sps:$4 sm:$0xff]   ;;  %v4175_v40 = vld [vmem:[%s5692_s9 + $0x154] ss:$8 sps:$4 sm:$0xff]  }
 0xb07   :  { %v2217_v12 = vmul.f32 %v5355_v8, %v2198_v15  ;;  %v2216_v1 = vmul.f32 %v5352_v24, %v2197_v54  ;;  %v4167_v15 = vld [vmem:[%s5692_s9 + $0x130] ss:$8 sps:$4 sm:$0xff]   ;;  %v4170_v54 = vld [vmem:[%s5692_s9 + $0x140] ss:$8 sps:$4 sm:$0xff]  }
 0xb08   :  { %3198 = vmatpush1.bf16.msra.mxu1 %v4146_v63  ;;  %v4169_v63 = vld [vmem:[%s5692_s9 + $0x134] ss:$8 sps:$4 sm:$0xff]  }
 0xb09   :  { %v5480_v45 = vadd.f32 %v5363_v16, %v2217_v12  ;;  %v5486_v18 = vadd.f32 %v5360_v0, %v2216_v1  ;;  %3199 = vmatprep.subr.bf16.mxu1 %v4151_v39  ;;  %v4154_v16 = vld [vmem:[%s5692_s9 + $0xe4] ss:$8 sps:$4 sm:$0xff]   ;;  %v4152_v0 = vld [vmem:[%s5692_s9 + $0xe0] ss:$8 sps:$4 sm:$0xff]   ;;  %v4173_v39 = vld [vmem:[%s5692_s9 + $0x150] ss:$8 sps:$4 sm:$0xff]  }
 0xb0a   :  { %v4178_v12 = vld [vmem:[%s5692_s9 + $0x164] ss:$8 sps:$4 sm:$0xff]   ;;  %v4176_v1 = vld [vmem:[%s5692_s9 + $0x160] ss:$8 sps:$4 sm:$0xff]  }
 0xb0b   :  { %v2240_v24 = vpack.c.bf16 %v5480_v45, %v5477_v59  ;;  %v2239_v8 = vpack.c.bf16 %v5486_v18, %v5483_v17 }
 0xb0c   :  { %3200 = vmatpush1.bf16.msra.mxu1 %v4149_v48  ;;  %v4181_v48 = vld [vmem:[%s5692_s9 + $0x174] ss:$8 sps:$4 sm:$0xff]  }
 0xb0d   :  { %2689 = vmatprep.mubr.bf16.mxu1 %v2240_v24  ;;  %2742 = vmatprep.mubr.bf16.mxu0 %v2240_v24  ;;  %v4179_v24 = vld [vmem:[%s5692_s9 + $0x170] ss:$8 sps:$4 sm:$0xff]  }
 0xb0e   :  { %2690 = vmatmul.mubr.bf16.gmra.mrb[44].mxu1 %v2239_v8  ;;  %2743 = vmatmul.mubr.bf16.gmra.mrb[60].mxu0 %v2239_v8  ;;  %v4184_v8 = vld [vmem:[%s5692_s9 + $0x184] ss:$8 sps:$4 sm:$0xff]  }
 0xb0f   :  { %3201 = vmatprep.subr.bf16.mxu1 %v4154_v16  ;;  %v4182_v16 = vld [vmem:[%s5692_s9 + $0x180] ss:$8 sps:$4 sm:$0xff]  }
 0xb10   :  { %3202 = vmatpush1.bf16.msra.mxu1 %v4152_v0  ;;  %v4187_v0 = vld [vmem:[%s5692_s9 + $0x194] ss:$8 sps:$4 sm:$0xff]  }
 0xb11   :  { %3203 = vmatprep.subr.bf16.mxu1 %v4157_v19  ;;  %v4185_v19 = vld [vmem:[%s5692_s9 + $0x190] ss:$8 sps:$4 sm:$0xff]  }
 0xb14   :  { %3204 = vmatpush1.bf16.msra.mxu1 %v4155_v4  ;;  %v4190_v4 = vld [vmem:[%s5692_s9 + $0x1a4] ss:$8 sps:$4 sm:$0xff]  }
 0xb15   :  { %3226 = vmatprep.subr.bf16.mxu1 %v4160_v7  ;;  %v4188_v7 = vld [vmem:[%s5692_s9 + $0x1a0] ss:$8 sps:$4 sm:$0xff]  }
 0xbaa   :  { %v2681_v22 = vpop.f32.mrb[40].mxu1  ;;  %v2734_v25 = vpop.f32.mrb[56].mxu0 }
 0xbab   :  { %v2682_v26 = vadd.f32 %v2681_v22, %v5511_v38  ;;  %v2735_v27 = vadd.f32 %v2734_v25, %v5515_v6  ;;  %v2683_v29 = vpop.f32.mrb[41].mxu1  ;;  %v2736_v3 = vpop.f32.mrb[57].mxu0  ;;  %v4191_v22 = vld [vmem:[%s5692_s9 + $0x1b0] ss:$8 sps:$4 sm:$0xff]   ;;  %v4196_v25 = vld [vmem:[%s5692_s9 + $0x1c4] ss:$8 sps:$4 sm:$0xff]  }
 0xbac   :  { %v2684_v30 = vadd.f32 %v2683_v29, %v5518_v37  ;;  %v2737_v47 = vadd.f32 %v2736_v3, %v5522_v44  ;;  %v2685_v31 = vpop.f32.mrb[42].mxu1  ;;  %v2738_v32 = vpop.f32.mrb[58].mxu0 }
 0xbad   :  { %v2686_v33 = vadd.f32 %v2685_v31, %v5511_v38  ;;  %v2739_v46 = vadd.f32 %v2738_v32, %v5515_v6  ;;  %v2687_v49 = vpop.f32.mrb[43].mxu1  ;;  %v2740_v34 = vpop.f32.mrb[59].mxu0  ;;  %v2753_v36 = vmax.f32 %v2682_v26, 0.0  ;;  %v2755_v14 = vmax.f32 %v2735_v27, 0.0  ;;  %v4194_v31 = vld [vmem:[%s5692_s9 + $0x1c0] ss:$8 sps:$4 sm:$0xff]  }
 0xbae   :  { %v2688_v35 = vadd.f32 %v2687_v49, %v5518_v37  ;;  %v2741_v28 = vadd.f32 %v2740_v34, %v5522_v44  ;;  %v2754_v43 = vmax.f32 %v2684_v30, 0.0  ;;  %v2756_v23 = vmax.f32 %v2737_v47, 0.0  ;;  %v4199_v34 = vld [vmem:[%s5692_s9 + $0x1d4] ss:$8 sps:$4 sm:$0xff]  }
 0xbaf   :  { %v2757_v41 = vmax.f32 %v2686_v33, 0.0  ;;  %v2759_v42 = vmax.f32 %v2739_v46, 0.0 }
 0xbb0   :  { %v2758_v2 = vmax.f32 %v2688_v35, 0.0  ;;  %v2760_v10 = vmax.f32 %v2741_v28, 0.0 }
 0xbb1   :  { %v2769_v58 = vpack.c.bf16 %v2757_v41, %v2753_v36  ;;  %v5532_v53 = vpack.c.bf16 %v2759_v42, %v2755_v14 }
 0xbb2   :  { %v2770_v9 = vpack.c.bf16 %v2758_v2, %v2754_v43  ;;  %v5534_v57 = vpack.c.bf16 %v2760_v10, %v2756_v23 }
 0xbb4   :  { %3205 = vmatprep.mubr.bf16.mxu1 %v2770_v9 }
 0xbb5   :  { %3206 = vmatmul.mubr.bf16.vlgmr.msra.gmra.mrb[48].mxu1 %v2769_v58  ;;  %v4197_v58 = vld [vmem:[%s5692_s9 + $0x1d0] ss:$8 sps:$4 sm:$0xff]  }
 0xbb6   :  { %3227 = vmatpush1.bf16.msra.mxu1 %v4158_v60 }
 0xbb7   :  { %3228 = vmatprep.subr.bf16.mxu1 %v4163_v13 }
 0xbba   :  { %3229 = vmatpush1.bf16.msra.mxu1 %v4161_v61 }
 0xbbb   :  { %3230 = vmatprep.subr.bf16.mxu1 %v4166_v55 }
 0xbbe   :  { %3231 = vmatpush1.bf16.msra.mxu1 %v4164_v62  ;;  %v4200_v62 = vld [vmem:[%s5692_s9 + $0x1e0] ss:$8 sps:$4 sm:$0xff]  }
 0xbbf   :  { %3232 = vmatprep.subr.bf16.mxu1 %v4169_v63  ;;  %v4205_v63 = vld [vmem:[%s5692_s9 + $0x1f4] ss:$8 sps:$4 sm:$0xff]  }
 0xbc2   :  { %3233 = vmatpush1.bf16.msra.mxu1 %v4167_v15  ;;  %v4203_v15 = vld [vmem:[%s5692_s9 + $0x1f0] ss:$8 sps:$4 sm:$0xff]  }
 0xbc3   :  { %3234 = vmatprep.subr.bf16.mxu1 %v4172_v52  ;;  %v2841_v52 = vld [vmem:[%s5696_s10] sm:$0x3] }
 0xbc6   :  { %3235 = vmatpush1.bf16.msra.mxu1 %v4170_v54  ;;  %v2846_v54 = vrot.slane %v2841_v52, %v4708_v50 }
 0xbc7   :  { %3236 = vmatprep.subr.bf16.mxu1 %v4175_v40  ;;  %v2850_v40 = vrot.slane %v2841_v52, %v4711_v51 }
 0xbca   :  { %3237 = vmatpush1.bf16.msra.mxu1 %v4173_v39 }
 0xbcb   :  { %3238 = vmatprep.subr.bf16.mxu1 %v4178_v12 }
 0xbce   :  { %3239 = vmatpush1.bf16.msra.mxu1 %v4176_v1 }
 0xbcf   :  { %3240 = vmatprep.subr.bf16.mxu1 %v4181_v48 }
 0xbd2   :  { %3241 = vmatpush1.bf16.msra.mxu1 %v4179_v24 }
 0xbd3   :  { %3242 = vmatprep.subr.bf16.mxu1 %v4184_v8 }
 0xbd6   :  { %3243 = vmatpush1.bf16.msra.mxu1 %v4182_v16 }
 0xbd7   :  { %3244 = vmatprep.subr.bf16.mxu1 %v4187_v0 }
 0xbda   :  { %3245 = vmatpush1.bf16.msra.mxu1 %v4185_v19 }
 0xbdb   :  { %3246 = vmatprep.subr.bf16.mxu1 %v4190_v4 }
 0xbde   :  { %3247 = vmatpush1.bf16.msra.mxu1 %v4188_v7 }
 0xbdf   :  { %3248 = vmatprep.subr.bf16.mxu1 %v4193_v21 }
 0xbe1   :  { %v2691_v26 = vpop.f32.mrb[44].mxu1  ;;  %v2744_v27 = vpop.f32.mrb[60].mxu0 }
 0xbe2   :  { %v2692_v29 = vadd.f32 %v2691_v26, %v5511_v38  ;;  %v2745_v3 = vadd.f32 %v2744_v27, %v5515_v6  ;;  %3249 = vmatpush1.bf16.msra.mxu1 %v4191_v22  ;;  %v2693_v30 = vpop.f32.mrb[45].mxu1  ;;  %v2746_v47 = vpop.f32.mrb[61].mxu0 }
 0xbe3   :  { %v2694_v32 = vadd.f32 %v2693_v30, %v5518_v37  ;;  %v2747_v33 = vadd.f32 %v2746_v47, %v5522_v44  ;;  %v2695_v46 = vpop.f32.mrb[46].mxu1  ;;  %v2748_v49 = vpop.f32.mrb[62].mxu0  ;;  %3250 = vmatprep.subr.bf16.mxu1 %v4196_v25 }
 0xbe4   :  { %v2696_v35 = vadd.f32 %v2695_v46, %v5511_v38  ;;  %v2749_v28 = vadd.f32 %v2748_v49, %v5515_v6  ;;  %v2697_v36 = vpop.f32.mrb[47].mxu1  ;;  %v2750_v14 = vpop.f32.mrb[63].mxu0  ;;  %v2761_v43 = vmax.f32 %v2692_v29, 0.0  ;;  %v2763_v23 = vmax.f32 %v2745_v3, 0.0  ;;  %v4202_v6 = vld [vmem:[%s5692_s9 + $0x1e4] ss:$8 sps:$4 sm:$0xff]  }
 0xbe5   :  { %v2698_v41 = vadd.f32 %v2697_v36, %v5518_v37  ;;  %v2751_v42 = vadd.f32 %v2750_v14, %v5522_v44  ;;  %v2762_v9 = vmax.f32 %v2694_v32, 0.0  ;;  %v2764_v60 = vmax.f32 %v2747_v33, 0.0 }
 0xbe6   :  { %v2765_v2 = vmax.f32 %v2696_v35, 0.0  ;;  %v2767_v10 = vmax.f32 %v2749_v28, 0.0  ;;  %3251 = vmatpush1.bf16.msra.mxu1 %v4194_v31 }
 0xbe7   :  { %v2766_v38 = vmax.f32 %v2698_v41, 0.0  ;;  %v2768_v13 = vmax.f32 %v2751_v42, 0.0  ;;  %3252 = vmatprep.subr.bf16.mxu1 %v4199_v34 }
 0xbe8   :  { %v2773_v37 = vpack.c.bf16 %v2765_v2, %v2761_v43  ;;  %v2775_v44 = vpack.c.bf16 %v2767_v10, %v2763_v23 }
 0xbe9   :  { %v2774_v61 = vpack.c.bf16 %v2766_v38, %v2762_v9  ;;  %v2776_v55 = vpack.c.bf16 %v2768_v13, %v2764_v60 }
 0xbea   :  { %3253 = vmatpush1.bf16.msra.mxu1 %v4197_v58 }
 0xbeb   :  { %3215 = vmatprep.mubr.bf16.mxu1 %v2774_v61  ;;  %3254 = vmatprep.subr.bf16.mxu1 %v4202_v6 }
 0xbec   :  { %3216 = vmatmul.mubr.bf16.gmra.mrb[52].mxu1 %v2773_v37 }
 0xbed   :  { %3258 = vmatprep.mubr.bf16.mxu1 %v5534_v57 }
 0xbee   :  { %3255 = vmatpush1.bf16.msra.mxu1 %v4200_v62 }
 0xbef   :  { %3256 = vmatprep.subr.bf16.mxu1 %v4205_v63 }
 0xbf2   :  { %3257 = vmatpush1.bf16.msra.mxu1 %v4203_v15 }
 0xbf5   :  { %3259 = vmatmul.mubr.bf16.vlgmr.msra.gmra.mrb[48].mxu1 %v5532_v53 }
 0xbf6   :  { %3268 = vmatprep.mubr.bf16.mxu1 %v2776_v55 }
 0xbfd   :  { %3269 = vmatmul.mubr.bf16.gmra.mrb[52].mxu1 %v2775_v44 }
 0xcc8   :  { %v3260_v57 = vpop.f32.mrb[48].mxu1 }
 0xcc9   :  { %v3803_v39 = vadd.f32 %v3260_v57, %v2846_v54  ;;  %v3262_v12 = vpop.f32.mrb[49].mxu1 }
 0xcca   :  { %v3804_v1 = vadd.f32 %v3262_v12, %v2850_v40  ;;  %v3264_v48 = vpop.f32.mrb[50].mxu1 }
 0xccb   :  { %v3279_v24 = vadd.f32 %v3803_v39, %v5378_v20  ;;  %v3805_v8 = vadd.f32 %v3264_v48, %v2846_v54  ;;  %v3266_v16 = vpop.f32.mrb[51].mxu1 }
 0xccc   :  { %v3280_v53 = vadd.f32 %v3804_v1, %v5372_v5  ;;  %v3806_v0 = vadd.f32 %v3266_v16, %v2850_v40  ;;  %v3287_v1 = vld [vmem:[%s5697_s11] sm:$0x3] }
 0xccd   :  { %v3281_v19 = vadd.f32 %v3805_v8, %v5381_v11  ;;  %v3288_v8 = vld [vmem:[%s5698_s12] sm:$0x3] }
 0xcce   :  { %v3282_v4 = vadd.f32 %v3806_v0, %v5375_v56  ;;  %v3289_v7 = vadd.f32 %v3280_v53, %v3279_v24  ;;  %v3361_v0 = vrot.slane %v3287_v1, %v4711_v51 }
 0xcd0   :  { %v3270_v21 = vpop.f32.mrb[52].mxu1  ;;  %3290 = vadd.xlane.f32.xlu1 %v3289_v7  ;;  %v3292_v22 = vadd.f32 %v3282_v4, %v3281_v19  ;;  %v3380_v7 = vrot.slane %v3288_v8, %v4711_v51 }
 0xcd1   :  { %v3807_v25 = vadd.f32 %v3270_v21, %v2846_v54  ;;  %v3272_v26 = vpop.f32.mrb[53].mxu1 }
 0xcd2   :  { %v3808_v27 = vadd.f32 %v3272_v26, %v2850_v40  ;;  %v3274_v29 = vpop.f32.mrb[54].mxu1  ;;  %3293 = vadd.xlane.f32.xlu0 %v3292_v22 }
 0xcd3   :  { %v3283_v20 = vadd.f32 %v3807_v25, %v5483_v17  ;;  %v3809_v3 = vadd.f32 %v3274_v29, %v2846_v54  ;;  %v3276_v30 = vpop.f32.mrb[55].mxu1 }
 0xcd4   :  { %v3284_v5 = vadd.f32 %v3808_v27, %v5477_v59  ;;  %v3810_v47 = vadd.f32 %v3276_v30, %v2850_v40 }
 0xcd5   :  { %v3285_v11 = vadd.f32 %v3809_v3, %v5486_v18 }
 0xcd6   :  { %v3286_v56 = vadd.f32 %v3810_v47, %v5480_v45  ;;  %v3295_v31 = vadd.f32 %v3284_v5, %v3283_v20 }
 0xcd8   :  { %3296 = vadd.xlane.f32.xlu1 %v3295_v31  ;;  %v3298_v32 = vadd.f32 %v3286_v56, %v3285_v11 }
 0xcda   :  { %3299 = vadd.xlane.f32.xlu0 %v3298_v32 }
 0xd5d   :  { %v3291_v33 = vpop.xlane.xlu1 %3290 }
 0xd5e   :  { %v3301_v46 = vmul.f32 0.00390625, %v3291_v33 }
 0xd5f   :  { %v3294_v49 = vpop.xlane.xlu0 %3293 }
 0xd60   :  { %v3305_v34 = vsub.f32 %v3279_v24, %v3301_v46  ;;  %v3306_v35 = vsub.f32 %v3280_v53, %v3301_v46  ;;  %v3302_v28 = vmul.f32 0.00390625, %v3294_v49  ;;  %v3357_v53 = vrot.slane %v3287_v1, %v4708_v50 }
 0xd62   :  { %v3307_v17 = vsub.f32 %v3281_v19, %v3302_v28  ;;  %v3308_v36 = vsub.f32 %v3282_v4, %v3302_v28  ;;  %v3313_v14 = vmul.f32 %v3305_v34, %v3305_v34  ;;  %v3314_v41 = vmul.f32 %v3306_v35, %v3306_v35 }
 0xd63   :  { %v3376_v4 = vrot.slane %v3288_v8, %v4708_v50 }
 0xd64   :  { %v3321_v59 = vadd.f32 %v3314_v41, %v3313_v14  ;;  %v3315_v42 = vmul.f32 %v3307_v17, %v3307_v17  ;;  %v3316_v43 = vmul.f32 %v3308_v36, %v3308_v36 }
 0xd65   :  { %v3297_v18 = vpop.xlane.xlu1 %3296 }
 0xd66   :  { %v3303_v23 = vmul.f32 0.00390625, %v3297_v18  ;;  %3322 = vadd.xlane.f32.xlu1 %v3321_v59  ;;  %v3324_v45 = vadd.f32 %v3316_v43, %v3315_v42 }
 0xd67   :  { %v3300_v2 = vpop.xlane.xlu0 %3299 }
 0xd68   :  { %v3309_v10 = vsub.f32 %v3283_v20, %v3303_v23  ;;  %v3310_v58 = vsub.f32 %v3284_v5, %v3303_v23  ;;  %v3304_v9 = vmul.f32 0.00390625, %v3300_v2  ;;  %3325 = vadd.xlane.f32.xlu0 %v3324_v45 }
 0xd6a   :  { %v3311_v60 = vsub.f32 %v3285_v11, %v3304_v9  ;;  %v3312_v38 = vsub.f32 %v3286_v56, %v3304_v9  ;;  %v3317_v13 = vmul.f32 %v3309_v10, %v3309_v10  ;;  %v3318_v6 = vmul.f32 %v3310_v58, %v3310_v58 }
 0xd6c   :  { %v3327_v37 = vadd.f32 %v3318_v6, %v3317_v13  ;;  %v3319_v44 = vmul.f32 %v3311_v60, %v3311_v60  ;;  %v3320_v61 = vmul.f32 %v3312_v38, %v3312_v38 }
 0xd6e   :  { %3328 = vadd.xlane.f32.xlu1 %v3327_v37  ;;  %v3330_v55 = vadd.f32 %v3320_v61, %v3319_v44 }
 0xd70   :  { %3331 = vadd.xlane.f32.xlu0 %v3330_v55 }
 0xdf3   :  { %v3323_v62 = vpop.xlane.xlu1 %3322 }
 0xdf4   :  { %v3333_v63 = vmul.f32 0.00390625, %v3323_v62 }
 0xdf5   :  { %v3326_v15 = vpop.xlane.xlu0 %3325 }
 0xdf6   :  { %v3337_v52 = vadd.f32 1e-05, %v3333_v63  ;;  %v3334_v54 = vmul.f32 0.00390625, %v3326_v15 }
 0xdf8   :  { %4278 = vrsqrt.f32 %v3337_v52  ;;  %v3338_v40 = vadd.f32 1e-05, %v3334_v54 }
 0xdfa   :  { %4280 = vrsqrt.f32 %v3338_v40 }
 0xdfb   :  { %v3329_v57 = vpop.xlane.xlu1 %3328 }
 0xdfc   :  { %v3335_v39 = vmul.f32 0.00390625, %v3329_v57 }
 0xdfd   :  { %v3332_v12 = vpop.xlane.xlu0 %3331 }
 0xdfe   :  { %v3339_v48 = vadd.f32 1e-05, %v3335_v39  ;;  %v3336_v24 = vmul.f32 0.00390625, %v3332_v12 }
 0xe00   :  { %4282 = vrsqrt.f32 %v3339_v48  ;;  %v3340_v16 = vadd.f32 1e-05, %v3336_v24 }
 0xe02   :  { %v4279_v19 = vpop.eup %4278  ;;  %4284 = vrsqrt.f32 %v3340_v16 }
 0xe03   :  { %v3345_v21 = vmul.f32 %v4279_v19, %v3305_v34  ;;  %v3346_v22 = vmul.f32 %v4279_v19, %v3306_v35 }
 0xe04   :  { %v4281_v25 = vpop.eup %4280 }
 0xe05   :  { %v3364_v26 = vmul.f32 %v3357_v53, %v3345_v21  ;;  %v3365_v27 = vmul.f32 %v3361_v0, %v3346_v22  ;;  %v3347_v29 = vmul.f32 %v4281_v25, %v3307_v17  ;;  %v3348_v20 = vmul.f32 %v4281_v25, %v3308_v36 }
 0xe07   :  { %v3383_v3 = vadd.f32 %v3376_v4, %v3364_v26  ;;  %v3384_v30 = vadd.f32 %v3380_v7, %v3365_v27  ;;  %v3366_v5 = vmul.f32 %v3357_v53, %v3347_v29  ;;  %v3367_v47 = vmul.f32 %v3361_v0, %v3348_v20 }
 0xe09   :  { %3391 = vst [vmem:[%s5699_s13] sm:$0xff] %v3383_v3  ;;  %3392 = vst [vmem:[%s5699_s13 + $0x8] sm:$0xff] %v3384_v30  ;;  %v3385_v50 = vadd.f32 %v3376_v4, %v3366_v5  ;;  %v3386_v51 = vadd.f32 %v3380_v7, %v3367_v47 }
 0xe0a   :  { %v4283_v11 = vpop.eup %4282 }
 0xe0b   :  { %3393 = vst [vmem:[%s5699_s13 + $0x10] sm:$0xff] %v3385_v50  ;;  %3394 = vst [vmem:[%s5699_s13 + $0x18] sm:$0xff] %v3386_v51  ;;  %v3349_v56 = vmul.f32 %v4283_v11, %v3309_v10  ;;  %v3350_v31 = vmul.f32 %v4283_v11, %v3310_v58 }
 0xe0c   :  { %v4285_v32 = vpop.eup %4284 }
 0xe0d   :  { %v3368_v33 = vmul.f32 %v3357_v53, %v3349_v56  ;;  %v3369_v46 = vmul.f32 %v3361_v0, %v3350_v31  ;;  %v3351_v49 = vmul.f32 %v4285_v32, %v3311_v60  ;;  %v3352_v34 = vmul.f32 %v4285_v32, %v3312_v38 }
 0xe0f   :  { %v3387_v35 = vadd.f32 %v3376_v4, %v3368_v33  ;;  %v3388_v28 = vadd.f32 %v3380_v7, %v3369_v46  ;;  %v3370_v17 = vmul.f32 %v3357_v53, %v3351_v49  ;;  %v3371_v36 = vmul.f32 %v3361_v0, %v3352_v34 }
 0xe11   :  { %3395 = vst [vmem:[%s5699_s13 + $0x20] sm:$0xff] %v3387_v35  ;;  %3396 = vst [vmem:[%s5699_s13 + $0x28] sm:$0xff] %v3388_v28  ;;  %v3389_v14 = vadd.f32 %v3376_v4, %v3370_v17  ;;  %v3390_v41 = vadd.f32 %v3380_v7, %v3371_v36 }
 0xe13   :  { %3397 = vst [vmem:[%s5699_s13 + $0x30] sm:$0xff] %v3389_v14  ;;  %3398 = vst [vmem:[%s5699_s13 + $0x38] sm:$0xff] %v3390_v41 }

</bundles_post_ra>
